<compile_context>
chip_gen: v7x
topology: tpu7x:2x2x1
jax: 0.10.0
libtpu: 0.0.40
codegen_flags: <defaults>
</compile_context>

<pallas_src>
import functools

import numpy as np
import jax
import jax.numpy as jnp
from jax import lax
from jax.experimental import pallas as pl
from jax.experimental.pallas import tpu as pltpu

EMB = 32    # embedding dim
LIN = 64    # first linear out
H1 = 128    # lstm1 hidden (per direction)
H2 = 64     # lstm2 hidden (per direction)
HP = 128    # lane-padded per-gate width used for the H2=64 layer
OUT = 6     # output classes


# ---------------------------------------------------------------------------
# Pallas kernels
# ---------------------------------------------------------------------------
def _lin_relu_gates_kernel(x_ref, w1_ref, b1_ref, wih_ref, bg_ref, o_ref):
    # x:(N,EMB) -> ReLU(x@W1+b1) -> @[Wih_fwd | Wih_bwd] + (b_ih+b_hh) -> (N, 8*H1)
    x = x_ref[...].astype(jnp.bfloat16)
    h = jnp.dot(x, w1_ref[...], preferred_element_type=jnp.float32) + b1_ref[...]
    h = jnp.maximum(h, 0.0).astype(jnp.bfloat16)
    o_ref[...] = jnp.dot(h, wih_ref[...], preferred_element_type=jnp.float32) + bg_ref[...]


def _gates_kernel(x_ref, wih_ref, bg_ref, o_ref):
    # Hoisted input projection for both directions of an LSTM layer: (N,In) @ (In, 8*Hp) + bias.
    x = x_ref[...].astype(jnp.bfloat16)
    o_ref[...] = jnp.dot(x, wih_ref[...], preferred_element_type=jnp.float32) + bg_ref[...]


def _lstm_cell(pre, c, hidden):
    # PyTorch gate order: i, f, g, o; all slices are lane-aligned (hidden is 128).
    i = jax.nn.sigmoid(pre[:, 0 * hidden:1 * hidden])
    f = jax.nn.sigmoid(pre[:, 1 * hidden:2 * hidden])
    g = jnp.tanh(pre[:, 2 * hidden:3 * hidden])
    o = jax.nn.sigmoid(pre[:, 3 * hidden:4 * hidden])
    c_new = f * c + i * g
    h_new = o * jnp.tanh(c_new)
    return h_new, c_new


def _bilstm_seq_kernel(g_ref, whh_ref, o_ref, *, seq_len, hidden):
    # One grid step per direction (0 = fwd, 1 = bwd); the whole sequence stays in VMEM and the
    # time loop is fully unrolled at compile time (no per-time-step grid / DMA).
    d = pl.program_id(0)
    whh = whh_ref[0]                                   # (H, 4H) bf16
    b = o_ref.shape[1]
    h = jnp.zeros((b, hidden), jnp.float32)
    c = jnp.zeros((b, hidden), jnp.float32)
    for s in range(seq_len):                           # static, fully unrolled
        t = jnp.where(d == 0, s, seq_len - 1 - s)
        pre = g_ref[t] + jnp.dot(h.astype(jnp.bfloat16), whh,
                                 preferred_element_type=jnp.float32)   # (B, 4H) f32
        h, c = _lstm_cell(pre, c, hidden)
        o_ref[t] = h                                   # out_spec routes fwd->[0:H), bwd->[H:2H)


def _bilstm_head_kernel(g_ref, whh_ref, wout_ref, o_ref, *, seq_len, hidden):
    # Second BiLSTM layer with the head fused: running sum of h over time, then the per-direction
    # partial of the output Linear (mean commutes with the affine head).
    d = pl.program_id(0)
    whh = whh_ref[0]                                   # (HP, 4*HP) bf16 (lane/row padded)
    b = o_ref.shape[1]
    h = jnp.zeros((b, hidden), jnp.float32)
    c = jnp.zeros((b, hidden), jnp.float32)
    hsum = jnp.zeros((b, hidden), jnp.float32)
    for s in range(seq_len):                           # static, fully unrolled
        t = jnp.where(d == 0, s, seq_len - 1 - s)
        pre = g_ref[t] + jnp.dot(h.astype(jnp.bfloat16), whh,
                                 preferred_element_type=jnp.float32)
        h, c = _lstm_cell(pre, c, hidden)
        hsum = hsum + h
    hmean = hsum * (1.0 / seq_len)
    o_ref[0] = jnp.dot(hmean, wout_ref[0], preferred_element_type=jnp.float32)   # (B, OUT)


# ---------------------------------------------------------------------------
# pallas_call wrappers
# ---------------------------------------------------------------------------
def lin_relu_gates(x2d, packed):
    n = x2d.shape[0]
    return pl.pallas_call(
        _lin_relu_gates_kernel,
        out_shape=jax.ShapeDtypeStruct((n, 8 * H1), jnp.float32),
    )(x2d, packed["w1"], packed["b1"], packed["wih1"], packed["bg1"])


def gates(x2d, wih, bg):
    n = x2d.shape[0]
    return pl.pallas_call(
        _gates_kernel,
        out_shape=jax.ShapeDtypeStruct((n, wih.shape[1]), jnp.float32),
    )(x2d, wih, bg)


def bilstm_layer1(g_tbf, whh):
    # g_tbf: (T, B, 8*H1) precomputed gates; whh: (2, H1, 4*H1) bf16.
    T, B, _ = g_tbf.shape
    kernel = functools.partial(_bilstm_seq_kernel, seq_len=T, hidden=H1)
    return pl.pallas_call(
        kernel,
        out_shape=jax.ShapeDtypeStruct((T, B, 2 * H1), jnp.float32),
        grid_spec=pltpu.PrefetchScalarGridSpec(
            num_scalar_prefetch=0,
            grid=(2,),                                            # direction
            in_specs=[
                pl.BlockSpec((T, B, 4 * H1), lambda d: (0, 0, d)),
                pl.BlockSpec((1, H1, 4 * H1), lambda d: (d, 0, 0)),
            ],
            out_specs=pl.BlockSpec((T, B, H1), lambda d: (0, 0, d)),
        ),
        compiler_params=pltpu.CompilerParams(
            dimension_semantics=("parallel",)),                   # fwd/bwd on separate TCs (v7x)
    )(g_tbf, whh)


def bilstm2_head(g_tbf, whh, wout):
    # g_tbf: (T, B, 8*HP) padded gates; whh: (2, HP, 4*HP) bf16; wout: (2, HP, OUT) f32.
    T, B, _ = g_tbf.shape
    kernel = functools.partial(_bilstm_head_kernel, seq_len=T, hidden=HP)
    return pl.pallas_call(
        kernel,
        out_shape=jax.ShapeDtypeStruct((2, B, OUT), jnp.float32),
        grid_spec=pltpu.PrefetchScalarGridSpec(
            num_scalar_prefetch=0,
            grid=(2,),
            in_specs=[
                pl.BlockSpec((T, B, 4 * HP), lambda d: (0, 0, d)),
                pl.BlockSpec((1, HP, 4 * HP), lambda d: (d, 0, 0)),
                pl.BlockSpec((1, HP, OUT), lambda d: (d, 0, 0)),
            ],
            out_specs=pl.BlockSpec((1, B, OUT), lambda d: (d, 0, 0)),
        ),
        compiler_params=pltpu.CompilerParams(
            dimension_semantics=("parallel",)),
    )(g_tbf, whh, wout)


# ---------------------------------------------------------------------------
# Parameters (deterministic, PyTorch-style shapes) + packing for the kernels
# ---------------------------------------------------------------------------
def init_params(key, vocab_size):
    ks = jax.random.split(key, 8)

    def unif(k, shape, fan_in):
        bound = 1.0 / np.sqrt(fan_in)
        return jax.random.uniform(k, shape, jnp.float32, -bound, bound)

    p = {}
    p["emb"] = jax.random.normal(ks[0], (vocab_size, EMB), jnp.float32)
    p["w1"] = unif(ks[1], (EMB, LIN), EMB)
    p["b1"] = unif(ks[2], (1, LIN), EMB)

    def lstm_params(kbase, in_dim, hdim):
        k = jax.random.split(kbase, 8)
        d = {}
        for di, tag in enumerate(["f", "b"]):
            wih = unif(k[4 * di + 0], (4 * hdim, in_dim), hdim)   # torch weight_ih
            whh = unif(k[4 * di + 1], (4 * hdim, hdim), hdim)     # torch weight_hh
            bih = unif(k[4 * di + 2], (4 * hdim,), hdim)
            bhh = unif(k[4 * di + 3], (4 * hdim,), hdim)
            d["wih_" + tag] = wih.T                               # (In, 4H) for x @ W
            d["whh_" + tag] = whh.T                               # (H, 4H)
            d["b_" + tag] = (bih + bhh).reshape(1, 4 * hdim)
        return d

    p["lstm1"] = lstm_params(ks[3], LIN, H1)
    p["lstm2"] = lstm_params(ks[4], 2 * H1, H2)
    p["w_out"] = unif(ks[5], (2 * H2, OUT), 2 * H2)
    p["b_out"] = unif(ks[6], (1, OUT), 2 * H2)
    return p


def _pad_gate_cols(w, h, hp):
    # w: (..., 4*h) -> (..., 4*hp): each of the 4 gate blocks is zero-padded on lanes to width hp.
    parts = []
    for k in range(4):
        blk = w[..., k * h:(k + 1) * h]
        pad_width = [(0, 0)] * (blk.ndim - 1) + [(0, hp - h)]
        parts.append(jnp.pad(blk, pad_width))
    return jnp.concatenate(parts, axis=-1)


def pack_params(p):
    # Packed / padded / bf16 weights consumed by the Pallas pipeline.
    bf = jnp.bfloat16
    l1, l2 = p["lstm1"], p["lstm2"]
    packed = {
        "emb": p["emb"],
        "w1": p["w1"].astype(bf),                                              # (32, 64)
        "b1": p["b1"],                                                         # (1, 64)
        "wih1": jnp.concatenate([l1["wih_f"], l1["wih_b"]], axis=1).astype(bf),  # (64, 1024)
        "bg1": jnp.concatenate([l1["b_f"], l1["b_b"]], axis=1),                  # (1, 1024)
        "whh1": jnp.stack([l1["whh_f"], l1["whh_b"]], axis=0).astype(bf),        # (2, 128, 512)
        "b_out": p["b_out"],                                                     # (1, 6)
    }
    # layer 2: pad each 64-wide gate slab to 128 lanes (zeros stay zero through the recurrence).
    wih2_f = _pad_gate_cols(l2["wih_f"], H2, HP)                                 # (256, 512)
    wih2_b = _pad_gate_cols(l2["wih_b"], H2, HP)
    packed["wih2"] = jnp.concatenate([wih2_f, wih2_b], axis=1).astype(bf)        # (256, 1024)
    bg2_f = _pad_gate_cols(l2["b_f"], H2, HP)
    bg2_b = _pad_gate_cols(l2["b_b"], H2, HP)
    packed["bg2"] = jnp.concatenate([bg2_f, bg2_b], axis=1)                      # (1, 1024)
    whh2_f = jnp.pad(_pad_gate_cols(l2["whh_f"], H2, HP), ((0, HP - H2), (0, 0)))  # (128, 512)
    whh2_b = jnp.pad(_pad_gate_cols(l2["whh_b"], H2, HP), ((0, HP - H2), (0, 0)))
    packed["whh2"] = jnp.stack([whh2_f, whh2_b], axis=0).astype(bf)              # (2, 128, 512)
    wout_f = jnp.pad(p["w_out"][:H2, :], ((0, HP - H2), (0, 0)))                 # (128, 6)
    wout_b = jnp.pad(p["w_out"][H2:, :], ((0, HP - H2), (0, 0)))
    packed["wout"] = jnp.stack([wout_f, wout_b], axis=0)                         # (2, 128, 6) f32
    return packed


# ---------------------------------------------------------------------------
# Model forward (Pallas pipeline)
# ---------------------------------------------------------------------------
def lstm_model_forward(ids, packed):
    # ids: (B, 1, T) int32
    ids = ids[:, 0, :]                               # x.squeeze(1)        -> (B, T)
    emb = jnp.take(packed["emb"], ids, axis=0)       # embedding gather (plain-JAX glue)
    x = jnp.transpose(emb, (1, 0, 2))                # time-major (T, B, EMB)
    T, B, _ = x.shape

    # layer 1: Linear+ReLU fused with the hoisted input projection for both directions
    g1 = lin_relu_gates(x.reshape(T * B, EMB), packed)                # (T*B, 8*H1)
    h1 = bilstm_layer1(g1.reshape(T, B, 8 * H1), packed["whh1"])      # (T, B, 2*H1)

    # layer 2: hoisted (lane-padded) input projection, recurrence + fused mean/output head
    g2 = gates(h1.reshape(T * B, 2 * H1), packed["wih2"], packed["bg2"])   # (T*B, 8*HP)
    parts = bilstm2_head(g2.reshape(T, B, 8 * HP), packed["whh2"], packed["wout"])  # (2, B, OUT)

    return parts[0] + parts[1] + packed["b_out"]     # tiny cross-direction sum + bias (plain JAX)


# ---------------------------------------------------------------------------
# Pure-JAX f32 reference (for a sanity check)
# ---------------------------------------------------------------------------
def _ref_lstm_dir(x_tbf, wih_t, whh_t, bias, hidden, reverse):
    _, B, _ = x_tbf.shape
    xs = x_tbf[::-1] if reverse else x_tbf

    def step(carry, x_t):
        h, c = carry
        gate = x_t @ wih_t + h @ whh_t + bias
        i = jax.nn.sigmoid(gate[:, 0 * hidden:1 * hidden])
        f = jax.nn.sigmoid(gate[:, 1 * hidden:2 * hidden])
        g = jnp.tanh(gate[:, 2 * hidden:3 * hidden])
        o = jax.nn.sigmoid(gate[:, 3 * hidden:4 * hidden])
        c = f * c + i * g
        h = o * jnp.tanh(c)
        return (h, c), h

    init = (jnp.zeros((B, hidden), jnp.float32), jnp.zeros((B, hidden), jnp.float32))
    _, hs = lax.scan(step, init, xs)
    return hs[::-1] if reverse else hs


def ref_forward(ids, params):
    ids = ids[:, 0, :]
    emb = jnp.take(params["emb"], ids, axis=0)
    x = jnp.transpose(emb, (1, 0, 2))
    T, B, _ = x.shape
    h = jnp.maximum(x.reshape(T * B, EMB) @ params["w1"] + params["b1"], 0.0)
    h = h.reshape(T, B, LIN)
    for lp, hd in ((params["lstm1"], H1), (params["lstm2"], H2)):
        f = _ref_lstm_dir(h, lp["wih_f"], lp["whh_f"], lp["b_f"], hd, False)
        b = _ref_lstm_dir(h, lp["wih_b"], lp["whh_b"], lp["b_b"], hd, True)
        h = jnp.concatenate([f, b], axis=-1)
    return jnp.mean(h, axis=0) @ params["w_out"] + params["b_out"]


# ---------------------------------------------------------------------------
if __name__ == "__main__":
    key = jax.random.PRNGKey(0)
    pkey, dkey = jax.random.split(key)

    vocab_size = 1000       # small vocab (module default 30522; parameterized)
    B, T = 2, 8             # batch, sequence length

    params = init_params(pkey, vocab_size)
    packed = pack_params(params)
    ids = jax.random.randint(dkey, (B, 1, T), 0, vocab_size, dtype=jnp.int32)

    fwd = jax.jit(lstm_model_forward)
    out = jax.block_until_ready(fwd(ids, packed))
    assert out.shape == (B, OUT) and out.dtype == jnp.float32

    ref = jax.block_until_ready(ref_forward(ids, params))
    np.testing.assert_allclose(np.asarray(out), np.asarray(ref), rtol=2e-2, atol=2e-2)

    print("KERNEL_OK")
</pallas_src>

<mosaic_0001>
module attributes {stable_mosaic.version = 11 : i64} {
  func.func @_lin_relu_gates_kernel(%arg0: memref<16x32xf32, #tpu.memory_space<vmem>>, %arg1: memref<32x64xbf16, #tpu.memory_space<vmem>>, %arg2: memref<1x64xf32, #tpu.memory_space<vmem>>, %arg3: memref<64x1024xbf16, #tpu.memory_space<vmem>>, %arg4: memref<1x1024xf32, #tpu.memory_space<vmem>>, %arg5: memref<16x1024xf32, #tpu.memory_space<vmem>>) attributes {dimension_semantics = [], scalar_prefetch = 0 : i64, scratch_operands = 0 : i64, tpu.core_type = #tpu.core_type<tc>} {
    %c0 = arith.constant 0 : index
    %c0_0 = arith.constant 0 : index
    %0 = vector.load %arg0[%c0, %c0_0] : memref<16x32xf32, #tpu.memory_space<vmem>>, vector<16x32xf32>
    %1 = arith.truncf %0 : vector<16x32xf32> to vector<16x32xbf16>
    %c0_1 = arith.constant 0 : index
    %c0_2 = arith.constant 0 : index
    %2 = vector.load %arg1[%c0_1, %c0_2] : memref<32x64xbf16, #tpu.memory_space<vmem>>, vector<32x64xbf16>
    %cst = arith.constant dense<0.000000e+00> : vector<16x64xf32>
    %3 = tpu.matmul %1, %2, %cst {dimension_numbers = #tpu.dot_dimension_numbers<[1], [0], [0], [1], [0, 0, 1, 1], [], []>} : vector<16x32xbf16>, vector<32x64xbf16>, vector<16x64xf32> -> vector<16x64xf32>
    %c0_3 = arith.constant 0 : index
    %c0_4 = arith.constant 0 : index
    %4 = vector.load %arg2[%c0_3, %c0_4] : memref<1x64xf32, #tpu.memory_space<vmem>>, vector<1x64xf32>
    %5 = vector.broadcast %4 : vector<1x64xf32> to vector<16x64xf32>
    %6 = arith.addf %3, %5 : vector<16x64xf32>
    %cst_5 = arith.constant 0.000000e+00 : f32
    %7 = vector.broadcast %cst_5 : f32 to vector<16x64xf32>
    %8 = arith.maximumf %6, %7 : vector<16x64xf32>
    %9 = arith.truncf %8 : vector<16x64xf32> to vector<16x64xbf16>
    %c0_6 = arith.constant 0 : index
    %c0_7 = arith.constant 0 : index
    %10 = vector.load %arg3[%c0_6, %c0_7] : memref<64x1024xbf16, #tpu.memory_space<vmem>>, vector<64x1024xbf16>
    %cst_8 = arith.constant dense<0.000000e+00> : vector<16x1024xf32>
    %11 = tpu.matmul %9, %10, %cst_8 {dimension_numbers = #tpu.dot_dimension_numbers<[1], [0], [0], [1], [0, 0, 1, 1], [], []>} : vector<16x64xbf16>, vector<64x1024xbf16>, vector<16x1024xf32> -> vector<16x1024xf32>
    %c0_9 = arith.constant 0 : index
    %c0_10 = arith.constant 0 : index
    %12 = vector.load %arg4[%c0_9, %c0_10] : memref<1x1024xf32, #tpu.memory_space<vmem>>, vector<1x1024xf32>
    %13 = vector.broadcast %12 : vector<1x1024xf32> to vector<16x1024xf32>
    %14 = arith.addf %11, %13 : vector<16x1024xf32>
    %c0_11 = arith.constant 0 : index
    %c0_12 = arith.constant 0 : index
    %15 = vector.load %arg5[%c0_11, %c0_12] : memref<16x1024xf32, #tpu.memory_space<vmem>>, vector<16x1024xf32>
    tpu.vector_store %arg5[%c0_11, %c0_12], %14 {strides = array<i32>} : memref<16x1024xf32, #tpu.memory_space<vmem>>, vector<16x1024xf32>,
    return
  }
}

module attributes {stable_mosaic.version = 11 : i64} {
  func.func @_gates_kernel(%arg0: memref<16x256xf32, #tpu.memory_space<vmem>>, %arg1: memref<256x1024xbf16, #tpu.memory_space<vmem>>, %arg2: memref<1x1024xf32, #tpu.memory_space<vmem>>, %arg3: memref<16x1024xf32, #tpu.memory_space<vmem>>) attributes {dimension_semantics = [], scalar_prefetch = 0 : i64, scratch_operands = 0 : i64, tpu.core_type = #tpu.core_type<tc>} {
    %c0 = arith.constant 0 : index
    %c0_0 = arith.constant 0 : index
    %0 = vector.load %arg0[%c0, %c0_0] : memref<16x256xf32, #tpu.memory_space<vmem>>, vector<16x256xf32>
    %1 = arith.truncf %0 : vector<16x256xf32> to vector<16x256xbf16>
    %c0_1 = arith.constant 0 : index
    %c0_2 = arith.constant 0 : index
    %2 = vector.load %arg1[%c0_1, %c0_2] : memref<256x1024xbf16, #tpu.memory_space<vmem>>, vector<256x1024xbf16>
    %cst = arith.constant dense<0.000000e+00> : vector<16x1024xf32>
    %3 = tpu.matmul %1, %2, %cst {dimension_numbers = #tpu.dot_dimension_numbers<[1], [0], [0], [1], [0, 0, 1, 1], [], []>} : vector<16x256xbf16>, vector<256x1024xbf16>, vector<16x1024xf32> -> vector<16x1024xf32>
    %c0_3 = arith.constant 0 : index
    %c0_4 = arith.constant 0 : index
    %4 = vector.load %arg2[%c0_3, %c0_4] : memref<1x1024xf32, #tpu.memory_space<vmem>>, vector<1x1024xf32>
    %5 = vector.broadcast %4 : vector<1x1024xf32> to vector<16x1024xf32>
    %6 = arith.addf %3, %5 : vector<16x1024xf32>
    %c0_5 = arith.constant 0 : index
    %c0_6 = arith.constant 0 : index
    %7 = vector.load %arg3[%c0_5, %c0_6] : memref<16x1024xf32, #tpu.memory_space<vmem>>, vector<16x1024xf32>
    tpu.vector_store %arg3[%c0_5, %c0_6], %6 {strides = array<i32>} : memref<16x1024xf32, #tpu.memory_space<vmem>>, vector<16x1024xf32>,
    return
  }
}

module attributes {stable_mosaic.version = 11 : i64} {
  func.func @_bilstm_seq_kernel(%arg0: i32, %arg1: memref<8x2x512xf32, #tpu.memory_space<vmem>>, %arg2: memref<1x128x512xbf16, #tpu.memory_space<vmem>>, %arg3: memref<8x2x128xf32, #tpu.memory_space<vmem>>) attributes {dimension_semantics = [#tpu.dimension_semantics<parallel>], iteration_bounds = array<i64: 2>, scalar_prefetch = 0 : i64, scratch_operands = 0 : i64, tpu.core_type = #tpu.core_type<tc>, window_params = [{transform_indices = @transform_0, window_bounds = array<i64: 8, 2, 512>}, {transform_indices = @transform_1, window_bounds = array<i64: 1, 128, 512>}, {transform_indices = @transform_2, window_bounds = array<i64: 8, 2, 128>}]} {
    %c0 = arith.constant 0 : index
    %c0_0 = arith.constant 0 : index
    %c0_1 = arith.constant 0 : index
    %0 = vector.load %arg2[%c0, %c0_0, %c0_1] : memref<1x128x512xbf16, #tpu.memory_space<vmem>>, vector<1x128x512xbf16>
    %1 = vector.shape_cast %0 : vector<1x128x512xbf16> to vector<128x512xbf16>
    %cst = arith.constant 0.000000e+00 : f32
    %2 = vector.broadcast %cst : f32 to vector<2x128xf32>
    %cst_2 = arith.constant 0.000000e+00 : f32
    %3 = vector.broadcast %cst_2 : f32 to vector<2x128xf32>
    %c0_i32 = arith.constant 0 : i32
    %4 = arith.cmpi eq, %arg0, %c0_i32 : i32
    %c0_i32_3 = arith.constant 0 : i32
    %c7_i32 = arith.constant 7 : i32
    %5 = arith.select %4, %c0_i32_3, %c7_i32 : i32
    %6 = arith.index_cast %5 : i32 to index
    %c0_4 = arith.constant 0 : index
    %c0_5 = arith.constant 0 : index
    %7 = vector.load %arg1[%6, %c0_4, %c0_5] : memref<8x2x512xf32, #tpu.memory_space<vmem>>, vector<1x2x512xf32>
    %8 = vector.shape_cast %7 : vector<1x2x512xf32> to vector<2x512xf32>
    %9 = arith.truncf %2 : vector<2x128xf32> to vector<2x128xbf16>
    %cst_6 = arith.constant dense<0.000000e+00> : vector<2x512xf32>
    %10 = tpu.matmul %9, %1, %cst_6 {dimension_numbers = #tpu.dot_dimension_numbers<[1], [0], [0], [1], [0, 0, 1, 1], [], []>} : vector<2x128xbf16>, vector<128x512xbf16>, vector<2x512xf32> -> vector<2x512xf32>
    %11 = arith.addf %8, %10 : vector<2x512xf32>
    %12 = vector.extract_strided_slice %11 {offsets = [0, 0], sizes = [2, 128], strides = [1, 1]} : vector<2x512xf32> to vector<2x128xf32>
    %13 = arith.negf %12 : vector<2x128xf32>
    %14 = math.exp %13 : vector<2x128xf32>
    %cst_7 = arith.constant 1.000000e+00 : f32
    %15 = vector.broadcast %cst_7 : f32 to vector<2x128xf32>
    %16 = arith.addf %15, %14 : vector<2x128xf32>
    %17 = arith.divf %15, %16 : vector<2x128xf32>
    %18 = vector.extract_strided_slice %11 {offsets = [0, 128], sizes = [2, 128], strides = [1, 1]} : vector<2x512xf32> to vector<2x128xf32>
    %19 = arith.negf %18 : vector<2x128xf32>
    %20 = math.exp %19 : vector<2x128xf32>
    %cst_8 = arith.constant 1.000000e+00 : f32
    %21 = vector.broadcast %cst_8 : f32 to vector<2x128xf32>
    %22 = arith.addf %21, %20 : vector<2x128xf32>
    %23 = arith.divf %21, %22 : vector<2x128xf32>
    %24 = vector.extract_strided_slice %11 {offsets = [0, 256], sizes = [2, 128], strides = [1, 1]} : vector<2x512xf32> to vector<2x128xf32>
    %25 = math.tanh %24 : vector<2x128xf32>
    %26 = vector.extract_strided_slice %11 {offsets = [0, 384], sizes = [2, 128], strides = [1, 1]} : vector<2x512xf32> to vector<2x128xf32>
    %27 = arith.negf %26 : vector<2x128xf32>
    %28 = math.exp %27 : vector<2x128xf32>
    %cst_9 = arith.constant 1.000000e+00 : f32
    %29 = vector.broadcast %cst_9 : f32 to vector<2x128xf32>
    %30 = arith.addf %29, %28 : vector<2x128xf32>
    %31 = arith.divf %29, %30 : vector<2x128xf32>
    %32 = arith.mulf %23, %3 : vector<2x128xf32>
    %33 = arith.mulf %17, %25 : vector<2x128xf32>
    %34 = arith.addf %32, %33 : vector<2x128xf32>
    %35 = math.tanh %34 : vector<2x128xf32>
    %36 = arith.mulf %31, %35 : vector<2x128xf32>
    %37 = arith.index_cast %5 : i32 to index
    %c0_10 = arith.constant 0 : index
    %c0_11 = arith.constant 0 : index
    %38 = vector.load %arg3[%37, %c0_10, %c0_11] : memref<8x2x128xf32, #tpu.memory_space<vmem>>, vector<1x2x128xf32>
    %39 = vector.shape_cast %38 : vector<1x2x128xf32> to vector<2x128xf32>
    %40 = vector.shape_cast %36 : vector<2x128xf32> to vector<1x2x128xf32>
    tpu.vector_store %arg3[%37, %c0_10, %c0_11], %40 {strides = array<i32>} : memref<8x2x128xf32, #tpu.memory_space<vmem>>, vector<1x2x128xf32>,
    %c0_i32_12 = arith.constant 0 : i32
    %41 = arith.cmpi eq, %arg0, %c0_i32_12 : i32
    %c1_i32 = arith.constant 1 : i32
    %c6_i32 = arith.constant 6 : i32
    %42 = arith.select %41, %c1_i32, %c6_i32 : i32
    %43 = arith.index_cast %42 : i32 to index
    %c0_13 = arith.constant 0 : index
    %c0_14 = arith.constant 0 : index
    %44 = vector.load %arg1[%43, %c0_13, %c0_14] : memref<8x2x512xf32, #tpu.memory_space<vmem>>, vector<1x2x512xf32>
    %45 = vector.shape_cast %44 : vector<1x2x512xf32> to vector<2x512xf32>
    %46 = arith.truncf %36 : vector<2x128xf32> to vector<2x128xbf16>
    %cst_15 = arith.constant dense<0.000000e+00> : vector<2x512xf32>
    %47 = tpu.matmul %46, %1, %cst_15 {dimension_numbers = #tpu.dot_dimension_numbers<[1], [0], [0], [1], [0, 0, 1, 1], [], []>} : vector<2x128xbf16>, vector<128x512xbf16>, vector<2x512xf32> -> vector<2x512xf32>
    %48 = arith.addf %45, %47 : vector<2x512xf32>
    %49 = vector.extract_strided_slice %48 {offsets = [0, 0], sizes = [2, 128], strides = [1, 1]} : vector<2x512xf32> to vector<2x128xf32>
    %50 = arith.negf %49 : vector<2x128xf32>
    %51 = math.exp %50 : vector<2x128xf32>
    %cst_16 = arith.constant 1.000000e+00 : f32
    %52 = vector.broadcast %cst_16 : f32 to vector<2x128xf32>
    %53 = arith.addf %52, %51 : vector<2x128xf32>
    %54 = arith.divf %52, %53 : vector<2x128xf32>
    %55 = vector.extract_strided_slice %48 {offsets = [0, 128], sizes = [2, 128], strides = [1, 1]} : vector<2x512xf32> to vector<2x128xf32>
    %56 = arith.negf %55 : vector<2x128xf32>
    %57 = math.exp %56 : vector<2x128xf32>
    %cst_17 = arith.constant 1.000000e+00 : f32
    %58 = vector.broadcast %cst_17 : f32 to vector<2x128xf32>
    %59 = arith.addf %58, %57 : vector<2x128xf32>
    %60 = arith.divf %58, %59 : vector<2x128xf32>
    %61 = vector.extract_strided_slice %48 {offsets = [0, 256], sizes = [2, 128], strides = [1, 1]} : vector<2x512xf32> to vector<2x128xf32>
    %62 = math.tanh %61 : vector<2x128xf32>
    %63 = vector.extract_strided_slice %48 {offsets = [0, 384], sizes = [2, 128], strides = [1, 1]} : vector<2x512xf32> to vector<2x128xf32>
    %64 = arith.negf %63 : vector<2x128xf32>
    %65 = math.exp %64 : vector<2x128xf32>
    %cst_18 = arith.constant 1.000000e+00 : f32
    %66 = vector.broadcast %cst_18 : f32 to vector<2x128xf32>
    %67 = arith.addf %66, %65 : vector<2x128xf32>
    %68 = arith.divf %66, %67 : vector<2x128xf32>
    %69 = arith.mulf %60, %34 : vector<2x128xf32>
    %70 = arith.mulf %54, %62 : vector<2x128xf32>
    %71 = arith.addf %69, %70 : vector<2x128xf32>
    %72 = math.tanh %71 : vector<2x128xf32>
    %73 = arith.mulf %68, %72 : vector<2x128xf32>
    %74 = arith.index_cast %42 : i32 to index
    %c0_19 = arith.constant 0 : index
    %c0_20 = arith.constant 0 : index
    %75 = vector.load %arg3[%74, %c0_19, %c0_20] : memref<8x2x128xf32, #tpu.memory_space<vmem>>, vector<1x2x128xf32>
    %76 = vector.shape_cast %75 : vector<1x2x128xf32> to vector<2x128xf32>
    %77 = vector.shape_cast %73 : vector<2x128xf32> to vector<1x2x128xf32>
    tpu.vector_store %arg3[%74, %c0_19, %c0_20], %77 {strides = array<i32>} : memref<8x2x128xf32, #tpu.memory_space<vmem>>, vector<1x2x128xf32>,
    %c0_i32_21 = arith.constant 0 : i32
    %78 = arith.cmpi eq, %arg0, %c0_i32_21 : i32
    %c2_i32 = arith.constant 2 : i32
    %c5_i32 = arith.constant 5 : i32
    %79 = arith.select %78, %c2_i32, %c5_i32 : i32
    %80 = arith.index_cast %79 : i32 to index
    %c0_22 = arith.constant 0 : index
    %c0_23 = arith.constant 0 : index
    %81 = vector.load %arg1[%80, %c0_22, %c0_23] : memref<8x2x512xf32, #tpu.memory_space<vmem>>, vector<1x2x512xf32>
    %82 = vector.shape_cast %81 : vector<1x2x512xf32> to vector<2x512xf32>
    %83 = arith.truncf %73 : vector<2x128xf32> to vector<2x128xbf16>
    %cst_24 = arith.constant dense<0.000000e+00> : vector<2x512xf32>
    %84 = tpu.matmul %83, %1, %cst_24 {dimension_numbers = #tpu.dot_dimension_numbers<[1], [0], [0], [1], [0, 0, 1, 1], [], []>} : vector<2x128xbf16>, vector<128x512xbf16>, vector<2x512xf32> -> vector<2x512xf32>
    %85 = arith.addf %82, %84 : vector<2x512xf32>
    %86 = vector.extract_strided_slice %85 {offsets = [0, 0], sizes = [2, 128], strides = [1, 1]} : vector<2x512xf32> to vector<2x128xf32>
    %87 = arith.negf %86 : vector<2x128xf32>
    %88 = math.exp %87 : vector<2x128xf32>
    %cst_25 = arith.constant 1.000000e+00 : f32
    %89 = vector.broadcast %cst_25 : f32 to vector<2x128xf32>
    %90 = arith.addf %89, %88 : vector<2x128xf32>
    %91 = arith.divf %89, %90 : vector<2x128xf32>
    %92 = vector.extract_strided_slice %85 {offsets = [0, 128], sizes = [2, 128], strides = [1, 1]} : vector<2x512xf32> to vector<2x128xf32>
    %93 = arith.negf %92 : vector<2x128xf32>
    %94 = math.exp %93 : vector<2x128xf32>
    %cst_26 = arith.constant 1.000000e+00 : f32
    %95 = vector.broadcast %cst_26 : f32 to vector<2x128xf32>
    %96 = arith.addf %95, %94 : vector<2x128xf32>
    %97 = arith.divf %95, %96 : vector<2x128xf32>
    %98 = vector.extract_strided_slice %85 {offsets = [0, 256], sizes = [2, 128], strides = [1, 1]} : vector<2x512xf32> to vector<2x128xf32>
    %99 = math.tanh %98 : vector<2x128xf32>
    %100 = vector.extract_strided_slice %85 {offsets = [0, 384], sizes = [2, 128], strides = [1, 1]} : vector<2x512xf32> to vector<2x128xf32>
    %101 = arith.negf %100 : vector<2x128xf32>
    %102 = math.exp %101 : vector<2x128xf32>
    %cst_27 = arith.constant 1.000000e+00 : f32
    %103 = vector.broadcast %cst_27 : f32 to vector<2x128xf32>
    %104 = arith.addf %103, %102 : vector<2x128xf32>
    %105 = arith.divf %103, %104 : vector<2x128xf32>
    %106 = arith.mulf %97, %71 : vector<2x128xf32>
    %107 = arith.mulf %91, %99 : vector<2x128xf32>
    %108 = arith.addf %106, %107 : vector<2x128xf32>
    %109 = math.tanh %108 : vector<2x128xf32>
    %110 = arith.mulf %105, %109 : vector<2x128xf32>
    %111 = arith.index_cast %79 : i32 to index
    %c0_28 = arith.constant 0 : index
    %c0_29 = arith.constant 0 : index
    %112 = vector.load %arg3[%111, %c0_28, %c0_29] : memref<8x2x128xf32, #tpu.memory_space<vmem>>, vector<1x2x128xf32>
    %113 = vector.shape_cast %112 : vector<1x2x128xf32> to vector<2x128xf32>
    %114 = vector.shape_cast %110 : vector<2x128xf32> to vector<1x2x128xf32>
    tpu.vector_store %arg3[%111, %c0_28, %c0_29], %114 {strides = array<i32>} : memref<8x2x128xf32, #tpu.memory_space<vmem>>, vector<1x2x128xf32>,
    %c0_i32_30 = arith.constant 0 : i32
    %115 = arith.cmpi eq, %arg0, %c0_i32_30 : i32
    %c3_i32 = arith.constant 3 : i32
    %c4_i32 = arith.constant 4 : i32
    %116 = arith.select %115, %c3_i32, %c4_i32 : i32
    %117 = arith.index_cast %116 : i32 to index
    %c0_31 = arith.constant 0 : index
    %c0_32 = arith.constant 0 : index
    %118 = vector.load %arg1[%117, %c0_31, %c0_32] : memref<8x2x512xf32, #tpu.memory_space<vmem>>, vector<1x2x512xf32>
    %119 = vector.shape_cast %118 : vector<1x2x512xf32> to vector<2x512xf32>
    %120 = arith.truncf %110 : vector<2x128xf32> to vector<2x128xbf16>
    %cst_33 = arith.constant dense<0.000000e+00> : vector<2x512xf32>
    %121 = tpu.matmul %120, %1, %cst_33 {dimension_numbers = #tpu.dot_dimension_numbers<[1], [0], [0], [1], [0, 0, 1, 1], [], []>} : vector<2x128xbf16>, vector<128x512xbf16>, vector<2x512xf32> -> vector<2x512xf32>
    %122 = arith.addf %119, %121 : vector<2x512xf32>
    %123 = vector.extract_strided_slice %122 {offsets = [0, 0], sizes = [2, 128], strides = [1, 1]} : vector<2x512xf32> to vector<2x128xf32>
    %124 = arith.negf %123 : vector<2x128xf32>
    %125 = math.exp %124 : vector<2x128xf32>
    %cst_34 = arith.constant 1.000000e+00 : f32
    %126 = vector.broadcast %cst_34 : f32 to vector<2x128xf32>
    %127 = arith.addf %126, %125 : vector<2x128xf32>
    %128 = arith.divf %126, %127 : vector<2x128xf32>
    %129 = vector.extract_strided_slice %122 {offsets = [0, 128], sizes = [2, 128], strides = [1, 1]} : vector<2x512xf32> to vector<2x128xf32>
    %130 = arith.negf %129 : vector<2x128xf32>
    %131 = math.exp %130 : vector<2x128xf32>
    %cst_35 = arith.constant 1.000000e+00 : f32
    %132 = vector.broadcast %cst_35 : f32 to vector<2x128xf32>
    %133 = arith.addf %132, %131 : vector<2x128xf32>
    %134 = arith.divf %132, %133 : vector<2x128xf32>
    %135 = vector.extract_strided_slice %122 {offsets = [0, 256], sizes = [2, 128], strides = [1, 1]} : vector<2x512xf32> to vector<2x128xf32>
    %136 = math.tanh %135 : vector<2x128xf32>
    %137 = vector.extract_strided_slice %122 {offsets = [0, 384], sizes = [2, 128], strides = [1, 1]} : vector<2x512xf32> to vector<2x128xf32>
    %138 = arith.negf %137 : vector<2x128xf32>
    %139 = math.exp %138 : vector<2x128xf32>
    %cst_36 = arith.constant 1.000000e+00 : f32
    %140 = vector.broadcast %cst_36 : f32 to vector<2x128xf32>
    %141 = arith.addf %140, %139 : vector<2x128xf32>
    %142 = arith.divf %140, %141 : vector<2x128xf32>
    %143 = arith.mulf %134, %108 : vector<2x128xf32>
    %144 = arith.mulf %128, %136 : vector<2x128xf32>
    %145 = arith.addf %143, %144 : vector<2x128xf32>
    %146 = math.tanh %145 : vector<2x128xf32>
    %147 = arith.mulf %142, %146 : vector<2x128xf32>
    %148 = arith.index_cast %116 : i32 to index
    %c0_37 = arith.constant 0 : index
    %c0_38 = arith.constant 0 : index
    %149 = vector.load %arg3[%148, %c0_37, %c0_38] : memref<8x2x128xf32, #tpu.memory_space<vmem>>, vector<1x2x128xf32>
    %150 = vector.shape_cast %149 : vector<1x2x128xf32> to vector<2x128xf32>
    %151 = vector.shape_cast %147 : vector<2x128xf32> to vector<1x2x128xf32>
    tpu.vector_store %arg3[%148, %c0_37, %c0_38], %151 {strides = array<i32>} : memref<8x2x128xf32, #tpu.memory_space<vmem>>, vector<1x2x128xf32>,
    %c0_i32_39 = arith.constant 0 : i32
    %152 = arith.cmpi eq, %arg0, %c0_i32_39 : i32
    %c4_i32_40 = arith.constant 4 : i32
    %c3_i32_41 = arith.constant 3 : i32
    %153 = arith.select %152, %c4_i32_40, %c3_i32_41 : i32
    %154 = arith.index_cast %153 : i32 to index
    %c0_42 = arith.constant 0 : index
    %c0_43 = arith.constant 0 : index
    %155 = vector.load %arg1[%154, %c0_42, %c0_43] : memref<8x2x512xf32, #tpu.memory_space<vmem>>, vector<1x2x512xf32>
    %156 = vector.shape_cast %155 : vector<1x2x512xf32> to vector<2x512xf32>
    %157 = arith.truncf %147 : vector<2x128xf32> to vector<2x128xbf16>
    %cst_44 = arith.constant dense<0.000000e+00> : vector<2x512xf32>
    %158 = tpu.matmul %157, %1, %cst_44 {dimension_numbers = #tpu.dot_dimension_numbers<[1], [0], [0], [1], [0, 0, 1, 1], [], []>} : vector<2x128xbf16>, vector<128x512xbf16>, vector<2x512xf32> -> vector<2x512xf32>
    %159 = arith.addf %156, %158 : vector<2x512xf32>
    %160 = vector.extract_strided_slice %159 {offsets = [0, 0], sizes = [2, 128], strides = [1, 1]} : vector<2x512xf32> to vector<2x128xf32>
    %161 = arith.negf %160 : vector<2x128xf32>
    %162 = math.exp %161 : vector<2x128xf32>
    %cst_45 = arith.constant 1.000000e+00 : f32
    %163 = vector.broadcast %cst_45 : f32 to vector<2x128xf32>
    %164 = arith.addf %163, %162 : vector<2x128xf32>
    %165 = arith.divf %163, %164 : vector<2x128xf32>
    %166 = vector.extract_strided_slice %159 {offsets = [0, 128], sizes = [2, 128], strides = [1, 1]} : vector<2x512xf32> to vector<2x128xf32>
    %167 = arith.negf %166 : vector<2x128xf32>
    %168 = math.exp %167 : vector<2x128xf32>
    %cst_46 = arith.constant 1.000000e+00 : f32
    %169 = vector.broadcast %cst_46 : f32 to vector<2x128xf32>
    %170 = arith.addf %169, %168 : vector<2x128xf32>
    %171 = arith.divf %169, %170 : vector<2x128xf32>
    %172 = vector.extract_strided_slice %159 {offsets = [0, 256], sizes = [2, 128], strides = [1, 1]} : vector<2x512xf32> to vector<2x128xf32>
    %173 = math.tanh %172 : vector<2x128xf32>
    %174 = vector.extract_strided_slice %159 {offsets = [0, 384], sizes = [2, 128], strides = [1, 1]} : vector<2x512xf32> to vector<2x128xf32>
    %175 = arith.negf %174 : vector<2x128xf32>
    %176 = math.exp %175 : vector<2x128xf32>
    %cst_47 = arith.constant 1.000000e+00 : f32
    %177 = vector.broadcast %cst_47 : f32 to vector<2x128xf32>
    %178 = arith.addf %177, %176 : vector<2x128xf32>
    %179 = arith.divf %177, %178 : vector<2x128xf32>
    %180 = arith.mulf %171, %145 : vector<2x128xf32>
    %181 = arith.mulf %165, %173 : vector<2x128xf32>
    %182 = arith.addf %180, %181 : vector<2x128xf32>
    %183 = math.tanh %182 : vector<2x128xf32>
    %184 = arith.mulf %179, %183 : vector<2x128xf32>
    %185 = arith.index_cast %153 : i32 to index
    %c0_48 = arith.constant 0 : index
    %c0_49 = arith.constant 0 : index
    %186 = vector.load %arg3[%185, %c0_48, %c0_49] : memref<8x2x128xf32, #tpu.memory_space<vmem>>, vector<1x2x128xf32>
    %187 = vector.shape_cast %186 : vector<1x2x128xf32> to vector<2x128xf32>
    %188 = vector.shape_cast %184 : vector<2x128xf32> to vector<1x2x128xf32>
    tpu.vector_store %arg3[%185, %c0_48, %c0_49], %188 {strides = array<i32>} : memref<8x2x128xf32, #tpu.memory_space<vmem>>, vector<1x2x128xf32>,
    %c0_i32_50 = arith.constant 0 : i32
    %189 = arith.cmpi eq, %arg0, %c0_i32_50 : i32
    %c5_i32_51 = arith.constant 5 : i32
    %c2_i32_52 = arith.constant 2 : i32
    %190 = arith.select %189, %c5_i32_51, %c2_i32_52 : i32
    %191 = arith.index_cast %190 : i32 to index
    %c0_53 = arith.constant 0 : index
    %c0_54 = arith.constant 0 : index
    %192 = vector.load %arg1[%191, %c0_53, %c0_54] : memref<8x2x512xf32, #tpu.memory_space<vmem>>, vector<1x2x512xf32>
    %193 = vector.shape_cast %192 : vector<1x2x512xf32> to vector<2x512xf32>
    %194 = arith.truncf %184 : vector<2x128xf32> to vector<2x128xbf16>
    %cst_55 = arith.constant dense<0.000000e+00> : vector<2x512xf32>
    %195 = tpu.matmul %194, %1, %cst_55 {dimension_numbers = #tpu.dot_dimension_numbers<[1], [0], [0], [1], [0, 0, 1, 1], [], []>} : vector<2x128xbf16>, vector<128x512xbf16>, vector<2x512xf32> -> vector<2x512xf32>
    %196 = arith.addf %193, %195 : vector<2x512xf32>
    %197 = vector.extract_strided_slice %196 {offsets = [0, 0], sizes = [2, 128], strides = [1, 1]} : vector<2x512xf32> to vector<2x128xf32>
    %198 = arith.negf %197 : vector<2x128xf32>
    %199 = math.exp %198 : vector<2x128xf32>
    %cst_56 = arith.constant 1.000000e+00 : f32
    %200 = vector.broadcast %cst_56 : f32 to vector<2x128xf32>
    %201 = arith.addf %200, %199 : vector<2x128xf32>
    %202 = arith.divf %200, %201 : vector<2x128xf32>
    %203 = vector.extract_strided_slice %196 {offsets = [0, 128], sizes = [2, 128], strides = [1, 1]} : vector<2x512xf32> to vector<2x128xf32>
    %204 = arith.negf %203 : vector<2x128xf32>
    %205 = math.exp %204 : vector<2x128xf32>
    %cst_57 = arith.constant 1.000000e+00 : f32
    %206 = vector.broadcast %cst_57 : f32 to vector<2x128xf32>
    %207 = arith.addf %206, %205 : vector<2x128xf32>
    %208 = arith.divf %206, %207 : vector<2x128xf32>
    %209 = vector.extract_strided_slice %196 {offsets = [0, 256], sizes = [2, 128], strides = [1, 1]} : vector<2x512xf32> to vector<2x128xf32>
    %210 = math.tanh %209 : vector<2x128xf32>
    %211 = vector.extract_strided_slice %196 {offsets = [0, 384], sizes = [2, 128], strides = [1, 1]} : vector<2x512xf32> to vector<2x128xf32>
    %212 = arith.negf %211 : vector<2x128xf32>
    %213 = math.exp %212 : vector<2x128xf32>
    %cst_58 = arith.constant 1.000000e+00 : f32
    %214 = vector.broadcast %cst_58 : f32 to vector<2x128xf32>
    %215 = arith.addf %214, %213 : vector<2x128xf32>
    %216 = arith.divf %214, %215 : vector<2x128xf32>
    %217 = arith.mulf %208, %182 : vector<2x128xf32>
    %218 = arith.mulf %202, %210 : vector<2x128xf32>
    %219 = arith.addf %217, %218 : vector<2x128xf32>
    %220 = math.tanh %219 : vector<2x128xf32>
    %221 = arith.mulf %216, %220 : vector<2x128xf32>
    %222 = arith.index_cast %190 : i32 to index
    %c0_59 = arith.constant 0 : index
    %c0_60 = arith.constant 0 : index
    %223 = vector.load %arg3[%222, %c0_59, %c0_60] : memref<8x2x128xf32, #tpu.memory_space<vmem>>, vector<1x2x128xf32>
    %224 = vector.shape_cast %223 : vector<1x2x128xf32> to vector<2x128xf32>
    %225 = vector.shape_cast %221 : vector<2x128xf32> to vector<1x2x128xf32>
    tpu.vector_store %arg3[%222, %c0_59, %c0_60], %225 {strides = array<i32>} : memref<8x2x128xf32, #tpu.memory_space<vmem>>, vector<1x2x128xf32>,
    %c0_i32_61 = arith.constant 0 : i32
    %226 = arith.cmpi eq, %arg0, %c0_i32_61 : i32
    %c6_i32_62 = arith.constant 6 : i32
    %c1_i32_63 = arith.constant 1 : i32
    %227 = arith.select %226, %c6_i32_62, %c1_i32_63 : i32
    %228 = arith.index_cast %227 : i32 to index
    %c0_64 = arith.constant 0 : index
    %c0_65 = arith.constant 0 : index
    %229 = vector.load %arg1[%228, %c0_64, %c0_65] : memref<8x2x512xf32, #tpu.memory_space<vmem>>, vector<1x2x512xf32>
    %230 = vector.shape_cast %229 : vector<1x2x512xf32> to vector<2x512xf32>
    %231 = arith.truncf %221 : vector<2x128xf32> to vector<2x128xbf16>
    %cst_66 = arith.constant dense<0.000000e+00> : vector<2x512xf32>
    %232 = tpu.matmul %231, %1, %cst_66 {dimension_numbers = #tpu.dot_dimension_numbers<[1], [0], [0], [1], [0, 0, 1, 1], [], []>} : vector<2x128xbf16>, vector<128x512xbf16>, vector<2x512xf32> -> vector<2x512xf32>
    %233 = arith.addf %230, %232 : vector<2x512xf32>
    %234 = vector.extract_strided_slice %233 {offsets = [0, 0], sizes = [2, 128], strides = [1, 1]} : vector<2x512xf32> to vector<2x128xf32>
    %235 = arith.negf %234 : vector<2x128xf32>
    %236 = math.exp %235 : vector<2x128xf32>
    %cst_67 = arith.constant 1.000000e+00 : f32
    %237 = vector.broadcast %cst_67 : f32 to vector<2x128xf32>
    %238 = arith.addf %237, %236 : vector<2x128xf32>
    %239 = arith.divf %237, %238 : vector<2x128xf32>
    %240 = vector.extract_strided_slice %233 {offsets = [0, 128], sizes = [2, 128], strides = [1, 1]} : vector<2x512xf32> to vector<2x128xf32>
    %241 = arith.negf %240 : vector<2x128xf32>
    %242 = math.exp %241 : vector<2x128xf32>
    %cst_68 = arith.constant 1.000000e+00 : f32
    %243 = vector.broadcast %cst_68 : f32 to vector<2x128xf32>
    %244 = arith.addf %243, %242 : vector<2x128xf32>
    %245 = arith.divf %243, %244 : vector<2x128xf32>
    %246 = vector.extract_strided_slice %233 {offsets = [0, 256], sizes = [2, 128], strides = [1, 1]} : vector<2x512xf32> to vector<2x128xf32>
    %247 = math.tanh %246 : vector<2x128xf32>
    %248 = vector.extract_strided_slice %233 {offsets = [0, 384], sizes = [2, 128], strides = [1, 1]} : vector<2x512xf32> to vector<2x128xf32>
    %249 = arith.negf %248 : vector<2x128xf32>
    %250 = math.exp %249 : vector<2x128xf32>
    %cst_69 = arith.constant 1.000000e+00 : f32
    %251 = vector.broadcast %cst_69 : f32 to vector<2x128xf32>
    %252 = arith.addf %251, %250 : vector<2x128xf32>
    %253 = arith.divf %251, %252 : vector<2x128xf32>
    %254 = arith.mulf %245, %219 : vector<2x128xf32>
    %255 = arith.mulf %239, %247 : vector<2x128xf32>
    %256 = arith.addf %254, %255 : vector<2x128xf32>
    %257 = math.tanh %256 : vector<2x128xf32>
    %258 = arith.mulf %253, %257 : vector<2x128xf32>
    %259 = arith.index_cast %227 : i32 to index
    %c0_70 = arith.constant 0 : index
    %c0_71 = arith.constant 0 : index
    %260 = vector.load %arg3[%259, %c0_70, %c0_71] : memref<8x2x128xf32, #tpu.memory_space<vmem>>, vector<1x2x128xf32>
    %261 = vector.shape_cast %260 : vector<1x2x128xf32> to vector<2x128xf32>
    %262 = vector.shape_cast %258 : vector<2x128xf32> to vector<1x2x128xf32>
    tpu.vector_store %arg3[%259, %c0_70, %c0_71], %262 {strides = array<i32>} : memref<8x2x128xf32, #tpu.memory_space<vmem>>, vector<1x2x128xf32>,
    %c0_i32_72 = arith.constant 0 : i32
    %263 = arith.cmpi eq, %arg0, %c0_i32_72 : i32
    %c7_i32_73 = arith.constant 7 : i32
    %c0_i32_74 = arith.constant 0 : i32
    %264 = arith.select %263, %c7_i32_73, %c0_i32_74 : i32
    %265 = arith.index_cast %264 : i32 to index
    %c0_75 = arith.constant 0 : index
    %c0_76 = arith.constant 0 : index
    %266 = vector.load %arg1[%265, %c0_75, %c0_76] : memref<8x2x512xf32, #tpu.memory_space<vmem>>, vector<1x2x512xf32>
    %267 = vector.shape_cast %266 : vector<1x2x512xf32> to vector<2x512xf32>
    %268 = arith.truncf %258 : vector<2x128xf32> to vector<2x128xbf16>
    %cst_77 = arith.constant dense<0.000000e+00> : vector<2x512xf32>
    %269 = tpu.matmul %268, %1, %cst_77 {dimension_numbers = #tpu.dot_dimension_numbers<[1], [0], [0], [1], [0, 0, 1, 1], [], []>} : vector<2x128xbf16>, vector<128x512xbf16>, vector<2x512xf32> -> vector<2x512xf32>
    %270 = arith.addf %267, %269 : vector<2x512xf32>
    %271 = vector.extract_strided_slice %270 {offsets = [0, 0], sizes = [2, 128], strides = [1, 1]} : vector<2x512xf32> to vector<2x128xf32>
    %272 = arith.negf %271 : vector<2x128xf32>
    %273 = math.exp %272 : vector<2x128xf32>
    %cst_78 = arith.constant 1.000000e+00 : f32
    %274 = vector.broadcast %cst_78 : f32 to vector<2x128xf32>
    %275 = arith.addf %274, %273 : vector<2x128xf32>
    %276 = arith.divf %274, %275 : vector<2x128xf32>
    %277 = vector.extract_strided_slice %270 {offsets = [0, 128], sizes = [2, 128], strides = [1, 1]} : vector<2x512xf32> to vector<2x128xf32>
    %278 = arith.negf %277 : vector<2x128xf32>
    %279 = math.exp %278 : vector<2x128xf32>
    %cst_79 = arith.constant 1.000000e+00 : f32
    %280 = vector.broadcast %cst_79 : f32 to vector<2x128xf32>
    %281 = arith.addf %280, %279 : vector<2x128xf32>
    %282 = arith.divf %280, %281 : vector<2x128xf32>
    %283 = vector.extract_strided_slice %270 {offsets = [0, 256], sizes = [2, 128], strides = [1, 1]} : vector<2x512xf32> to vector<2x128xf32>
    %284 = math.tanh %283 : vector<2x128xf32>
    %285 = vector.extract_strided_slice %270 {offsets = [0, 384], sizes = [2, 128], strides = [1, 1]} : vector<2x512xf32> to vector<2x128xf32>
    %286 = arith.negf %285 : vector<2x128xf32>
    %287 = math.exp %286 : vector<2x128xf32>
    %cst_80 = arith.constant 1.000000e+00 : f32
    %288 = vector.broadcast %cst_80 : f32 to vector<2x128xf32>
    %289 = arith.addf %288, %287 : vector<2x128xf32>
    %290 = arith.divf %288, %289 : vector<2x128xf32>
    %291 = arith.mulf %282, %256 : vector<2x128xf32>
    %292 = arith.mulf %276, %284 : vector<2x128xf32>
    %293 = arith.addf %291, %292 : vector<2x128xf32>
    %294 = math.tanh %293 : vector<2x128xf32>
    %295 = arith.mulf %290, %294 : vector<2x128xf32>
    %296 = arith.index_cast %264 : i32 to index
    %c0_81 = arith.constant 0 : index
    %c0_82 = arith.constant 0 : index
    %297 = vector.load %arg3[%296, %c0_81, %c0_82] : memref<8x2x128xf32, #tpu.memory_space<vmem>>, vector<1x2x128xf32>
    %298 = vector.shape_cast %297 : vector<1x2x128xf32> to vector<2x128xf32>
    %299 = vector.shape_cast %295 : vector<2x128xf32> to vector<1x2x128xf32>
    tpu.vector_store %arg3[%296, %c0_81, %c0_82], %299 {strides = array<i32>} : memref<8x2x128xf32, #tpu.memory_space<vmem>>, vector<1x2x128xf32>,
    return
  }
  func.func @transform_0(%arg0: i32) -> (i32, i32, i32) {
    %c0_i32 = arith.constant 0 : i32
    %c0_i32_0 = arith.constant 0 : i32
    %c0_i32_1 = arith.constant 0 : i32
    return %c0_i32, %c0_i32_0, %arg0 : i32, i32, i32
  }
  func.func @transform_1(%arg0: i32) -> (i32, i32, i32) {
    %c0_i32 = arith.constant 0 : i32
    %c0_i32_0 = arith.constant 0 : i32
    %c0_i32_1 = arith.constant 0 : i32
    return %arg0, %c0_i32, %c0_i32_0 : i32, i32, i32
  }
  func.func @transform_2(%arg0: i32) -> (i32, i32, i32) {
    %c0_i32 = arith.constant 0 : i32
    %c0_i32_0 = arith.constant 0 : i32
    %c0_i32_1 = arith.constant 0 : i32
    return %c0_i32, %c0_i32_0, %arg0 : i32, i32, i32
  }
}

module attributes {stable_mosaic.version = 11 : i64} {
  func.func @_bilstm_head_kernel(%arg0: i32, %arg1: memref<8x2x512xf32, #tpu.memory_space<vmem>>, %arg2: memref<1x128x512xbf16, #tpu.memory_space<vmem>>, %arg3: memref<1x128x6xf32, #tpu.memory_space<vmem>>, %arg4: memref<1x2x6xf32, #tpu.memory_space<vmem>>) attributes {dimension_semantics = [#tpu.dimension_semantics<parallel>], iteration_bounds = array<i64: 2>, scalar_prefetch = 0 : i64, scratch_operands = 0 : i64, tpu.core_type = #tpu.core_type<tc>, window_params = [{transform_indices = @transform_0, window_bounds = array<i64: 8, 2, 512>}, {transform_indices = @transform_1, window_bounds = array<i64: 1, 128, 512>}, {transform_indices = @transform_2, window_bounds = array<i64: 1, 128, 6>}, {transform_indices = @transform_3, window_bounds = array<i64: 1, 2, 6>}]} {
    %c0 = arith.constant 0 : index
    %c0_0 = arith.constant 0 : index
    %c0_1 = arith.constant 0 : index
    %0 = vector.load %arg2[%c0, %c0_0, %c0_1] : memref<1x128x512xbf16, #tpu.memory_space<vmem>>, vector<1x128x512xbf16>
    %1 = vector.shape_cast %0 : vector<1x128x512xbf16> to vector<128x512xbf16>
    %cst = arith.constant 0.000000e+00 : f32
    %2 = vector.broadcast %cst : f32 to vector<2x128xf32>
    %cst_2 = arith.constant 0.000000e+00 : f32
    %3 = vector.broadcast %cst_2 : f32 to vector<2x128xf32>
    %cst_3 = arith.constant 0.000000e+00 : f32
    %4 = vector.broadcast %cst_3 : f32 to vector<2x128xf32>
    %c0_i32 = arith.constant 0 : i32
    %5 = arith.cmpi eq, %arg0, %c0_i32 : i32
    %c0_i32_4 = arith.constant 0 : i32
    %c7_i32 = arith.constant 7 : i32
    %6 = arith.select %5, %c0_i32_4, %c7_i32 : i32
    %7 = arith.index_cast %6 : i32 to index
    %c0_5 = arith.constant 0 : index
    %c0_6 = arith.constant 0 : index
    %8 = vector.load %arg1[%7, %c0_5, %c0_6] : memref<8x2x512xf32, #tpu.memory_space<vmem>>, vector<1x2x512xf32>
    %9 = vector.shape_cast %8 : vector<1x2x512xf32> to vector<2x512xf32>
    %10 = arith.truncf %2 : vector<2x128xf32> to vector<2x128xbf16>
    %cst_7 = arith.constant dense<0.000000e+00> : vector<2x512xf32>
    %11 = tpu.matmul %10, %1, %cst_7 {dimension_numbers = #tpu.dot_dimension_numbers<[1], [0], [0], [1], [0, 0, 1, 1], [], []>} : vector<2x128xbf16>, vector<128x512xbf16>, vector<2x512xf32> -> vector<2x512xf32>
    %12 = arith.addf %9, %11 : vector<2x512xf32>
    %13 = vector.extract_strided_slice %12 {offsets = [0, 0], sizes = [2, 128], strides = [1, 1]} : vector<2x512xf32> to vector<2x128xf32>
    %14 = arith.negf %13 : vector<2x128xf32>
    %15 = math.exp %14 : vector<2x128xf32>
    %cst_8 = arith.constant 1.000000e+00 : f32
    %16 = vector.broadcast %cst_8 : f32 to vector<2x128xf32>
    %17 = arith.addf %16, %15 : vector<2x128xf32>
    %18 = arith.divf %16, %17 : vector<2x128xf32>
    %19 = vector.extract_strided_slice %12 {offsets = [0, 128], sizes = [2, 128], strides = [1, 1]} : vector<2x512xf32> to vector<2x128xf32>
    %20 = arith.negf %19 : vector<2x128xf32>
    %21 = math.exp %20 : vector<2x128xf32>
    %cst_9 = arith.constant 1.000000e+00 : f32
    %22 = vector.broadcast %cst_9 : f32 to vector<2x128xf32>
    %23 = arith.addf %22, %21 : vector<2x128xf32>
    %24 = arith.divf %22, %23 : vector<2x128xf32>
    %25 = vector.extract_strided_slice %12 {offsets = [0, 256], sizes = [2, 128], strides = [1, 1]} : vector<2x512xf32> to vector<2x128xf32>
    %26 = math.tanh %25 : vector<2x128xf32>
    %27 = vector.extract_strided_slice %12 {offsets = [0, 384], sizes = [2, 128], strides = [1, 1]} : vector<2x512xf32> to vector<2x128xf32>
    %28 = arith.negf %27 : vector<2x128xf32>
    %29 = math.exp %28 : vector<2x128xf32>
    %cst_10 = arith.constant 1.000000e+00 : f32
    %30 = vector.broadcast %cst_10 : f32 to vector<2x128xf32>
    %31 = arith.addf %30, %29 : vector<2x128xf32>
    %32 = arith.divf %30, %31 : vector<2x128xf32>
    %33 = arith.mulf %24, %3 : vector<2x128xf32>
    %34 = arith.mulf %18, %26 : vector<2x128xf32>
    %35 = arith.addf %33, %34 : vector<2x128xf32>
    %36 = math.tanh %35 : vector<2x128xf32>
    %37 = arith.mulf %32, %36 : vector<2x128xf32>
    %38 = arith.addf %4, %37 : vector<2x128xf32>
    %c0_i32_11 = arith.constant 0 : i32
    %39 = arith.cmpi eq, %arg0, %c0_i32_11 : i32
    %c1_i32 = arith.constant 1 : i32
    %c6_i32 = arith.constant 6 : i32
    %40 = arith.select %39, %c1_i32, %c6_i32 : i32
    %41 = arith.index_cast %40 : i32 to index
    %c0_12 = arith.constant 0 : index
    %c0_13 = arith.constant 0 : index
    %42 = vector.load %arg1[%41, %c0_12, %c0_13] : memref<8x2x512xf32, #tpu.memory_space<vmem>>, vector<1x2x512xf32>
    %43 = vector.shape_cast %42 : vector<1x2x512xf32> to vector<2x512xf32>
    %44 = arith.truncf %37 : vector<2x128xf32> to vector<2x128xbf16>
    %cst_14 = arith.constant dense<0.000000e+00> : vector<2x512xf32>
    %45 = tpu.matmul %44, %1, %cst_14 {dimension_numbers = #tpu.dot_dimension_numbers<[1], [0], [0], [1], [0, 0, 1, 1], [], []>} : vector<2x128xbf16>, vector<128x512xbf16>, vector<2x512xf32> -> vector<2x512xf32>
    %46 = arith.addf %43, %45 : vector<2x512xf32>
    %47 = vector.extract_strided_slice %46 {offsets = [0, 0], sizes = [2, 128], strides = [1, 1]} : vector<2x512xf32> to vector<2x128xf32>
    %48 = arith.negf %47 : vector<2x128xf32>
    %49 = math.exp %48 : vector<2x128xf32>
    %cst_15 = arith.constant 1.000000e+00 : f32
    %50 = vector.broadcast %cst_15 : f32 to vector<2x128xf32>
    %51 = arith.addf %50, %49 : vector<2x128xf32>
    %52 = arith.divf %50, %51 : vector<2x128xf32>
    %53 = vector.extract_strided_slice %46 {offsets = [0, 128], sizes = [2, 128], strides = [1, 1]} : vector<2x512xf32> to vector<2x128xf32>
    %54 = arith.negf %53 : vector<2x128xf32>
    %55 = math.exp %54 : vector<2x128xf32>
    %cst_16 = arith.constant 1.000000e+00 : f32
    %56 = vector.broadcast %cst_16 : f32 to vector<2x128xf32>
    %57 = arith.addf %56, %55 : vector<2x128xf32>
    %58 = arith.divf %56, %57 : vector<2x128xf32>
    %59 = vector.extract_strided_slice %46 {offsets = [0, 256], sizes = [2, 128], strides = [1, 1]} : vector<2x512xf32> to vector<2x128xf32>
    %60 = math.tanh %59 : vector<2x128xf32>
    %61 = vector.extract_strided_slice %46 {offsets = [0, 384], sizes = [2, 128], strides = [1, 1]} : vector<2x512xf32> to vector<2x128xf32>
    %62 = arith.negf %61 : vector<2x128xf32>
    %63 = math.exp %62 : vector<2x128xf32>
    %cst_17 = arith.constant 1.000000e+00 : f32
    %64 = vector.broadcast %cst_17 : f32 to vector<2x128xf32>
    %65 = arith.addf %64, %63 : vector<2x128xf32>
    %66 = arith.divf %64, %65 : vector<2x128xf32>
    %67 = arith.mulf %58, %35 : vector<2x128xf32>
    %68 = arith.mulf %52, %60 : vector<2x128xf32>
    %69 = arith.addf %67, %68 : vector<2x128xf32>
    %70 = math.tanh %69 : vector<2x128xf32>
    %71 = arith.mulf %66, %70 : vector<2x128xf32>
    %72 = arith.addf %38, %71 : vector<2x128xf32>
    %c0_i32_18 = arith.constant 0 : i32
    %73 = arith.cmpi eq, %arg0, %c0_i32_18 : i32
    %c2_i32 = arith.constant 2 : i32
    %c5_i32 = arith.constant 5 : i32
    %74 = arith.select %73, %c2_i32, %c5_i32 : i32
    %75 = arith.index_cast %74 : i32 to index
    %c0_19 = arith.constant 0 : index
    %c0_20 = arith.constant 0 : index
    %76 = vector.load %arg1[%75, %c0_19, %c0_20] : memref<8x2x512xf32, #tpu.memory_space<vmem>>, vector<1x2x512xf32>
    %77 = vector.shape_cast %76 : vector<1x2x512xf32> to vector<2x512xf32>
    %78 = arith.truncf %71 : vector<2x128xf32> to vector<2x128xbf16>
    %cst_21 = arith.constant dense<0.000000e+00> : vector<2x512xf32>
    %79 = tpu.matmul %78, %1, %cst_21 {dimension_numbers = #tpu.dot_dimension_numbers<[1], [0], [0], [1], [0, 0, 1, 1], [], []>} : vector<2x128xbf16>, vector<128x512xbf16>, vector<2x512xf32> -> vector<2x512xf32>
    %80 = arith.addf %77, %79 : vector<2x512xf32>
    %81 = vector.extract_strided_slice %80 {offsets = [0, 0], sizes = [2, 128], strides = [1, 1]} : vector<2x512xf32> to vector<2x128xf32>
    %82 = arith.negf %81 : vector<2x128xf32>
    %83 = math.exp %82 : vector<2x128xf32>
    %cst_22 = arith.constant 1.000000e+00 : f32
    %84 = vector.broadcast %cst_22 : f32 to vector<2x128xf32>
    %85 = arith.addf %84, %83 : vector<2x128xf32>
    %86 = arith.divf %84, %85 : vector<2x128xf32>
    %87 = vector.extract_strided_slice %80 {offsets = [0, 128], sizes = [2, 128], strides = [1, 1]} : vector<2x512xf32> to vector<2x128xf32>
    %88 = arith.negf %87 : vector<2x128xf32>
    %89 = math.exp %88 : vector<2x128xf32>
    %cst_23 = arith.constant 1.000000e+00 : f32
    %90 = vector.broadcast %cst_23 : f32 to vector<2x128xf32>
    %91 = arith.addf %90, %89 : vector<2x128xf32>
    %92 = arith.divf %90, %91 : vector<2x128xf32>
    %93 = vector.extract_strided_slice %80 {offsets = [0, 256], sizes = [2, 128], strides = [1, 1]} : vector<2x512xf32> to vector<2x128xf32>
    %94 = math.tanh %93 : vector<2x128xf32>
    %95 = vector.extract_strided_slice %80 {offsets = [0, 384], sizes = [2, 128], strides = [1, 1]} : vector<2x512xf32> to vector<2x128xf32>
    %96 = arith.negf %95 : vector<2x128xf32>
    %97 = math.exp %96 : vector<2x128xf32>
    %cst_24 = arith.constant 1.000000e+00 : f32
    %98 = vector.broadcast %cst_24 : f32 to vector<2x128xf32>
    %99 = arith.addf %98, %97 : vector<2x128xf32>
    %100 = arith.divf %98, %99 : vector<2x128xf32>
    %101 = arith.mulf %92, %69 : vector<2x128xf32>
    %102 = arith.mulf %86, %94 : vector<2x128xf32>
    %103 = arith.addf %101, %102 : vector<2x128xf32>
    %104 = math.tanh %103 : vector<2x128xf32>
    %105 = arith.mulf %100, %104 : vector<2x128xf32>
    %106 = arith.addf %72, %105 : vector<2x128xf32>
    %c0_i32_25 = arith.constant 0 : i32
    %107 = arith.cmpi eq, %arg0, %c0_i32_25 : i32
    %c3_i32 = arith.constant 3 : i32
    %c4_i32 = arith.constant 4 : i32
    %108 = arith.select %107, %c3_i32, %c4_i32 : i32
    %109 = arith.index_cast %108 : i32 to index
    %c0_26 = arith.constant 0 : index
    %c0_27 = arith.constant 0 : index
    %110 = vector.load %arg1[%109, %c0_26, %c0_27] : memref<8x2x512xf32, #tpu.memory_space<vmem>>, vector<1x2x512xf32>
    %111 = vector.shape_cast %110 : vector<1x2x512xf32> to vector<2x512xf32>
    %112 = arith.truncf %105 : vector<2x128xf32> to vector<2x128xbf16>
    %cst_28 = arith.constant dense<0.000000e+00> : vector<2x512xf32>
    %113 = tpu.matmul %112, %1, %cst_28 {dimension_numbers = #tpu.dot_dimension_numbers<[1], [0], [0], [1], [0, 0, 1, 1], [], []>} : vector<2x128xbf16>, vector<128x512xbf16>, vector<2x512xf32> -> vector<2x512xf32>
    %114 = arith.addf %111, %113 : vector<2x512xf32>
    %115 = vector.extract_strided_slice %114 {offsets = [0, 0], sizes = [2, 128], strides = [1, 1]} : vector<2x512xf32> to vector<2x128xf32>
    %116 = arith.negf %115 : vector<2x128xf32>
    %117 = math.exp %116 : vector<2x128xf32>
    %cst_29 = arith.constant 1.000000e+00 : f32
    %118 = vector.broadcast %cst_29 : f32 to vector<2x128xf32>
    %119 = arith.addf %118, %117 : vector<2x128xf32>
    %120 = arith.divf %118, %119 : vector<2x128xf32>
    %121 = vector.extract_strided_slice %114 {offsets = [0, 128], sizes = [2, 128], strides = [1, 1]} : vector<2x512xf32> to vector<2x128xf32>
    %122 = arith.negf %121 : vector<2x128xf32>
    %123 = math.exp %122 : vector<2x128xf32>
    %cst_30 = arith.constant 1.000000e+00 : f32
    %124 = vector.broadcast %cst_30 : f32 to vector<2x128xf32>
    %125 = arith.addf %124, %123 : vector<2x128xf32>
    %126 = arith.divf %124, %125 : vector<2x128xf32>
    %127 = vector.extract_strided_slice %114 {offsets = [0, 256], sizes = [2, 128], strides = [1, 1]} : vector<2x512xf32> to vector<2x128xf32>
    %128 = math.tanh %127 : vector<2x128xf32>
    %129 = vector.extract_strided_slice %114 {offsets = [0, 384], sizes = [2, 128], strides = [1, 1]} : vector<2x512xf32> to vector<2x128xf32>
    %130 = arith.negf %129 : vector<2x128xf32>
    %131 = math.exp %130 : vector<2x128xf32>
    %cst_31 = arith.constant 1.000000e+00 : f32
    %132 = vector.broadcast %cst_31 : f32 to vector<2x128xf32>
    %133 = arith.addf %132, %131 : vector<2x128xf32>
    %134 = arith.divf %132, %133 : vector<2x128xf32>
    %135 = arith.mulf %126, %103 : vector<2x128xf32>
    %136 = arith.mulf %120, %128 : vector<2x128xf32>
    %137 = arith.addf %135, %136 : vector<2x128xf32>
    %138 = math.tanh %137 : vector<2x128xf32>
    %139 = arith.mulf %134, %138 : vector<2x128xf32>
    %140 = arith.addf %106, %139 : vector<2x128xf32>
    %c0_i32_32 = arith.constant 0 : i32
    %141 = arith.cmpi eq, %arg0, %c0_i32_32 : i32
    %c4_i32_33 = arith.constant 4 : i32
    %c3_i32_34 = arith.constant 3 : i32
    %142 = arith.select %141, %c4_i32_33, %c3_i32_34 : i32
    %143 = arith.index_cast %142 : i32 to index
    %c0_35 = arith.constant 0 : index
    %c0_36 = arith.constant 0 : index
    %144 = vector.load %arg1[%143, %c0_35, %c0_36] : memref<8x2x512xf32, #tpu.memory_space<vmem>>, vector<1x2x512xf32>
    %145 = vector.shape_cast %144 : vector<1x2x512xf32> to vector<2x512xf32>
    %146 = arith.truncf %139 : vector<2x128xf32> to vector<2x128xbf16>
    %cst_37 = arith.constant dense<0.000000e+00> : vector<2x512xf32>
    %147 = tpu.matmul %146, %1, %cst_37 {dimension_numbers = #tpu.dot_dimension_numbers<[1], [0], [0], [1], [0, 0, 1, 1], [], []>} : vector<2x128xbf16>, vector<128x512xbf16>, vector<2x512xf32> -> vector<2x512xf32>
    %148 = arith.addf %145, %147 : vector<2x512xf32>
    %149 = vector.extract_strided_slice %148 {offsets = [0, 0], sizes = [2, 128], strides = [1, 1]} : vector<2x512xf32> to vector<2x128xf32>
    %150 = arith.negf %149 : vector<2x128xf32>
    %151 = math.exp %150 : vector<2x128xf32>
    %cst_38 = arith.constant 1.000000e+00 : f32
    %152 = vector.broadcast %cst_38 : f32 to vector<2x128xf32>
    %153 = arith.addf %152, %151 : vector<2x128xf32>
    %154 = arith.divf %152, %153 : vector<2x128xf32>
    %155 = vector.extract_strided_slice %148 {offsets = [0, 128], sizes = [2, 128], strides = [1, 1]} : vector<2x512xf32> to vector<2x128xf32>
    %156 = arith.negf %155 : vector<2x128xf32>
    %157 = math.exp %156 : vector<2x128xf32>
    %cst_39 = arith.constant 1.000000e+00 : f32
    %158 = vector.broadcast %cst_39 : f32 to vector<2x128xf32>
    %159 = arith.addf %158, %157 : vector<2x128xf32>
    %160 = arith.divf %158, %159 : vector<2x128xf32>
    %161 = vector.extract_strided_slice %148 {offsets = [0, 256], sizes = [2, 128], strides = [1, 1]} : vector<2x512xf32> to vector<2x128xf32>
    %162 = math.tanh %161 : vector<2x128xf32>
    %163 = vector.extract_strided_slice %148 {offsets = [0, 384], sizes = [2, 128], strides = [1, 1]} : vector<2x512xf32> to vector<2x128xf32>
    %164 = arith.negf %163 : vector<2x128xf32>
    %165 = math.exp %164 : vector<2x128xf32>
    %cst_40 = arith.constant 1.000000e+00 : f32
    %166 = vector.broadcast %cst_40 : f32 to vector<2x128xf32>
    %167 = arith.addf %166, %165 : vector<2x128xf32>
    %168 = arith.divf %166, %167 : vector<2x128xf32>
    %169 = arith.mulf %160, %137 : vector<2x128xf32>
    %170 = arith.mulf %154, %162 : vector<2x128xf32>
    %171 = arith.addf %169, %170 : vector<2x128xf32>
    %172 = math.tanh %171 : vector<2x128xf32>
    %173 = arith.mulf %168, %172 : vector<2x128xf32>
    %174 = arith.addf %140, %173 : vector<2x128xf32>
    %c0_i32_41 = arith.constant 0 : i32
    %175 = arith.cmpi eq, %arg0, %c0_i32_41 : i32
    %c5_i32_42 = arith.constant 5 : i32
    %c2_i32_43 = arith.constant 2 : i32
    %176 = arith.select %175, %c5_i32_42, %c2_i32_43 : i32
    %177 = arith.index_cast %176 : i32 to index
    %c0_44 = arith.constant 0 : index
    %c0_45 = arith.constant 0 : index
    %178 = vector.load %arg1[%177, %c0_44, %c0_45] : memref<8x2x512xf32, #tpu.memory_space<vmem>>, vector<1x2x512xf32>
    %179 = vector.shape_cast %178 : vector<1x2x512xf32> to vector<2x512xf32>
    %180 = arith.truncf %173 : vector<2x128xf32> to vector<2x128xbf16>
    %cst_46 = arith.constant dense<0.000000e+00> : vector<2x512xf32>
    %181 = tpu.matmul %180, %1, %cst_46 {dimension_numbers = #tpu.dot_dimension_numbers<[1], [0], [0], [1], [0, 0, 1, 1], [], []>} : vector<2x128xbf16>, vector<128x512xbf16>, vector<2x512xf32> -> vector<2x512xf32>
    %182 = arith.addf %179, %181 : vector<2x512xf32>
    %183 = vector.extract_strided_slice %182 {offsets = [0, 0], sizes = [2, 128], strides = [1, 1]} : vector<2x512xf32> to vector<2x128xf32>
    %184 = arith.negf %183 : vector<2x128xf32>
    %185 = math.exp %184 : vector<2x128xf32>
    %cst_47 = arith.constant 1.000000e+00 : f32
    %186 = vector.broadcast %cst_47 : f32 to vector<2x128xf32>
    %187 = arith.addf %186, %185 : vector<2x128xf32>
    %188 = arith.divf %186, %187 : vector<2x128xf32>
    %189 = vector.extract_strided_slice %182 {offsets = [0, 128], sizes = [2, 128], strides = [1, 1]} : vector<2x512xf32> to vector<2x128xf32>
    %190 = arith.negf %189 : vector<2x128xf32>
    %191 = math.exp %190 : vector<2x128xf32>
    %cst_48 = arith.constant 1.000000e+00 : f32
    %192 = vector.broadcast %cst_48 : f32 to vector<2x128xf32>
    %193 = arith.addf %192, %191 : vector<2x128xf32>
    %194 = arith.divf %192, %193 : vector<2x128xf32>
    %195 = vector.extract_strided_slice %182 {offsets = [0, 256], sizes = [2, 128], strides = [1, 1]} : vector<2x512xf32> to vector<2x128xf32>
    %196 = math.tanh %195 : vector<2x128xf32>
    %197 = vector.extract_strided_slice %182 {offsets = [0, 384], sizes = [2, 128], strides = [1, 1]} : vector<2x512xf32> to vector<2x128xf32>
    %198 = arith.negf %197 : vector<2x128xf32>
    %199 = math.exp %198 : vector<2x128xf32>
    %cst_49 = arith.constant 1.000000e+00 : f32
    %200 = vector.broadcast %cst_49 : f32 to vector<2x128xf32>
    %201 = arith.addf %200, %199 : vector<2x128xf32>
    %202 = arith.divf %200, %201 : vector<2x128xf32>
    %203 = arith.mulf %194, %171 : vector<2x128xf32>
    %204 = arith.mulf %188, %196 : vector<2x128xf32>
    %205 = arith.addf %203, %204 : vector<2x128xf32>
    %206 = math.tanh %205 : vector<2x128xf32>
    %207 = arith.mulf %202, %206 : vector<2x128xf32>
    %208 = arith.addf %174, %207 : vector<2x128xf32>
    %c0_i32_50 = arith.constant 0 : i32
    %209 = arith.cmpi eq, %arg0, %c0_i32_50 : i32
    %c6_i32_51 = arith.constant 6 : i32
    %c1_i32_52 = arith.constant 1 : i32
    %210 = arith.select %209, %c6_i32_51, %c1_i32_52 : i32
    %211 = arith.index_cast %210 : i32 to index
    %c0_53 = arith.constant 0 : index
    %c0_54 = arith.constant 0 : index
    %212 = vector.load %arg1[%211, %c0_53, %c0_54] : memref<8x2x512xf32, #tpu.memory_space<vmem>>, vector<1x2x512xf32>
    %213 = vector.shape_cast %212 : vector<1x2x512xf32> to vector<2x512xf32>
    %214 = arith.truncf %207 : vector<2x128xf32> to vector<2x128xbf16>
    %cst_55 = arith.constant dense<0.000000e+00> : vector<2x512xf32>
    %215 = tpu.matmul %214, %1, %cst_55 {dimension_numbers = #tpu.dot_dimension_numbers<[1], [0], [0], [1], [0, 0, 1, 1], [], []>} : vector<2x128xbf16>, vector<128x512xbf16>, vector<2x512xf32> -> vector<2x512xf32>
    %216 = arith.addf %213, %215 : vector<2x512xf32>
    %217 = vector.extract_strided_slice %216 {offsets = [0, 0], sizes = [2, 128], strides = [1, 1]} : vector<2x512xf32> to vector<2x128xf32>
    %218 = arith.negf %217 : vector<2x128xf32>
    %219 = math.exp %218 : vector<2x128xf32>
    %cst_56 = arith.constant 1.000000e+00 : f32
    %220 = vector.broadcast %cst_56 : f32 to vector<2x128xf32>
    %221 = arith.addf %220, %219 : vector<2x128xf32>
    %222 = arith.divf %220, %221 : vector<2x128xf32>
    %223 = vector.extract_strided_slice %216 {offsets = [0, 128], sizes = [2, 128], strides = [1, 1]} : vector<2x512xf32> to vector<2x128xf32>
    %224 = arith.negf %223 : vector<2x128xf32>
    %225 = math.exp %224 : vector<2x128xf32>
    %cst_57 = arith.constant 1.000000e+00 : f32
    %226 = vector.broadcast %cst_57 : f32 to vector<2x128xf32>
    %227 = arith.addf %226, %225 : vector<2x128xf32>
    %228 = arith.divf %226, %227 : vector<2x128xf32>
    %229 = vector.extract_strided_slice %216 {offsets = [0, 256], sizes = [2, 128], strides = [1, 1]} : vector<2x512xf32> to vector<2x128xf32>
    %230 = math.tanh %229 : vector<2x128xf32>
    %231 = vector.extract_strided_slice %216 {offsets = [0, 384], sizes = [2, 128], strides = [1, 1]} : vector<2x512xf32> to vector<2x128xf32>
    %232 = arith.negf %231 : vector<2x128xf32>
    %233 = math.exp %232 : vector<2x128xf32>
    %cst_58 = arith.constant 1.000000e+00 : f32
    %234 = vector.broadcast %cst_58 : f32 to vector<2x128xf32>
    %235 = arith.addf %234, %233 : vector<2x128xf32>
    %236 = arith.divf %234, %235 : vector<2x128xf32>
    %237 = arith.mulf %228, %205 : vector<2x128xf32>
    %238 = arith.mulf %222, %230 : vector<2x128xf32>
    %239 = arith.addf %237, %238 : vector<2x128xf32>
    %240 = math.tanh %239 : vector<2x128xf32>
    %241 = arith.mulf %236, %240 : vector<2x128xf32>
    %242 = arith.addf %208, %241 : vector<2x128xf32>
    %c0_i32_59 = arith.constant 0 : i32
    %243 = arith.cmpi eq, %arg0, %c0_i32_59 : i32
    %c7_i32_60 = arith.constant 7 : i32
    %c0_i32_61 = arith.constant 0 : i32
    %244 = arith.select %243, %c7_i32_60, %c0_i32_61 : i32
    %245 = arith.index_cast %244 : i32 to index
    %c0_62 = arith.constant 0 : index
    %c0_63 = arith.constant 0 : index
    %246 = vector.load %arg1[%245, %c0_62, %c0_63] : memref<8x2x512xf32, #tpu.memory_space<vmem>>, vector<1x2x512xf32>
    %247 = vector.shape_cast %246 : vector<1x2x512xf32> to vector<2x512xf32>
    %248 = arith.truncf %241 : vector<2x128xf32> to vector<2x128xbf16>
    %cst_64 = arith.constant dense<0.000000e+00> : vector<2x512xf32>
    %249 = tpu.matmul %248, %1, %cst_64 {dimension_numbers = #tpu.dot_dimension_numbers<[1], [0], [0], [1], [0, 0, 1, 1], [], []>} : vector<2x128xbf16>, vector<128x512xbf16>, vector<2x512xf32> -> vector<2x512xf32>
    %250 = arith.addf %247, %249 : vector<2x512xf32>
    %251 = vector.extract_strided_slice %250 {offsets = [0, 0], sizes = [2, 128], strides = [1, 1]} : vector<2x512xf32> to vector<2x128xf32>
    %252 = arith.negf %251 : vector<2x128xf32>
    %253 = math.exp %252 : vector<2x128xf32>
    %cst_65 = arith.constant 1.000000e+00 : f32
    %254 = vector.broadcast %cst_65 : f32 to vector<2x128xf32>
    %255 = arith.addf %254, %253 : vector<2x128xf32>
    %256 = arith.divf %254, %255 : vector<2x128xf32>
    %257 = vector.extract_strided_slice %250 {offsets = [0, 128], sizes = [2, 128], strides = [1, 1]} : vector<2x512xf32> to vector<2x128xf32>
    %258 = arith.negf %257 : vector<2x128xf32>
    %259 = math.exp %258 : vector<2x128xf32>
    %cst_66 = arith.constant 1.000000e+00 : f32
    %260 = vector.broadcast %cst_66 : f32 to vector<2x128xf32>
    %261 = arith.addf %260, %259 : vector<2x128xf32>
    %262 = arith.divf %260, %261 : vector<2x128xf32>
    %263 = vector.extract_strided_slice %250 {offsets = [0, 256], sizes = [2, 128], strides = [1, 1]} : vector<2x512xf32> to vector<2x128xf32>
    %264 = math.tanh %263 : vector<2x128xf32>
    %265 = vector.extract_strided_slice %250 {offsets = [0, 384], sizes = [2, 128], strides = [1, 1]} : vector<2x512xf32> to vector<2x128xf32>
    %266 = arith.negf %265 : vector<2x128xf32>
    %267 = math.exp %266 : vector<2x128xf32>
    %cst_67 = arith.constant 1.000000e+00 : f32
    %268 = vector.broadcast %cst_67 : f32 to vector<2x128xf32>
    %269 = arith.addf %268, %267 : vector<2x128xf32>
    %270 = arith.divf %268, %269 : vector<2x128xf32>
    %271 = arith.mulf %262, %239 : vector<2x128xf32>
    %272 = arith.mulf %256, %264 : vector<2x128xf32>
    %273 = arith.addf %271, %272 : vector<2x128xf32>
    %274 = math.tanh %273 : vector<2x128xf32>
    %275 = arith.mulf %270, %274 : vector<2x128xf32>
    %276 = arith.addf %242, %275 : vector<2x128xf32>
    %cst_68 = arith.constant 1.250000e-01 : f32
    %277 = vector.broadcast %cst_68 : f32 to vector<2x128xf32>
    %278 = arith.mulf %276, %277 : vector<2x128xf32>
    %c0_69 = arith.constant 0 : index
    %c0_70 = arith.constant 0 : index
    %c0_71 = arith.constant 0 : index
    %279 = vector.load %arg3[%c0_69, %c0_70, %c0_71] : memref<1x128x6xf32, #tpu.memory_space<vmem>>, vector<1x128x6xf32>
    %280 = vector.shape_cast %279 : vector<1x128x6xf32> to vector<128x6xf32>
    %cst_72 = arith.constant dense<0.000000e+00> : vector<2x6xf32>
    %281 = tpu.matmul %278, %280, %cst_72 {dimension_numbers = #tpu.dot_dimension_numbers<[1], [0], [0], [1], [0, 0, 1, 1], [], []>} : vector<2x128xf32>, vector<128x6xf32>, vector<2x6xf32> -> vector<2x6xf32>
    %c0_73 = arith.constant 0 : index
    %c0_74 = arith.constant 0 : index
    %c0_75 = arith.constant 0 : index
    %282 = vector.load %arg4[%c0_73, %c0_74, %c0_75] : memref<1x2x6xf32, #tpu.memory_space<vmem>>, vector<1x2x6xf32>
    %283 = vector.shape_cast %282 : vector<1x2x6xf32> to vector<2x6xf32>
    %284 = vector.shape_cast %281 : vector<2x6xf32> to vector<1x2x6xf32>
    tpu.vector_store %arg4[%c0_73, %c0_74, %c0_75], %284 {strides = array<i32>} : memref<1x2x6xf32, #tpu.memory_space<vmem>>, vector<1x2x6xf32>,
    return
  }
  func.func @transform_0(%arg0: i32) -> (i32, i32, i32) {
    %c0_i32 = arith.constant 0 : i32
    %c0_i32_0 = arith.constant 0 : i32
    %c0_i32_1 = arith.constant 0 : i32
    return %c0_i32, %c0_i32_0, %arg0 : i32, i32, i32
  }
  func.func @transform_1(%arg0: i32) -> (i32, i32, i32) {
    %c0_i32 = arith.constant 0 : i32
    %c0_i32_0 = arith.constant 0 : i32
    %c0_i32_1 = arith.constant 0 : i32
    return %arg0, %c0_i32, %c0_i32_0 : i32, i32, i32
  }
  func.func @transform_2(%arg0: i32) -> (i32, i32, i32) {
    %c0_i32 = arith.constant 0 : i32
    %c0_i32_0 = arith.constant 0 : i32
    %c0_i32_1 = arith.constant 0 : i32
    return %arg0, %c0_i32, %c0_i32_0 : i32, i32, i32
  }
  func.func @transform_3(%arg0: i32) -> (i32, i32, i32) {
    %c0_i32 = arith.constant 0 : i32
    %c0_i32_0 = arith.constant 0 : i32
    %c0_i32_1 = arith.constant 0 : i32
    return %arg0, %c0_i32, %c0_i32_0 : i32, i32, i32
  }
}

</mosaic_0001>

<bundles_post_ra>
// kernel: lstm_model_forward.4
= control target key start
LH: loop header
LB: loop body
LE: loop exit
PB: predicated region body
PF: predicated region fallthrough
CT: control target
= control target key end

     0   :  { %v581_v0 = vmov 0.0   ;;  %vm582_vm0 = vmmov 0   ;;  %vm47_vm1 = vcmask 261120   ;;  %v583_v46 = vmov 0   ;;  %s780_s1 = inlined_call_operand.vmem [shape: bf16[32,64], index: 1, kind: input, shape index: {}]   ;;  %s781_s0 = inlined_call_operand.vmem [shape: f32[16,32], index: 0, kind: input, shape index: {}]   ;;  %s782_s3 = inlined_call_operand.vmem [shape: bf16[64,1024], index: 3, kind: input, shape index: {}]   ;;  %s783_s2 = inlined_call_operand.vmem [shape: f32[1,64], index: 2, kind: input, shape index: {}]   ;;  %s784_s4 = inlined_call_operand.vmem [shape: f32[1,1024], index: 4, kind: input, shape index: {}]   ;;  %s785_s5 = inlined_call_operand.vmem [shape: f32[16,1024], index: 5, kind: output, shape index: {}]  }
   0x1   :  { %568 = vmatprep.subr.bf16.mxu0 %v581_v0  ;;  %v579_v1 = vld [vmem:[%s780_s1] sm:$0xff]   ;;  %572 = vmatprep.mubr.msk.bf16.mxu0 %vm582_vm0, %v581_v0  ;;  %v580_v2 = vld [vmem:[%s780_s1 + $0x8] sm:$0xff]   ;;  %v97_v38 = vld [vmem:[%s782_s3 + $0x10] sm:$0xff]  ;;  %vm329_vm2 = vcmask 523264  }
   0x2   :  { %569 = vmatpush3.bf16.msra.mxu0 %v579_v1  ;;  %v21_v3 = vld [vmem:[%s781_s0] sm:$0xff]  ;;  %v22_v4 = vld [vmem:[%s781_s0 + $0x8] sm:$0xff]  ;;  %v101_v39 = vld [vmem:[%s782_s3 + $0x30] sm:$0xff]  ;;  %365 = vmatprep.mubr.bf16.mxu1 %v583_v46 }
   0x3   :  { %v95_v5 = vld [vmem:[%s782_s3] sm:$0xff]  ;;  %570 = vmatprep.subr.bf16.mxu0 %v581_v0  ;;  %v96_v7 = vld [vmem:[%s782_s3 + $0x8] sm:$0xff]  ;;  %v23_v15 = vpack.c.bf16 %v22_v4, %v21_v3  ;;  %v98_v40 = vld [vmem:[%s782_s3 + $0x18] sm:$0xff]  ;;  %v534_v41 = vcombine.high %v97_v38, %v101_v39  ;;  %v533_v43 = vcombine.low %v97_v38, %v101_v39 }
   0x4   :  { %v99_v6 = vld [vmem:[%s782_s3 + $0x20] sm:$0xff]  ;;  %v100_v8 = vld [vmem:[%s782_s3 + $0x28] sm:$0xff]  ;;  %v102_v42 = vld [vmem:[%s782_s3 + $0x38] sm:$0xff] }
   0x5   :  { %v530_v9 = vcombine.high %v95_v5, %v99_v6  ;;  %v532_v10 = vcombine.high %v96_v7, %v100_v8  ;;  %v529_v11 = vcombine.low %v95_v5, %v99_v6  ;;  %v103_v12 = vld [vmem:[%s782_s3 + $0x40] sm:$0xff]  ;;  %v104_v14 = vld [vmem:[%s782_s3 + $0x48] sm:$0xff]  ;;  %v531_v18 = vcombine.low %v96_v7, %v100_v8  ;;  %v105_v54 = vld [vmem:[%s782_s3 + $0x50] sm:$0xff] }
   0x6   :  { %v107_v13 = vld [vmem:[%s782_s3 + $0x60] sm:$0xff]  ;;  %v108_v17 = vld [vmem:[%s782_s3 + $0x68] sm:$0xff]  ;;  %571 = vmatpush3.bf16.msra.mxu0 %v580_v2  ;;  %v535_v44 = vcombine.low %v98_v40, %v102_v42  ;;  %v536_v45 = vcombine.high %v98_v40, %v102_v42  ;;  %v109_v55 = vld [vmem:[%s782_s3 + $0x70] sm:$0xff] }
   0x7   :  { %v538_v16 = vcombine.high %v103_v12, %v107_v13  ;;  %333 = vmatprep.subr.bf16.mxu1 %v530_v9  ;;  %376 = vmatprep.subr.bf16.mxu0 %v532_v10  ;;  %v540_v19 = vcombine.high %v104_v14, %v108_v17  ;;  %v537_v20 = vcombine.low %v103_v12, %v107_v13  ;;  %v111_v22 = vld [vmem:[%s782_s3 + $0x80] sm:$0xff]  ;;  %v112_v24 = vld [vmem:[%s782_s3 + $0x88] sm:$0xff]  ;;  %v106_v56 = vld [vmem:[%s782_s3 + $0x58] sm:$0xff] }
   0x8   :  { %334 = vmatpush1.bf16.msra.mxu1 %v529_v11  ;;  %v539_v21 = vcombine.low %v104_v14, %v108_v17  ;;  %v115_v23 = vld [vmem:[%s782_s3 + $0xa0] sm:$0xff]  ;;  %v116_v26 = vld [vmem:[%s782_s3 + $0xa8] sm:$0xff]  ;;  %v110_v57 = vld [vmem:[%s782_s3 + $0x78] sm:$0xff]  ;;  %v542_v61 = vcombine.high %v105_v54, %v109_v55  ;;  %v541_v3 = vcombine.low %v105_v54, %v109_v55  ;;  %v129_v17 = vlaneseq }
   0x9   :  { %335 = vmatprep.subr.bf16.mxu1 %v538_v16  ;;  %573 = vmatmul.mubr.msk.bf16.vlgmr.msra.gmra.mrb[0].mxu0 %vm47_vm1, %v23_v15  ;;  %v546_v25 = vcombine.high %v111_v22, %v115_v23  ;;  %v547_v27 = vcombine.low %v112_v24, %v116_v26  ;;  %v548_v28 = vcombine.high %v112_v24, %v116_v26  ;;  %v119_v30 = vld [vmem:[%s782_s3 + $0xc0] sm:$0xff]  ;;  %v120_v32 = vld [vmem:[%s782_s3 + $0xc8] sm:$0xff]  ;;  %v113_v63 = vld [vmem:[%s782_s3 + $0x90] sm:$0xff] }
   0xa   :  { %377 = vmatpush1.bf16.msra.mxu0 %v531_v18  ;;  %v545_v29 = vcombine.low %v111_v22, %v115_v23  ;;  %v123_v31 = vld [vmem:[%s782_s3 + $0xe0] sm:$0xff]  ;;  %v124_v34 = vld [vmem:[%s782_s3 + $0xe8] sm:$0xff]  ;;  %408 = vmatprep.mubr.bf16.mxu0 %v583_v46  ;;  %v544_v62 = vcombine.high %v106_v56, %v110_v57  ;;  %v117_v0 = vld [vmem:[%s782_s3 + $0xb0] sm:$0xff]  ;;  %v543_v4 = vcombine.low %v106_v56, %v110_v57  ;;  %v130_v18 = vshrl.u32 %v129_v17, 7 }
   0xb   :  { %378 = vmatprep.subr.bf16.mxu0 %v540_v19  ;;  %v554_v33 = vcombine.high %v119_v30, %v123_v31  ;;  %v555_v35 = vcombine.low %v120_v32, %v124_v34  ;;  %v556_v36 = vcombine.high %v120_v32, %v124_v34  ;;  %v553_v37 = vcombine.low %v119_v30, %v123_v31  ;;  %v525_v47 = vld [vmem:[%s783_s2] ss:$0 sm:$0xff]  ;;  %v114_v1 = vld [vmem:[%s782_s3 + $0x98] sm:$0xff]  ;;  %v121_v7 = vld [vmem:[%s782_s3 + $0xd0] sm:$0xff] }
   0xc   :  { %336 = vmatpush1.bf16.msra.mxu1 %v537_v20  ;;  %v118_v2 = vld [vmem:[%s782_s3 + $0xb8] sm:$0xff]  ;;  %v550_v5 = vcombine.high %v113_v63, %v117_v0  ;;  %v125_v8 = vld [vmem:[%s782_s3 + $0xf0] sm:$0xff]  ;;  %v549_v11 = vcombine.low %v113_v63, %v117_v0  ;;  %v131_v19 = vsub.s32 0, %v130_v18  ;;  %v139_v20 = vsub.s32 2, %v130_v18 }
   0xd   :  { %337 = vmatprep.subr.bf16.mxu1 %v546_v25  ;;  %v552_v6 = vcombine.high %v114_v1, %v118_v2  ;;  %v122_v9 = vld [vmem:[%s782_s3 + $0xd8] sm:$0xff]  ;;  %v551_v12 = vcombine.low %v114_v1, %v118_v2  ;;  %v558_v13 = vcombine.high %v121_v7, %v125_v8  ;;  %v557_v15 = vcombine.low %v121_v7, %v125_v8 }
   0xe   :  { %379 = vmatpush1.bf16.msra.mxu0 %v539_v21  ;;  %v126_v10 = vld [vmem:[%s782_s3 + $0xf8] sm:$0xff]  ;;  %v127_v21 = vld [vmem:[%s784_s4] sm:$0xff]  ;;  %v135_v22 = vsub.s32 1, %v130_v18  ;;  %v143_v23 = vsub.s32 3, %v130_v18 }
   0xf   :  { %380 = vmatprep.subr.bf16.mxu0 %v548_v28  ;;  %v560_v14 = vcombine.high %v122_v9, %v126_v10  ;;  %v559_v16 = vcombine.low %v122_v9, %v126_v10  ;;  %v132_v24 = vrot.slane %v127_v21, %v131_v19  ;;  %v140_v25 = vrot.slane %v127_v21, %v139_v20 }
  0x10   :  { %338 = vmatpush1.bf16.msra.mxu1 %v545_v29  ;;  %v136_v26 = vrot.slane %v127_v21, %v135_v22 }
  0x11   :  { %339 = vmatprep.subr.bf16.mxu1 %v554_v33 }
  0x12   :  { %381 = vmatpush1.bf16.msra.mxu0 %v547_v27  ;;  %v144_v27 = vrot.slane %v127_v21, %v143_v23 }
  0x13   :  { %382 = vmatprep.subr.bf16.mxu0 %v556_v36 }
  0x14   :  { %340 = vmatpush1.bf16.msra.mxu1 %v553_v37 }
  0x15   :  { %419 = vmatprep.subr.bf16.mxu1 %v534_v41 }
  0x16   :  { %383 = vmatpush1.bf16.msra.mxu0 %v555_v35 }
  0x17   :  { %462 = vmatprep.subr.bf16.mxu0 %v536_v45  ;;  %v155_v45 = vsub.s32 6, %v130_v18 }
  0xdc   :  { %v85_v48 = vpop.f32.mrb[0].mxu0 }
  0xdd   :  { %v86_v49 = vadd.f32 %v525_v47, %v85_v48  ;;  %v574_v50 = vpop.f32.mrb[1].mxu0 }
  0xde   :  { %v88_v51 = vpop.f32.mrb[2].mxu0 }
  0xdf   :  { %v89_v52 = vadd.f32 %v525_v47, %v88_v51  ;;  %v575_v53 = vpop.f32.mrb[3].mxu0  ;;  %v92_v58 = vmax.f32 %v86_v49, 0.0  ;;  %v159_v47 = vsub.s32 7, %v130_v18  ;;  %v156_v49 = vrot.slane %v127_v21, %v155_v45 }
  0xe1   :  { %v93_v59 = vmax.f32 %v89_v52, 0.0  ;;  %v160_v51 = vrot.slane %v127_v21, %v159_v47 }
  0xe3   :  { %v94_v60 = vpack.c.bf16 %v93_v59, %v92_v58 }
  0xe5   :  { %561 = vmatmul.mubr.msk.bf16.vlgmr.msra.gmra.mrb[0].mxu1 %vm329_vm2, %v94_v60  ;;  %562 = vmatmul.mubr.msk.bf16.vlgmr.msra.gmra.mrb[4].mxu0 %vm329_vm2, %v94_v60 }
  0xe6   :  { %420 = vmatpush1.bf16.msra.mxu1 %v533_v43  ;;  %463 = vmatpush1.bf16.msra.mxu0 %v535_v44  ;;  %v147_v44 = vsub.s32 4, %v130_v18 }
  0xe7   :  { %421 = vmatprep.subr.bf16.mxu1 %v542_v61  ;;  %464 = vmatprep.subr.bf16.mxu0 %v544_v62 }
  0xe8   :  { %451 = vmatprep.mubr.bf16.mxu1 %v583_v46  ;;  %494 = vmatprep.mubr.bf16.mxu0 %v583_v46  ;;  %v151_v46 = vsub.s32 5, %v130_v18  ;;  %v148_v48 = vrot.slane %v127_v21, %v147_v44 }
  0xea   :  { %422 = vmatpush1.bf16.msra.mxu1 %v541_v3  ;;  %465 = vmatpush1.bf16.msra.mxu0 %v543_v4  ;;  %v152_v50 = vrot.slane %v127_v21, %v151_v46 }
  0xeb   :  { %423 = vmatprep.subr.bf16.mxu1 %v550_v5  ;;  %466 = vmatprep.subr.bf16.mxu0 %v552_v6 }
  0xee   :  { %424 = vmatpush1.bf16.msra.mxu1 %v549_v11  ;;  %467 = vmatpush1.bf16.msra.mxu0 %v551_v12 }
  0xef   :  { %425 = vmatprep.subr.bf16.mxu1 %v558_v13  ;;  %468 = vmatprep.subr.bf16.mxu0 %v560_v14 }
  0xf2   :  { %426 = vmatpush1.bf16.msra.mxu1 %v557_v15  ;;  %469 = vmatpush1.bf16.msra.mxu0 %v559_v16 }
  0xf5   :  { %563 = vmatmul.mubr.msk.bf16.vlgmr.msra.gmra.mrb[4].mxu1 %vm329_vm2, %v94_v60  ;;  %564 = vmatmul.mubr.msk.bf16.vlgmr.msra.gmra.mrb[8].mxu0 %vm329_vm2, %v94_v60 }
 0x1b8   :  { %v367_v28 = vpop.f32.mrb[0].mxu1  ;;  %v410_v29 = vpop.f32.mrb[4].mxu0 }
 0x1b9   :  { %v368_v30 = vadd.f32 %v367_v28, %v132_v24  ;;  %v411_v31 = vadd.f32 %v410_v29, %v140_v25  ;;  %v369_v32 = vpop.f32.mrb[1].mxu1  ;;  %v412_v33 = vpop.f32.mrb[5].mxu0 }
 0x1ba   :  { %v370_v34 = vadd.f32 %v369_v32, %v136_v26  ;;  %v413_v35 = vadd.f32 %v412_v33, %v144_v27  ;;  %v371_v36 = vpop.f32.mrb[2].mxu1  ;;  %v414_v37 = vpop.f32.mrb[6].mxu0 }
 0x1bb   :  { %505 = vst [vmem:[%s785_s5] sm:$0xff] %v368_v30  ;;  %507 = vst [vmem:[%s785_s5 + $0x10] sm:$0xff] %v411_v31  ;;  %v372_v38 = vadd.f32 %v371_v36, %v132_v24  ;;  %v415_v39 = vadd.f32 %v414_v37, %v140_v25  ;;  %v373_v40 = vpop.f32.mrb[3].mxu1  ;;  %v416_v41 = vpop.f32.mrb[7].mxu0 }
 0x1bc   :  { %506 = vst [vmem:[%s785_s5 + $0x8] sm:$0xff] %v370_v34  ;;  %508 = vst [vmem:[%s785_s5 + $0x18] sm:$0xff] %v413_v35  ;;  %v374_v42 = vadd.f32 %v373_v40, %v136_v26  ;;  %v417_v43 = vadd.f32 %v416_v41, %v144_v27 }
 0x1bd   :  { %513 = vst [vmem:[%s785_s5 + $0x40] sm:$0xff] %v372_v38  ;;  %515 = vst [vmem:[%s785_s5 + $0x50] sm:$0xff] %v415_v39 }
 0x1be   :  { %514 = vst [vmem:[%s785_s5 + $0x48] sm:$0xff] %v374_v42  ;;  %516 = vst [vmem:[%s785_s5 + $0x58] sm:$0xff] %v417_v43 }
 0x1c8   :  { %v453_v52 = vpop.f32.mrb[4].mxu1  ;;  %v496_v53 = vpop.f32.mrb[8].mxu0 }
 0x1c9   :  { %v454_v54 = vadd.f32 %v453_v52, %v148_v48  ;;  %v497_v55 = vadd.f32 %v496_v53, %v156_v49  ;;  %v455_v56 = vpop.f32.mrb[5].mxu1  ;;  %v498_v57 = vpop.f32.mrb[9].mxu0 }
 0x1ca   :  { %v456_v58 = vadd.f32 %v455_v56, %v152_v50  ;;  %v499_v59 = vadd.f32 %v498_v57, %v160_v51  ;;  %v457_v60 = vpop.f32.mrb[6].mxu1  ;;  %v500_v61 = vpop.f32.mrb[10].mxu0 }
 0x1cb   :  { %509 = vst [vmem:[%s785_s5 + $0x20] sm:$0xff] %v454_v54  ;;  %511 = vst [vmem:[%s785_s5 + $0x30] sm:$0xff] %v497_v55  ;;  %v458_v62 = vadd.f32 %v457_v60, %v148_v48  ;;  %v501_v63 = vadd.f32 %v500_v61, %v156_v49  ;;  %v459_v0 = vpop.f32.mrb[7].mxu1  ;;  %v502_v1 = vpop.f32.mrb[11].mxu0 }
 0x1cc   :  { %510 = vst [vmem:[%s785_s5 + $0x28] sm:$0xff] %v456_v58  ;;  %512 = vst [vmem:[%s785_s5 + $0x38] sm:$0xff] %v499_v59  ;;  %v460_v2 = vadd.f32 %v459_v0, %v152_v50  ;;  %v503_v3 = vadd.f32 %v502_v1, %v160_v51 }
 0x1cd   :  { %517 = vst [vmem:[%s785_s5 + $0x60] sm:$0xff] %v458_v62  ;;  %519 = vst [vmem:[%s785_s5 + $0x70] sm:$0xff] %v501_v63 }
 0x1ce   :  { %518 = vst [vmem:[%s785_s5 + $0x68] sm:$0xff] %v460_v2  ;;  %520 = vst [vmem:[%s785_s5 + $0x78] sm:$0xff] %v503_v3 }

// kernel: lstm_model_forward.6
= control target key start
LH: loop header
LB: loop body
LE: loop exit
PB: predicated region body
PF: predicated region fallthrough
CT: control target
= control target key end

     0   :  { %s1629_s1 = inlined_call_operand.vmem [shape: bf16[256,1024], index: 1, kind: input, shape index: {}]   ;;  %s1630_s0 = inlined_call_operand.vmem [shape: f32[16,256], index: 0, kind: input, shape index: {}]   ;;  %s1631_s2 = inlined_call_operand.vmem [shape: f32[1,1024], index: 2, kind: input, shape index: {}]   ;;  %s1632_s3 = inlined_call_operand.vmem [shape: f32[16,1024], index: 3, kind: output, shape index: {}]  }
   0x1   :  { %v20_v0 = vld [vmem:[%s1629_s1] sm:$0xff]  ;;  %v21_v2 = vld [vmem:[%s1629_s1 + $0x8] sm:$0xff]  ;;  %v17_v54 = vld [vmem:[%s1630_s0 + $0x18] sm:$0xff] }
   0x2   :  { %v24_v1 = vld [vmem:[%s1629_s1 + $0x20] sm:$0xff]  ;;  %v25_v4 = vld [vmem:[%s1629_s1 + $0x28] sm:$0xff] }
   0x3   :  { %v1023_v3 = vcombine.high %v20_v0, %v24_v1  ;;  %v1022_v5 = vcombine.low %v20_v0, %v24_v1  ;;  %v28_v6 = vld [vmem:[%s1629_s1 + $0x40] sm:$0xff]  ;;  %v1025_v8 = vcombine.high %v21_v2, %v25_v4  ;;  %v1024_v9 = vcombine.low %v21_v2, %v25_v4  ;;  %v29_v11 = vld [vmem:[%s1629_s1 + $0x48] sm:$0xff] }
   0x4   :  { %v32_v7 = vld [vmem:[%s1629_s1 + $0x60] sm:$0xff]  ;;  %v33_v12 = vld [vmem:[%s1629_s1 + $0x68] sm:$0xff] }
   0x5   :  { %v1031_v10 = vcombine.high %v28_v6, %v32_v7  ;;  %v36_v13 = vld [vmem:[%s1629_s1 + $0x80] sm:$0xff]  ;;  %830 = vmatprep.subr.bf16.mxu0 %v1023_v3  ;;  %v1033_v14 = vcombine.high %v29_v11, %v33_v12  ;;  %v37_v16 = vld [vmem:[%s1629_s1 + $0x88] sm:$0xff]  ;;  %873 = vmatprep.subr.bf16.mxu1 %v1025_v8  ;;  %v1030_v18 = vcombine.low %v28_v6, %v32_v7 }
   0x6   :  { %v40_v15 = vld [vmem:[%s1629_s1 + $0xa0] sm:$0xff]  ;;  %v41_v17 = vld [vmem:[%s1629_s1 + $0xa8] sm:$0xff]  ;;  %831 = vmatpush1.bf16.msra.mxu0 %v1022_v5  ;;  %874 = vmatpush1.bf16.msra.mxu1 %v1024_v9  ;;  %v1032_v19 = vcombine.low %v29_v11, %v33_v12 }
   0x7   :  { %832 = vmatprep.subr.bf16.mxu0 %v1031_v10  ;;  %v1039_v20 = vcombine.high %v36_v13, %v40_v15  ;;  %875 = vmatprep.subr.bf16.mxu1 %v1033_v14  ;;  %v1041_v21 = vcombine.high %v37_v16, %v41_v17  ;;  %v44_v22 = vld [vmem:[%s1629_s1 + $0xc0] sm:$0xff]  ;;  %v45_v24 = vld [vmem:[%s1629_s1 + $0xc8] sm:$0xff]  ;;  %v1038_v26 = vcombine.low %v36_v13, %v40_v15 }
   0x8   :  { %v48_v23 = vld [vmem:[%s1629_s1 + $0xe0] sm:$0xff]  ;;  %v49_v25 = vld [vmem:[%s1629_s1 + $0xe8] sm:$0xff]  ;;  %v1040_v27 = vcombine.low %v37_v16, %v41_v17 }
   0x9   :  { %v1047_v28 = vcombine.high %v44_v22, %v48_v23  ;;  %v1049_v29 = vcombine.high %v45_v24, %v49_v25  ;;  %v52_v30 = vld [vmem:[%s1629_s1 + $0x100] sm:$0xff]  ;;  %v53_v32 = vld [vmem:[%s1629_s1 + $0x108] sm:$0xff]  ;;  %v1046_v34 = vcombine.low %v44_v22, %v48_v23  ;;  %v1048_v35 = vcombine.low %v45_v24, %v49_v25 }
   0xa   :  { %833 = vmatpush1.bf16.msra.mxu0 %v1030_v18  ;;  %876 = vmatpush1.bf16.msra.mxu1 %v1032_v19  ;;  %v56_v31 = vld [vmem:[%s1629_s1 + $0x120] sm:$0xff]  ;;  %v57_v33 = vld [vmem:[%s1629_s1 + $0x128] sm:$0xff] }
   0xb   :  { %834 = vmatprep.subr.bf16.mxu0 %v1039_v20  ;;  %877 = vmatprep.subr.bf16.mxu1 %v1041_v21  ;;  %v1055_v36 = vcombine.high %v52_v30, %v56_v31  ;;  %v1057_v37 = vcombine.high %v53_v32, %v57_v33  ;;  %v60_v38 = vld [vmem:[%s1629_s1 + $0x140] sm:$0xff]  ;;  %v61_v40 = vld [vmem:[%s1629_s1 + $0x148] sm:$0xff]  ;;  %v1054_v42 = vcombine.low %v52_v30, %v56_v31 }
   0xc   :  { %v64_v39 = vld [vmem:[%s1629_s1 + $0x160] sm:$0xff]  ;;  %v65_v41 = vld [vmem:[%s1629_s1 + $0x168] sm:$0xff]  ;;  %v1056_v43 = vcombine.low %v53_v32, %v57_v33 }
   0xd   :  { %v1063_v44 = vcombine.high %v60_v38, %v64_v39  ;;  %v1065_v45 = vcombine.high %v61_v40, %v65_v41  ;;  %v68_v46 = vld [vmem:[%s1629_s1 + $0x180] sm:$0xff]  ;;  %v69_v48 = vld [vmem:[%s1629_s1 + $0x188] sm:$0xff]  ;;  %v1062_v50 = vcombine.low %v60_v38, %v64_v39  ;;  %v1064_v51 = vcombine.low %v61_v40, %v65_v41 }
   0xe   :  { %835 = vmatpush1.bf16.msra.mxu0 %v1038_v26  ;;  %878 = vmatpush1.bf16.msra.mxu1 %v1040_v27  ;;  %v72_v47 = vld [vmem:[%s1629_s1 + $0x1a0] sm:$0xff]  ;;  %v73_v49 = vld [vmem:[%s1629_s1 + $0x1a8] sm:$0xff] }
   0xf   :  { %836 = vmatprep.subr.bf16.mxu0 %v1047_v28  ;;  %879 = vmatprep.subr.bf16.mxu1 %v1049_v29  ;;  %v1071_v52 = vcombine.high %v68_v46, %v72_v47  ;;  %v15_v53 = vld [vmem:[%s1630_s0 + $0x8] sm:$0xff]  ;;  %v1073_v55 = vcombine.high %v69_v48, %v73_v49  ;;  %v76_v56 = vld [vmem:[%s1629_s1 + $0x1c0] sm:$0xff]  ;;  %v1070_v61 = vcombine.low %v68_v46, %v72_v47 }
  0x10   :  { %v80_v57 = vld [vmem:[%s1629_s1 + $0x1e0] sm:$0xff]  ;;  %v1266_v58 = vpack.c.bf16 %v17_v54, %v15_v53  ;;  %v77_v59 = vld [vmem:[%s1629_s1 + $0x1c8] sm:$0xff]  ;;  %v1072_v62 = vcombine.low %v69_v48, %v73_v49 }
  0x11   :  { %v81_v60 = vld [vmem:[%s1629_s1 + $0x1e8] sm:$0xff]  ;;  %v1079_v63 = vcombine.high %v76_v56, %v80_v57  ;;  %v84_v1 = vld [vmem:[%s1629_s1 + $0x200] sm:$0xff]  ;;  %v1078_v5 = vcombine.low %v76_v56, %v80_v57 }
  0x12   :  { %837 = vmatpush1.bf16.msra.mxu0 %v1046_v34  ;;  %880 = vmatpush1.bf16.msra.mxu1 %v1048_v35  ;;  %v1081_v0 = vcombine.high %v77_v59, %v81_v60  ;;  %v88_v2 = vld [vmem:[%s1629_s1 + $0x220] sm:$0xff]  ;;  %v85_v3 = vld [vmem:[%s1629_s1 + $0x208] sm:$0xff]  ;;  %v1080_v6 = vcombine.low %v77_v59, %v81_v60 }
  0x13   :  { %838 = vmatprep.subr.bf16.mxu0 %v1055_v36  ;;  %881 = vmatprep.subr.bf16.mxu1 %v1057_v37  ;;  %v89_v4 = vld [vmem:[%s1629_s1 + $0x228] sm:$0xff]  ;;  %v1087_v7 = vcombine.high %v84_v1, %v88_v2  ;;  %v92_v9 = vld [vmem:[%s1629_s1 + $0x240] sm:$0xff]  ;;  %v1086_v13 = vcombine.low %v84_v1, %v88_v2  ;;  %v22_v2 = vld [vmem:[%s1629_s1 + $0x10] sm:$0xff] }
  0x14   :  { %862 = vmatprep.mubr.bf16.mxu0 %v1266_v58  ;;  %905 = vmatprep.mubr.bf16.mxu1 %v1266_v58  ;;  %v1089_v8 = vcombine.high %v85_v3, %v89_v4  ;;  %v96_v10 = vld [vmem:[%s1629_s1 + $0x260] sm:$0xff]  ;;  %v93_v11 = vld [vmem:[%s1629_s1 + $0x248] sm:$0xff]  ;;  %v1088_v14 = vcombine.low %v85_v3, %v89_v4  ;;  %v26_v3 = vld [vmem:[%s1629_s1 + $0x30] sm:$0xff] }
  0x15   :  { %v97_v12 = vld [vmem:[%s1629_s1 + $0x268] sm:$0xff]  ;;  %v1095_v15 = vcombine.high %v92_v9, %v96_v10  ;;  %v100_v17 = vld [vmem:[%s1629_s1 + $0x280] sm:$0xff]  ;;  %v1094_v21 = vcombine.low %v92_v9, %v96_v10  ;;  %v23_v4 = vld [vmem:[%s1629_s1 + $0x18] sm:$0xff]  ;;  %v1027_v10 = vcombine.high %v22_v2, %v26_v3 }
  0x16   :  { %839 = vmatpush1.bf16.msra.mxu0 %v1054_v42  ;;  %882 = vmatpush1.bf16.msra.mxu1 %v1056_v43  ;;  %v1097_v16 = vcombine.high %v93_v11, %v97_v12  ;;  %v104_v18 = vld [vmem:[%s1629_s1 + $0x2a0] sm:$0xff]  ;;  %v101_v19 = vld [vmem:[%s1629_s1 + $0x288] sm:$0xff]  ;;  %v1096_v22 = vcombine.low %v93_v11, %v97_v12  ;;  %v30_v12 = vld [vmem:[%s1629_s1 + $0x50] sm:$0xff] }
  0x17   :  { %840 = vmatprep.subr.bf16.mxu0 %v1063_v44  ;;  %883 = vmatprep.subr.bf16.mxu1 %v1065_v45  ;;  %v105_v20 = vld [vmem:[%s1629_s1 + $0x2a8] sm:$0xff]  ;;  %v1103_v23 = vcombine.high %v100_v17, %v104_v18  ;;  %v108_v25 = vld [vmem:[%s1629_s1 + $0x2c0] sm:$0xff]  ;;  %v1102_v29 = vcombine.low %v100_v17, %v104_v18  ;;  %v1026_v17 = vcombine.low %v22_v2, %v26_v3 }
  0x18   :  { %v1105_v24 = vcombine.high %v101_v19, %v105_v20  ;;  %v112_v26 = vld [vmem:[%s1629_s1 + $0x2e0] sm:$0xff]  ;;  %v109_v27 = vld [vmem:[%s1629_s1 + $0x2c8] sm:$0xff]  ;;  %v1104_v30 = vcombine.low %v101_v19, %v105_v20 }
  0x19   :  { %v113_v28 = vld [vmem:[%s1629_s1 + $0x2e8] sm:$0xff]  ;;  %v1111_v31 = vcombine.high %v108_v25, %v112_v26  ;;  %v116_v33 = vld [vmem:[%s1629_s1 + $0x300] sm:$0xff]  ;;  %v1110_v37 = vcombine.low %v108_v25, %v112_v26 }
  0x1a   :  { %841 = vmatpush1.bf16.msra.mxu0 %v1062_v50  ;;  %884 = vmatpush1.bf16.msra.mxu1 %v1064_v51  ;;  %v1113_v32 = vcombine.high %v109_v27, %v113_v28  ;;  %v120_v34 = vld [vmem:[%s1629_s1 + $0x320] sm:$0xff]  ;;  %v117_v35 = vld [vmem:[%s1629_s1 + $0x308] sm:$0xff]  ;;  %v1112_v38 = vcombine.low %v109_v27, %v113_v28 }
  0x1b   :  { %842 = vmatprep.subr.bf16.mxu0 %v1071_v52  ;;  %885 = vmatprep.subr.bf16.mxu1 %v1073_v55  ;;  %v121_v36 = vld [vmem:[%s1629_s1 + $0x328] sm:$0xff]  ;;  %v1119_v39 = vcombine.high %v116_v33, %v120_v34  ;;  %v124_v41 = vld [vmem:[%s1629_s1 + $0x340] sm:$0xff]  ;;  %v1118_v45 = vcombine.low %v116_v33, %v120_v34 }
  0x1c   :  { %v1121_v40 = vcombine.high %v117_v35, %v121_v36  ;;  %v128_v42 = vld [vmem:[%s1629_s1 + $0x360] sm:$0xff]  ;;  %v125_v43 = vld [vmem:[%s1629_s1 + $0x348] sm:$0xff]  ;;  %v1120_v46 = vcombine.low %v117_v35, %v121_v36 }
  0x1d   :  { %v129_v44 = vld [vmem:[%s1629_s1 + $0x368] sm:$0xff]  ;;  %v1127_v47 = vcombine.high %v124_v41, %v128_v42  ;;  %v132_v49 = vld [vmem:[%s1629_s1 + $0x380] sm:$0xff]  ;;  %v1126_v53 = vcombine.low %v124_v41, %v128_v42 }
  0x1e   :  { %843 = vmatpush1.bf16.msra.mxu0 %v1070_v61  ;;  %886 = vmatpush1.bf16.msra.mxu1 %v1072_v62  ;;  %v1129_v48 = vcombine.high %v125_v43, %v129_v44  ;;  %v136_v50 = vld [vmem:[%s1629_s1 + $0x3a0] sm:$0xff]  ;;  %v133_v51 = vld [vmem:[%s1629_s1 + $0x388] sm:$0xff]  ;;  %v1128_v54 = vcombine.low %v125_v43, %v129_v44  ;;  %v62_v44 = vld [vmem:[%s1629_s1 + $0x150] sm:$0xff] }
  0x1f   :  { %844 = vmatprep.subr.bf16.mxu0 %v1079_v63  ;;  %887 = vmatprep.subr.bf16.mxu1 %v1081_v0  ;;  %v137_v52 = vld [vmem:[%s1629_s1 + $0x3a8] sm:$0xff]  ;;  %v1135_v55 = vcombine.high %v132_v49, %v136_v50  ;;  %v140_v57 = vld [vmem:[%s1629_s1 + $0x3c0] sm:$0xff]  ;;  %v1134_v62 = vcombine.low %v132_v49, %v136_v50 }
  0x20   :  { %v1137_v56 = vcombine.high %v133_v51, %v137_v52  ;;  %v144_v59 = vld [vmem:[%s1629_s1 + $0x3e0] sm:$0xff]  ;;  %v141_v60 = vld [vmem:[%s1629_s1 + $0x3c8] sm:$0xff]  ;;  %v1136_v63 = vcombine.low %v133_v51, %v137_v52  ;;  %v70_v52 = vld [vmem:[%s1629_s1 + $0x190] sm:$0xff] }
  0x21   :  { %v145_v61 = vld [vmem:[%s1629_s1 + $0x3e8] sm:$0xff]  ;;  %v1143_v0 = vcombine.high %v140_v57, %v144_v59 }
  0x22   :  { %845 = vmatpush1.bf16.msra.mxu0 %v1078_v5  ;;  %888 = vmatpush1.bf16.msra.mxu1 %v1080_v6  ;;  %v1145_v1 = vcombine.high %v141_v60, %v145_v61  ;;  %v27_v5 = vld [vmem:[%s1629_s1 + $0x38] sm:$0xff]  ;;  %v1142_v6 = vcombine.low %v140_v57, %v144_v59  ;;  %v1144_v9 = vcombine.low %v141_v60, %v145_v61  ;;  %v78_v61 = vld [vmem:[%s1629_s1 + $0x1d0] sm:$0xff] }
  0x23   :  { %846 = vmatprep.subr.bf16.mxu0 %v1087_v7  ;;  %889 = vmatprep.subr.bf16.mxu1 %v1089_v8  ;;  %v14_v7 = vld [vmem:[%s1630_s0] sm:$0xff]  ;;  %v16_v8 = vld [vmem:[%s1630_s0 + $0x10] sm:$0xff]  ;;  %v1029_v11 = vcombine.high %v23_v4, %v27_v5  ;;  %v1028_v18 = vcombine.low %v23_v4, %v27_v5 }
  0x24   :  { %v86_v5 = vld [vmem:[%s1629_s1 + $0x210] sm:$0xff] }
  0x26   :  { %847 = vmatpush1.bf16.msra.mxu0 %v1086_v13  ;;  %890 = vmatpush1.bf16.msra.mxu1 %v1088_v14  ;;  %v34_v13 = vld [vmem:[%s1629_s1 + $0x70] sm:$0xff]  ;;  %v1396_v14 = vpack.c.bf16 %v16_v8, %v14_v7  ;;  %v87_v7 = vld [vmem:[%s1629_s1 + $0x218] sm:$0xff] }
  0x27   :  { %848 = vmatprep.subr.bf16.mxu0 %v1095_v15  ;;  %891 = vmatprep.subr.bf16.mxu1 %v1097_v16  ;;  %v31_v15 = vld [vmem:[%s1629_s1 + $0x58] sm:$0xff]  ;;  %v1035_v19 = vcombine.high %v30_v12, %v34_v13  ;;  %v1034_v25 = vcombine.low %v30_v12, %v34_v13  ;;  %v94_v13 = vld [vmem:[%s1629_s1 + $0x250] sm:$0xff] }
  0x28   :  { %v35_v16 = vld [vmem:[%s1629_s1 + $0x78] sm:$0xff] }
  0x29   :  { %v1037_v20 = vcombine.high %v31_v15, %v35_v16  ;;  %v1036_v26 = vcombine.low %v31_v15, %v35_v16  ;;  %v91_v8 = vld [vmem:[%s1629_s1 + $0x238] sm:$0xff]  ;;  %v98_v15 = vld [vmem:[%s1629_s1 + $0x270] sm:$0xff] }
  0x2a   :  { %849 = vmatpush1.bf16.msra.mxu0 %v1094_v21  ;;  %892 = vmatpush1.bf16.msra.mxu1 %v1096_v22  ;;  %v38_v21 = vld [vmem:[%s1629_s1 + $0x90] sm:$0xff]  ;;  %v1093_v12 = vcombine.high %v87_v7, %v91_v8  ;;  %v95_v16 = vld [vmem:[%s1629_s1 + $0x258] sm:$0xff] }
  0x2b   :  { %850 = vmatprep.subr.bf16.mxu0 %v1103_v23  ;;  %893 = vmatprep.subr.bf16.mxu1 %v1105_v24  ;;  %v42_v22 = vld [vmem:[%s1629_s1 + $0xb0] sm:$0xff]  ;;  %v39_v23 = vld [vmem:[%s1629_s1 + $0x98] sm:$0xff] }
  0x2c   :  { %v43_v24 = vld [vmem:[%s1629_s1 + $0xb8] sm:$0xff]  ;;  %v1043_v27 = vcombine.high %v38_v21, %v42_v22  ;;  %v1042_v33 = vcombine.low %v38_v21, %v42_v22  ;;  %v102_v22 = vld [vmem:[%s1629_s1 + $0x290] sm:$0xff] }
  0x2d   :  { %v1045_v28 = vcombine.high %v39_v23, %v43_v24  ;;  %v1044_v34 = vcombine.low %v39_v23, %v43_v24  ;;  %v106_v23 = vld [vmem:[%s1629_s1 + $0x2b0] sm:$0xff]  ;;  %v103_v24 = vld [vmem:[%s1629_s1 + $0x298] sm:$0xff] }
  0x2e   :  { %851 = vmatpush1.bf16.msra.mxu0 %v1102_v29  ;;  %894 = vmatpush1.bf16.msra.mxu1 %v1104_v30  ;;  %v46_v29 = vld [vmem:[%s1629_s1 + $0xd0] sm:$0xff] }
  0x2f   :  { %852 = vmatprep.subr.bf16.mxu0 %v1111_v31  ;;  %895 = vmatprep.subr.bf16.mxu1 %v1113_v32  ;;  %v50_v30 = vld [vmem:[%s1629_s1 + $0xf0] sm:$0xff]  ;;  %v47_v31 = vld [vmem:[%s1629_s1 + $0xd8] sm:$0xff] }
  0x30   :  { %v51_v32 = vld [vmem:[%s1629_s1 + $0xf8] sm:$0xff]  ;;  %v1051_v35 = vcombine.high %v46_v29, %v50_v30 }
  0x31   :  { %v1053_v36 = vcombine.high %v47_v31, %v51_v32  ;;  %v1052_v41 = vcombine.low %v47_v31, %v51_v32  ;;  %v114_v31 = vld [vmem:[%s1629_s1 + $0x2f0] sm:$0xff]  ;;  %v111_v32 = vld [vmem:[%s1629_s1 + $0x2d8] sm:$0xff] }
  0x32   :  { %853 = vmatpush1.bf16.msra.mxu0 %v1110_v37  ;;  %896 = vmatpush1.bf16.msra.mxu1 %v1112_v38  ;;  %v54_v37 = vld [vmem:[%s1629_s1 + $0x110] sm:$0xff] }
  0x33   :  { %854 = vmatprep.subr.bf16.mxu0 %v1119_v39  ;;  %897 = vmatprep.subr.bf16.mxu1 %v1121_v40  ;;  %v58_v38 = vld [vmem:[%s1629_s1 + $0x130] sm:$0xff]  ;;  %v59_v39 = vld [vmem:[%s1629_s1 + $0x138] sm:$0xff]  ;;  %v1050_v40 = vcombine.low %v46_v29, %v50_v30 }
  0x34   :  { %v1059_v42 = vcombine.high %v54_v37, %v58_v38  ;;  %v110_v30 = vld [vmem:[%s1629_s1 + $0x2d0] sm:$0xff] }
  0x36   :  { %855 = vmatpush1.bf16.msra.mxu0 %v1118_v45  ;;  %898 = vmatpush1.bf16.msra.mxu1 %v1120_v46  ;;  %v66_v45 = vld [vmem:[%s1629_s1 + $0x170] sm:$0xff]  ;;  %v63_v46 = vld [vmem:[%s1629_s1 + $0x158] sm:$0xff] }
  0x37   :  { %856 = vmatprep.subr.bf16.mxu0 %v1127_v47  ;;  %899 = vmatprep.subr.bf16.mxu1 %v1129_v48  ;;  %v67_v47 = vld [vmem:[%s1629_s1 + $0x178] sm:$0xff]  ;;  %v1058_v48 = vcombine.low %v54_v37, %v58_v38  ;;  %v1067_v50 = vcombine.high %v62_v44, %v66_v45  ;;  %v118_v38 = vld [vmem:[%s1629_s1 + $0x310] sm:$0xff] }
  0x38   :  { %v1069_v51 = vcombine.high %v63_v46, %v67_v47  ;;  %v1068_v57 = vcombine.low %v63_v46, %v67_v47  ;;  %v130_v46 = vld [vmem:[%s1629_s1 + $0x370] sm:$0xff]  ;;  %v127_v47 = vld [vmem:[%s1629_s1 + $0x358] sm:$0xff] }
  0x3a   :  { %857 = vmatpush1.bf16.msra.mxu0 %v1126_v53  ;;  %900 = vmatpush1.bf16.msra.mxu1 %v1128_v54  ;;  %v74_v53 = vld [vmem:[%s1629_s1 + $0x1b0] sm:$0xff]  ;;  %v71_v54 = vld [vmem:[%s1629_s1 + $0x198] sm:$0xff] }
  0x3b   :  { %858 = vmatprep.subr.bf16.mxu0 %v1135_v55  ;;  %901 = vmatprep.subr.bf16.mxu1 %v1137_v56  ;;  %v75_v55 = vld [vmem:[%s1629_s1 + $0x1b8] sm:$0xff]  ;;  %v1066_v56 = vcombine.low %v62_v44, %v66_v45  ;;  %v1075_v59 = vcombine.high %v70_v52, %v74_v53  ;;  %v126_v45 = vld [vmem:[%s1629_s1 + $0x350] sm:$0xff] }
  0x3c   :  { %v1077_v60 = vcombine.high %v71_v54, %v75_v55  ;;  %v1076_v2 = vcombine.low %v71_v54, %v75_v55  ;;  %v138_v54 = vld [vmem:[%s1629_s1 + $0x3b0] sm:$0xff]  ;;  %v135_v55 = vld [vmem:[%s1629_s1 + $0x398] sm:$0xff] }
  0x3e   :  { %859 = vmatpush1.bf16.msra.mxu0 %v1134_v62  ;;  %902 = vmatpush1.bf16.msra.mxu1 %v1136_v63  ;;  %v82_v62 = vld [vmem:[%s1629_s1 + $0x1f0] sm:$0xff]  ;;  %v79_v63 = vld [vmem:[%s1629_s1 + $0x1d8] sm:$0xff] }
  0x3f   :  { %860 = vmatprep.subr.bf16.mxu0 %v1143_v0  ;;  %903 = vmatprep.subr.bf16.mxu1 %v1145_v1  ;;  %v83_v0 = vld [vmem:[%s1629_s1 + $0x1f8] sm:$0xff]  ;;  %v1074_v1 = vcombine.low %v70_v52, %v74_v53  ;;  %v1083_v3 = vcombine.high %v78_v61, %v82_v62  ;;  %v134_v53 = vld [vmem:[%s1629_s1 + $0x390] sm:$0xff] }
  0x40   :  { %v1085_v4 = vcombine.high %v79_v63, %v83_v0 }
  0x42   :  { %861 = vmatpush1.bf16.msra.mxu0 %v1142_v6  ;;  %904 = vmatpush1.bf16.msra.mxu1 %v1144_v9  ;;  %v90_v6 = vld [vmem:[%s1629_s1 + $0x230] sm:$0xff]  ;;  %v1082_v9 = vcombine.low %v78_v61, %v82_v62 }
  0x43   :  { %916 = vmatprep.subr.bf16.mxu0 %v1027_v10  ;;  %959 = vmatprep.subr.bf16.mxu1 %v1029_v11  ;;  %v1084_v10 = vcombine.low %v79_v63, %v83_v0  ;;  %v1091_v11 = vcombine.high %v86_v5, %v90_v6  ;;  %v142_v62 = vld [vmem:[%s1629_s1 + $0x3d0] sm:$0xff]  ;;  %v143_v0 = vld [vmem:[%s1629_s1 + $0x3d8] sm:$0xff] }
  0x44   :  { %v146_v63 = vld [vmem:[%s1629_s1 + $0x3f0] sm:$0xff] }
  0x45   :  { %863 = vmatmul.mubr.bf16.vlgmr.msra.gmra.mrb[0].mxu0 %v1396_v14  ;;  %906 = vmatmul.mubr.bf16.vlgmr.msra.gmra.mrb[0].mxu1 %v1396_v14 }
  0x46   :  { %917 = vmatpush1.bf16.msra.mxu0 %v1026_v17  ;;  %960 = vmatpush1.bf16.msra.mxu1 %v1028_v18  ;;  %v99_v17 = vld [vmem:[%s1629_s1 + $0x278] sm:$0xff]  ;;  %v1090_v18 = vcombine.low %v86_v5, %v90_v6  ;;  %v1146_v6 = vcombine.low %v142_v62, %v146_v63 }
  0x47   :  { %918 = vmatprep.subr.bf16.mxu0 %v1035_v19  ;;  %961 = vmatprep.subr.bf16.mxu1 %v1037_v20  ;;  %v1092_v19 = vcombine.low %v87_v7, %v91_v8  ;;  %v1099_v20 = vcombine.high %v94_v13, %v98_v15  ;;  %v1101_v21 = vcombine.high %v95_v16, %v99_v17  ;;  %v150_v8 = vlaneseq }
  0x48   :  { %948 = vmatprep.mubr.bf16.mxu0 %v1266_v58  ;;  %991 = vmatprep.mubr.bf16.mxu1 %v1266_v58  ;;  %v55_v58 = vld [vmem:[%s1629_s1 + $0x118] sm:$0xff] }
  0x49   :  { %v1061_v43 = vcombine.high %v55_v58, %v59_v39  ;;  %v1060_v49 = vcombine.low %v55_v58, %v59_v39  ;;  %v122_v58 = vld [vmem:[%s1629_s1 + $0x330] sm:$0xff]  ;;  %v119_v39 = vld [vmem:[%s1629_s1 + $0x318] sm:$0xff] }
  0x4a   :  { %919 = vmatpush1.bf16.msra.mxu0 %v1034_v25  ;;  %962 = vmatpush1.bf16.msra.mxu1 %v1036_v26  ;;  %v107_v25 = vld [vmem:[%s1629_s1 + $0x2b8] sm:$0xff]  ;;  %v1098_v26 = vcombine.low %v94_v13, %v98_v15 }
  0x4b   :  { %920 = vmatprep.subr.bf16.mxu0 %v1043_v27  ;;  %963 = vmatprep.subr.bf16.mxu1 %v1045_v28  ;;  %v1100_v27 = vcombine.low %v95_v16, %v99_v17  ;;  %v1107_v28 = vcombine.high %v102_v22, %v106_v23  ;;  %v1109_v29 = vcombine.high %v103_v24, %v107_v25 }
  0x4e   :  { %921 = vmatpush1.bf16.msra.mxu0 %v1042_v33  ;;  %964 = vmatpush1.bf16.msra.mxu1 %v1044_v34  ;;  %v115_v33 = vld [vmem:[%s1629_s1 + $0x2f8] sm:$0xff]  ;;  %v1106_v34 = vcombine.low %v102_v22, %v106_v23 }
  0x4f   :  { %922 = vmatprep.subr.bf16.mxu0 %v1051_v35  ;;  %965 = vmatprep.subr.bf16.mxu1 %v1053_v36  ;;  %v1108_v35 = vcombine.low %v103_v24, %v107_v25  ;;  %v1115_v36 = vcombine.high %v110_v30, %v114_v31  ;;  %v1117_v37 = vcombine.high %v111_v32, %v115_v33 }
  0x52   :  { %923 = vmatpush1.bf16.msra.mxu0 %v1050_v40  ;;  %966 = vmatpush1.bf16.msra.mxu1 %v1052_v41  ;;  %v123_v40 = vld [vmem:[%s1629_s1 + $0x338] sm:$0xff]  ;;  %v1114_v41 = vcombine.low %v110_v30, %v114_v31 }
  0x53   :  { %924 = vmatprep.subr.bf16.mxu0 %v1059_v42  ;;  %967 = vmatprep.subr.bf16.mxu1 %v1061_v43  ;;  %v1116_v42 = vcombine.low %v111_v32, %v115_v33  ;;  %v1123_v43 = vcombine.high %v118_v38, %v122_v58  ;;  %v1125_v44 = vcombine.high %v119_v39, %v123_v40 }
  0x56   :  { %925 = vmatpush1.bf16.msra.mxu0 %v1058_v48  ;;  %968 = vmatpush1.bf16.msra.mxu1 %v1060_v49  ;;  %v131_v48 = vld [vmem:[%s1629_s1 + $0x378] sm:$0xff]  ;;  %v1122_v49 = vcombine.low %v118_v38, %v122_v58 }
  0x57   :  { %926 = vmatprep.subr.bf16.mxu0 %v1067_v50  ;;  %969 = vmatprep.subr.bf16.mxu1 %v1069_v51  ;;  %v1124_v50 = vcombine.low %v119_v39, %v123_v40  ;;  %v1131_v51 = vcombine.high %v126_v45, %v130_v46  ;;  %v1133_v52 = vcombine.high %v127_v47, %v131_v48 }
  0x5a   :  { %927 = vmatpush1.bf16.msra.mxu0 %v1066_v56  ;;  %970 = vmatpush1.bf16.msra.mxu1 %v1068_v57  ;;  %v139_v56 = vld [vmem:[%s1629_s1 + $0x3b8] sm:$0xff]  ;;  %v1130_v57 = vcombine.low %v126_v45, %v130_v46 }
  0x5b   :  { %928 = vmatprep.subr.bf16.mxu0 %v1075_v59  ;;  %971 = vmatprep.subr.bf16.mxu1 %v1077_v60  ;;  %v1132_v59 = vcombine.low %v127_v47, %v131_v48  ;;  %v1139_v60 = vcombine.high %v134_v53, %v138_v54  ;;  %v1141_v61 = vcombine.high %v135_v55, %v139_v56 }
  0x5e   :  { %929 = vmatpush1.bf16.msra.mxu0 %v1074_v1  ;;  %972 = vmatpush1.bf16.msra.mxu1 %v1076_v2  ;;  %v147_v1 = vld [vmem:[%s1629_s1 + $0x3f8] sm:$0xff]  ;;  %v1138_v2 = vcombine.low %v134_v53, %v138_v54 }
  0x5f   :  { %930 = vmatprep.subr.bf16.mxu0 %v1083_v3  ;;  %973 = vmatprep.subr.bf16.mxu1 %v1085_v4  ;;  %v1140_v3 = vcombine.low %v135_v55, %v139_v56  ;;  %v1147_v4 = vcombine.high %v142_v62, %v146_v63  ;;  %v1149_v5 = vcombine.high %v143_v0, %v147_v1 }
  0x60   :  { %v1148_v7 = vcombine.low %v143_v0, %v147_v1 }
  0x62   :  { %931 = vmatpush1.bf16.msra.mxu0 %v1082_v9  ;;  %974 = vmatpush1.bf16.msra.mxu1 %v1084_v10  ;;  %v151_v9 = vshrl.u32 %v150_v8, 7 }
  0x63   :  { %932 = vmatprep.subr.bf16.mxu0 %v1091_v11  ;;  %975 = vmatprep.subr.bf16.mxu1 %v1093_v12  ;;  %v148_v11 = vld [vmem:[%s1631_s2] sm:$0xff] }
  0x64   :  { %v152_v10 = vsub.s32 0, %v151_v9  ;;  %v160_v12 = vsub.s32 2, %v151_v9  ;;  %v156_v13 = vsub.s32 1, %v151_v9  ;;  %v164_v15 = vsub.s32 3, %v151_v9 }
  0x65   :  { %v180_v38 = vsub.s32 7, %v151_v9 }
  0x66   :  { %933 = vmatpush1.bf16.msra.mxu0 %v1090_v18  ;;  %976 = vmatpush1.bf16.msra.mxu1 %v1092_v19  ;;  %v153_v16 = vrot.slane %v148_v11, %v152_v10  ;;  %v161_v17 = vrot.slane %v148_v11, %v160_v12  ;;  %v157_v18 = vrot.slane %v148_v11, %v156_v13 }
  0x67   :  { %934 = vmatprep.subr.bf16.mxu0 %v1099_v20  ;;  %977 = vmatprep.subr.bf16.mxu1 %v1101_v21  ;;  %v165_v19 = vrot.slane %v148_v11, %v164_v15 }
  0x6a   :  { %935 = vmatpush1.bf16.msra.mxu0 %v1098_v26  ;;  %978 = vmatpush1.bf16.msra.mxu1 %v1100_v27 }
  0x6b   :  { %936 = vmatprep.subr.bf16.mxu0 %v1107_v28  ;;  %979 = vmatprep.subr.bf16.mxu1 %v1109_v29 }
  0x6e   :  { %937 = vmatpush1.bf16.msra.mxu0 %v1106_v34  ;;  %980 = vmatpush1.bf16.msra.mxu1 %v1108_v35  ;;  %v168_v35 = vsub.s32 4, %v151_v9 }
  0x6f   :  { %938 = vmatprep.subr.bf16.mxu0 %v1115_v36  ;;  %981 = vmatprep.subr.bf16.mxu1 %v1117_v37  ;;  %v176_v36 = vsub.s32 6, %v151_v9  ;;  %v172_v37 = vsub.s32 5, %v151_v9 }
  0x70   :  { %v169_v58 = vrot.slane %v148_v11, %v168_v35 }
  0x71   :  { %v177_v39 = vrot.slane %v148_v11, %v176_v36  ;;  %v173_v40 = vrot.slane %v148_v11, %v172_v37 }
  0x72   :  { %939 = vmatpush1.bf16.msra.mxu0 %v1114_v41  ;;  %982 = vmatpush1.bf16.msra.mxu1 %v1116_v42  ;;  %v181_v41 = vrot.slane %v148_v11, %v180_v38 }
  0x73   :  { %940 = vmatprep.subr.bf16.mxu0 %v1123_v43  ;;  %983 = vmatprep.subr.bf16.mxu1 %v1125_v44 }
  0x76   :  { %941 = vmatpush1.bf16.msra.mxu0 %v1122_v49  ;;  %984 = vmatpush1.bf16.msra.mxu1 %v1124_v50 }
  0x77   :  { %942 = vmatprep.subr.bf16.mxu0 %v1131_v51  ;;  %985 = vmatprep.subr.bf16.mxu1 %v1133_v52 }
  0x7a   :  { %943 = vmatpush1.bf16.msra.mxu0 %v1130_v57  ;;  %986 = vmatpush1.bf16.msra.mxu1 %v1132_v59 }
  0x7b   :  { %944 = vmatprep.subr.bf16.mxu0 %v1139_v60  ;;  %987 = vmatprep.subr.bf16.mxu1 %v1141_v61 }
  0x7e   :  { %945 = vmatpush1.bf16.msra.mxu0 %v1138_v2  ;;  %988 = vmatpush1.bf16.msra.mxu1 %v1140_v3 }
  0x7f   :  { %946 = vmatprep.subr.bf16.mxu0 %v1147_v4  ;;  %989 = vmatprep.subr.bf16.mxu1 %v1149_v5 }
  0x82   :  { %947 = vmatpush1.bf16.msra.mxu0 %v1146_v6  ;;  %990 = vmatpush1.bf16.msra.mxu1 %v1148_v7 }
  0x85   :  { %949 = vmatmul.mubr.bf16.vlgmr.msra.gmra.mrb[4].mxu0 %v1396_v14  ;;  %992 = vmatmul.mubr.bf16.vlgmr.msra.gmra.mrb[4].mxu1 %v1396_v14 }
 0x118   :  { %v864_v20 = vpop.f32.mrb[0].mxu0  ;;  %v907_v22 = vpop.f32.mrb[0].mxu1 }
 0x119   :  { %v865_v21 = vadd.f32 %v864_v20, %v153_v16  ;;  %v866_v23 = vpop.f32.mrb[1].mxu0  ;;  %v908_v24 = vadd.f32 %v907_v22, %v161_v17  ;;  %v909_v25 = vpop.f32.mrb[1].mxu1 }
 0x11a   :  { %v867_v14 = vadd.f32 %v866_v23, %v157_v18  ;;  %v868_v26 = vpop.f32.mrb[2].mxu0  ;;  %v910_v27 = vadd.f32 %v909_v25, %v165_v19  ;;  %v911_v29 = vpop.f32.mrb[2].mxu1 }
 0x11b   :  { %1002 = vst [vmem:[%s1632_s3] sm:$0xff] %v865_v21  ;;  %v869_v28 = vadd.f32 %v868_v26, %v153_v16  ;;  %v870_v30 = vpop.f32.mrb[3].mxu0  ;;  %1004 = vst [vmem:[%s1632_s3 + $0x10] sm:$0xff] %v908_v24  ;;  %v912_v31 = vadd.f32 %v911_v29, %v161_v17  ;;  %v913_v33 = vpop.f32.mrb[3].mxu1 }
 0x11c   :  { %1003 = vst [vmem:[%s1632_s3 + $0x8] sm:$0xff] %v867_v14  ;;  %v871_v32 = vadd.f32 %v870_v30, %v157_v18  ;;  %1005 = vst [vmem:[%s1632_s3 + $0x18] sm:$0xff] %v910_v27  ;;  %v914_v34 = vadd.f32 %v913_v33, %v165_v19 }
 0x11d   :  { %1010 = vst [vmem:[%s1632_s3 + $0x40] sm:$0xff] %v869_v28  ;;  %1012 = vst [vmem:[%s1632_s3 + $0x50] sm:$0xff] %v912_v31 }
 0x11e   :  { %1011 = vst [vmem:[%s1632_s3 + $0x48] sm:$0xff] %v871_v32  ;;  %1013 = vst [vmem:[%s1632_s3 + $0x58] sm:$0xff] %v914_v34 }
 0x158   :  { %v950_v42 = vpop.f32.mrb[4].mxu0  ;;  %v993_v44 = vpop.f32.mrb[4].mxu1 }
 0x159   :  { %v951_v43 = vadd.f32 %v950_v42, %v169_v58  ;;  %v952_v45 = vpop.f32.mrb[5].mxu0  ;;  %v994_v46 = vadd.f32 %v993_v44, %v177_v39  ;;  %v995_v48 = vpop.f32.mrb[5].mxu1 }
 0x15a   :  { %v953_v47 = vadd.f32 %v952_v45, %v173_v40  ;;  %v954_v49 = vpop.f32.mrb[6].mxu0  ;;  %v996_v50 = vadd.f32 %v995_v48, %v181_v41  ;;  %v997_v52 = vpop.f32.mrb[6].mxu1 }
 0x15b   :  { %1006 = vst [vmem:[%s1632_s3 + $0x20] sm:$0xff] %v951_v43  ;;  %v955_v51 = vadd.f32 %v954_v49, %v169_v58  ;;  %v956_v53 = vpop.f32.mrb[7].mxu0  ;;  %1008 = vst [vmem:[%s1632_s3 + $0x30] sm:$0xff] %v994_v46  ;;  %v998_v54 = vadd.f32 %v997_v52, %v177_v39  ;;  %v999_v56 = vpop.f32.mrb[7].mxu1 }
 0x15c   :  { %1007 = vst [vmem:[%s1632_s3 + $0x28] sm:$0xff] %v953_v47  ;;  %v957_v55 = vadd.f32 %v956_v53, %v173_v40  ;;  %1009 = vst [vmem:[%s1632_s3 + $0x38] sm:$0xff] %v996_v50  ;;  %v1000_v57 = vadd.f32 %v999_v56, %v181_v41 }
 0x15d   :  { %1014 = vst [vmem:[%s1632_s3 + $0x60] sm:$0xff] %v955_v51  ;;  %1016 = vst [vmem:[%s1632_s3 + $0x70] sm:$0xff] %v998_v54 }
 0x15e   :  { %1015 = vst [vmem:[%s1632_s3 + $0x68] sm:$0xff] %v957_v55  ;;  %1017 = vst [vmem:[%s1632_s3 + $0x78] sm:$0xff] %v1000_v57 }

// kernel: lstm_model_forward.5
= control target key start
LH: loop header
LB: loop body
LE: loop exit
PB: predicated region body
PF: predicated region fallthrough
CT: control target
= control target key end

     0   :  { %s2132_s9 = smov 0   ;;  %s2134_s10 = smov 0   ;;  %s2740_s0 = inlined_call_operand.vmem [shape: f32[8,2,1024], index: 0, kind: input, shape index: {}]   ;;  %s2741_s1 = inlined_call_operand.vmem [shape: bf16[2,128,512], index: 1, kind: input, shape index: {}]   ;;  %s2742_s2 = inlined_call_operand.vmem [shape: f32[8,2,256], index: 2, kind: output, shape index: {}]  }
   0x1   :  { %s2136_s11 = smov 0  }
   0x2 LB: > { %s2148_s12 = sadd.s32 4294967295, %s2113_s11   ;;  %s2151_s13 = sadd.s32 1, %s2113_s11   ;;  %s2113_s11 = sphi %s2136_s11, %s2746_s11   ;;  %s2109_s10 = sphi %s2134_s10, %s2745_s10   ;;  %s2105_s9 = sphi %s2132_s9, %s2744_s9  }
   0x3   : > { %s16_s14 = ssub.s32 %s2113_s11, %s2151_s13  ;;  %s19_s15 = sadd.s32 1, %s2109_s10 }
   0x4   : > { %p17_p0 = scmp.eq.s32.totalorder %s16_s14, 0  ;;  %p26_p1 = scmp.ne.s32.totalorder %s2109_s10, %s2105_s9 }
   0x5   : > { %p27_p2 = scmp.eq.s32.totalorder %s2113_s11, 0  ;;  %p82_p3 = scmp.eq.s32.totalorder %s2148_s12, 1 }
   0x6   : > { %s2161_s16 = scalar_select %p17_p0, %s2109_s10, %s19_s15  }
   0x7   : > { %p28_p4 = por %p27_p2, %p26_p1  ;;  %p2163_p5 = por %p82_p3, %p26_p1 }
   0x8   : > { %p1754_p6 = scmp.ge.s32.totalorder %s2113_s11, 2 }
   0xa   : > { %104 = sbr.rel (%p1754_p6) target bundleno = 25 (0x19), region = 16 }
  0x11   : > { %107 = sbr.rel (!%p28_p4) target bundleno = 25 (0x19), region = 20  ;;  %s109_s18 = sand.u32 (%p28_p4), 1, %s2109_s10  }
  0x12   : > { %s1847_s19 = sshll.u32 (%p28_p4), %s2113_s11, 3  ;;  %s1755_s20 = sshll.u32 (%p28_p4), %s109_s18, 6 }
  0x13   : > { %s114_s23 = scalar_lea.vmem (%p28_p4), %s2740_s0, %s1847_s19  ;;  %s111_s24 = scalar_lea.vmem (%p28_p4), [#allocation2], %s1755_s20 }
  0x14   : > { %v156_v0 = vld [vmem:[%s114_s23] sm:$0xff] (%p28_p4)  ;;  %v158_v1 = vld [vmem:[%s114_s23 + $0x10] sm:$0xff] (%p28_p4) }
  0x15   : > { %v160_v2 = vld [vmem:[%s114_s23 + $0x20] sm:$0xff] (%p28_p4)  ;;  %157 = vst [vmem:[%s111_s24] sm:$0xff] (%p28_p4), %v156_v0  ;;  %159 = vst [vmem:[%s111_s24 + $0x8] sm:$0xff] (%p28_p4), %v158_v1  ;;  %v162_v3 = vld [vmem:[%s114_s23 + $0x30] sm:$0xff] (%p28_p4) }
  0x16   : > { %161 = vst [vmem:[%s111_s24 + $0x10] sm:$0xff] (%p28_p4), %v160_v2  ;;  %v164_v4 = vld [vmem:[%s114_s23 + $0x40] sm:$0xff] (%p28_p4)  ;;  %v166_v5 = vld [vmem:[%s114_s23 + $0x50] sm:$0xff] (%p28_p4)  ;;  %163 = vst [vmem:[%s111_s24 + $0x18] sm:$0xff] (%p28_p4), %v162_v3 }
  0x17   : > { %165 = vst [vmem:[%s111_s24 + $0x20] sm:$0xff] (%p28_p4), %v164_v4  ;;  %167 = vst [vmem:[%s111_s24 + $0x28] sm:$0xff] (%p28_p4), %v166_v5  ;;  %v168_v6 = vld [vmem:[%s114_s23 + $0x60] sm:$0xff] (%p28_p4)  ;;  %v170_v7 = vld [vmem:[%s114_s23 + $0x70] sm:$0xff] (%p28_p4) }
  0x18   : > { %169 = vst [vmem:[%s111_s24 + $0x30] sm:$0xff] %v168_v6  ;;  %171 = vst [vmem:[%s111_s24 + $0x38] sm:$0xff] %v170_v7 }
  0x19 PF: > { %p1758_p7 = scmp.ge.s32.totalorder %s2113_s11, 1  ;;  %p184_p8 = scmp.lt.s32.totalorder %s2113_s11, 3 }
  0x1b   : > { %p185_p9 = pnand %p1758_p7, %p184_p8 }
  0x1c   : > { %p217_p10 = scmp.lt.s32.totalorder (!%p185_p9), %s2148_s12, 1  ;;  %v2115_v8 = vmov (!%p185_p9), 0   ;;  %p255_p11 = scmp.eq.s32.totalorder (!%p185_p9), %s2148_s12, 0  ;;  %v2116_v41 = vmov (!%p185_p9), 1983009808   ;;  %v512_v43 = vlaneseq (!%p185_p9) }
  0x1d   : > { %188 = sbr.rel (%p185_p9) target bundleno = 2228 (0x8b4), region = 62  ;;  %453 = vmatprep.mubr.bf16.mxu0 (!%p185_p9), %v2115_v8  ;;  %494 = vmatprep.mubr.bf16.mxu1 (!%p185_p9), %v2115_v8  ;;  %v510_v42 = vunpack.c.l.s4 (!%p185_p9), %v2116_v41  ;;  %s191_s30 = sand.u32 (!%p185_p9), 1, %s2105_s9  }
  0x1e   : > { %v513_v45 = vshrl.u32 (!%p185_p9), %v512_v43, 7  ;;  %s1759_s4 = sshll.u32 (!%p185_p9), %s191_s30, 6  ;;  %s1760_s8 = sshll.u32 (!%p185_p9), %s191_s30, 4 }
  0x1f   : > { %v511_v44 = vunpack.c.0.s8 (!%p185_p9), %v510_v42  ;;  %s2361_s6 = scalar_lea.vmem (!%p185_p9), [#allocation2], %s1759_s4  ;;  %s2372_s14 = scalar_lea.vmem (!%p185_p9), [#allocation3], %s1760_s8 }
  0x21   : > { %v2359_v48 = vsub.s32 (!%p185_p9), %v511_v44, %v513_v45 }
  0x24   : > { %s218_s25 = scalar_select %p217_p10, %s2148_s12, 1 }
  0x25   : > { %s2354_s3 = scalar_select %p255_p11, 0, 7 }
  0x26   : > { %s1848_s26 = sshll.u32 %s218_s25, 8 }
  0x27   : > { %s2182_s29 = scalar_lea.vmem %s2741_s1, %s1848_s26  ;;  %s1849_s5 = sshll.u32 %s2354_s3, 3 }
  0x28   : > { %v2185_v9 = vld [vmem:[%s2182_s29 + $0x4] ss:$16 sps:$4 sm:$0xff]   ;;  %v2188_v10 = vld [vmem:[%s2182_s29 + $0xc] ss:$16 sps:$4 sm:$0xff]   ;;  %v2192_v11 = vld [vmem:[%s2182_s29] ss:$16 sps:$4 sm:$0xff]   ;;  %s259_s7 = scalar_lea.vmem %s2361_s6, %s1849_s5 [#allocation2] }
  0x29   : > { %421 = vmatprep.subr.bf16.mxu0 %v2185_v9  ;;  %v2195_v12 = vld [vmem:[%s2182_s29 + $0x8] ss:$16 sps:$4 sm:$0xff]   ;;  %462 = vmatprep.subr.bf16.mxu1 %v2188_v10  ;;  %v2199_v13 = vld [vmem:[%s2182_s29 + $0x24] ss:$16 sps:$4 sm:$0xff]   ;;  %v2204_v14 = vld [vmem:[%s2182_s29 + $0x2c] ss:$16 sps:$4 sm:$0xff]  }
  0x2a   : > { %422 = vmatpush1.bf16.msra.mxu0 %v2192_v11  ;;  %463 = vmatpush1.bf16.msra.mxu1 %v2195_v12  ;;  %v2207_v15 = vld [vmem:[%s2182_s29 + $0x20] ss:$16 sps:$4 sm:$0xff]   ;;  %v2211_v16 = vld [vmem:[%s2182_s29 + $0x28] ss:$16 sps:$4 sm:$0xff]   ;;  %v2215_v17 = vld [vmem:[%s2182_s29 + $0x44] ss:$16 sps:$4 sm:$0xff]  }
  0x2b   : > { %423 = vmatprep.subr.bf16.mxu0 %v2199_v13  ;;  %464 = vmatprep.subr.bf16.mxu1 %v2204_v14  ;;  %v2218_v18 = vld [vmem:[%s2182_s29 + $0x4c] ss:$16 sps:$4 sm:$0xff]   ;;  %v2221_v19 = vld [vmem:[%s2182_s29 + $0x40] ss:$16 sps:$4 sm:$0xff]   ;;  %v2224_v20 = vld [vmem:[%s2182_s29 + $0x48] ss:$16 sps:$4 sm:$0xff]  }
  0x2c   : > { %v2229_v21 = vld [vmem:[%s2182_s29 + $0x64] ss:$16 sps:$4 sm:$0xff]   ;;  %v2234_v22 = vld [vmem:[%s2182_s29 + $0x6c] ss:$16 sps:$4 sm:$0xff]   ;;  %v2237_v23 = vld [vmem:[%s2182_s29 + $0x60] ss:$16 sps:$4 sm:$0xff]  }
  0x2d   : > { %v2242_v24 = vld [vmem:[%s2182_s29 + $0x68] ss:$16 sps:$4 sm:$0xff]   ;;  %v2245_v25 = vld [vmem:[%s2182_s29 + $0x84] ss:$16 sps:$4 sm:$0xff]   ;;  %v2250_v26 = vld [vmem:[%s2182_s29 + $0x8c] ss:$16 sps:$4 sm:$0xff]  }
  0x2e   : > { %424 = vmatpush1.bf16.msra.mxu0 %v2207_v15  ;;  %465 = vmatpush1.bf16.msra.mxu1 %v2211_v16  ;;  %v2253_v27 = vld [vmem:[%s2182_s29 + $0x80] ss:$16 sps:$4 sm:$0xff]   ;;  %v2256_v28 = vld [vmem:[%s2182_s29 + $0x88] ss:$16 sps:$4 sm:$0xff]   ;;  %v2261_v29 = vld [vmem:[%s2182_s29 + $0xa4] ss:$16 sps:$4 sm:$0xff]  }
  0x2f   : > { %425 = vmatprep.subr.bf16.mxu0 %v2215_v17  ;;  %466 = vmatprep.subr.bf16.mxu1 %v2218_v18  ;;  %v2266_v30 = vld [vmem:[%s2182_s29 + $0xac] ss:$16 sps:$4 sm:$0xff]   ;;  %v2271_v31 = vld [vmem:[%s2182_s29 + $0xa0] ss:$16 sps:$4 sm:$0xff]   ;;  %v2274_v32 = vld [vmem:[%s2182_s29 + $0xa8] ss:$16 sps:$4 sm:$0xff]  }
  0x30   : > { %v2279_v33 = vld [vmem:[%s2182_s29 + $0xc4] ss:$16 sps:$4 sm:$0xff]   ;;  %v2282_v34 = vld [vmem:[%s2182_s29 + $0xcc] ss:$16 sps:$4 sm:$0xff]   ;;  %v2287_v35 = vld [vmem:[%s2182_s29 + $0xc0] ss:$16 sps:$4 sm:$0xff]  }
  0x31   : > { %v2290_v36 = vld [vmem:[%s2182_s29 + $0xc8] ss:$16 sps:$4 sm:$0xff]   ;;  %v2295_v37 = vld [vmem:[%s2182_s29 + $0xe4] ss:$16 sps:$4 sm:$0xff]   ;;  %v2298_v38 = vld [vmem:[%s2182_s29 + $0xec] ss:$16 sps:$4 sm:$0xff]  }
  0x32   : > { %426 = vmatpush1.bf16.msra.mxu0 %v2221_v19  ;;  %467 = vmatpush1.bf16.msra.mxu1 %v2224_v20  ;;  %v2303_v39 = vld [vmem:[%s2182_s29 + $0xe0] ss:$16 sps:$4 sm:$0xff]   ;;  %v2306_v40 = vld [vmem:[%s2182_s29 + $0xe8] ss:$16 sps:$4 sm:$0xff]   ;;  %s1800_s11 = sshll.u32 %s2354_s3, 1 }
  0x33   : > { %427 = vmatprep.subr.bf16.mxu0 %v2229_v21  ;;  %468 = vmatprep.subr.bf16.mxu1 %v2234_v22  ;;  %v260_v59 = vld [vmem:[%s259_s7] sm:$0xff]  ;;  %s558_s15 = scalar_lea.vmem %s2372_s14, %s1800_s11 [#allocation3] }
  0x34   : > { %s2411_s9 = scalar_select %p255_p11, 1, 6 }
  0x35   : > { %s2459_s22 = scalar_select %p255_p11, 2, 5 }
  0x36   : > { %428 = vmatpush1.bf16.msra.mxu0 %v2237_v23  ;;  %469 = vmatpush1.bf16.msra.mxu1 %v2242_v24  ;;  %s1850_s18 = sshll.u32 %s2411_s9, 3  ;;  %s1806_s20 = sshll.u32 %s2411_s9, 1 }
  0x37   : > { %429 = vmatprep.subr.bf16.mxu0 %v2245_v25  ;;  %470 = vmatprep.subr.bf16.mxu1 %v2250_v26  ;;  %s563_s19 = scalar_lea.vmem %s2361_s6, %s1850_s18 [#allocation2]  ;;  %s703_s21 = scalar_lea.vmem %s2372_s14, %s1806_s20 [#allocation3] }
  0x38   : > { %s1851_s23 = sshll.u32 %s2459_s22, 3  ;;  %s1812_s25 = sshll.u32 %s2459_s22, 1 }
  0x39   : > { %s708_s24 = scalar_lea.vmem %s2361_s6, %s1851_s23 [#allocation2]  ;;  %s848_s26 = scalar_lea.vmem %s2372_s14, %s1812_s25 [#allocation3] }
  0x3a   : > { %430 = vmatpush1.bf16.msra.mxu0 %v2253_v27  ;;  %471 = vmatpush1.bf16.msra.mxu1 %v2256_v28  ;;  %s2507_s27 = scalar_select %p255_p11, 3, 4 }
  0x3b   : > { %431 = vmatprep.subr.bf16.mxu0 %v2261_v29  ;;  %472 = vmatprep.subr.bf16.mxu1 %v2266_v30  ;;  %s2555_s5 = scalar_select %p255_p11, 4, 3 }
  0x3c   : > { %s1852_s28 = sshll.u32 %s2507_s27, 3  ;;  %s1818_s3 = sshll.u32 %s2507_s27, 1 }
  0x3d   : > { %s853_s30 = scalar_lea.vmem %s2361_s6, %s1852_s28 [#allocation2]  ;;  %s993_s4 = scalar_lea.vmem %s2372_s14, %s1818_s3 [#allocation3] }
  0x3e   : > { %432 = vmatpush1.bf16.msra.mxu0 %v2271_v31  ;;  %473 = vmatpush1.bf16.msra.mxu1 %v2274_v32  ;;  %s1853_s7 = sshll.u32 %s2555_s5, 3  ;;  %s1824_s11 = sshll.u32 %s2555_s5, 1 }
  0x3f   : > { %433 = vmatprep.subr.bf16.mxu0 %v2279_v33  ;;  %474 = vmatprep.subr.bf16.mxu1 %v2282_v34  ;;  %s998_s8 = scalar_lea.vmem %s2361_s6, %s1853_s7 [#allocation2]  ;;  %s1844_s3 = sshll.u32 (%p2163_p5), %s2148_s12, 1 }
  0x40   : > { %s2651_s9 = scalar_select %p255_p11, 5, 2 }
  0x41   : > { %s2697_s22 = scalar_select %p255_p11, 6, 1 }
  0x42   : > { %434 = vmatpush1.bf16.msra.mxu0 %v2287_v35  ;;  %475 = vmatpush1.bf16.msra.mxu1 %v2290_v36  ;;  %s1854_s18 = sshll.u32 %s2651_s9, 3  ;;  %s1830_s20 = sshll.u32 %s2651_s9, 1 }
  0x43   : > { %435 = vmatprep.subr.bf16.mxu0 %v2295_v37  ;;  %476 = vmatprep.subr.bf16.mxu1 %v2298_v38  ;;  %s1855_s23 = sshll.u32 %s2697_s22, 3  ;;  %s1583_s7 = scalar_lea.vmem (%p2163_p5), %s2742_s2, %s1844_s3 }
  0x46   : > { %436 = vmatpush1.bf16.msra.mxu0 %v2303_v39  ;;  %477 = vmatpush1.bf16.msra.mxu1 %v2306_v40 }
  0x47   : > { %566 = vmatprep.subr.bf16.mxu0 %v2185_v9  ;;  %607 = vmatprep.subr.bf16.mxu1 %v2188_v10 }
  0x49   : > { %454 = vmatmul.mubr.bf16.vlgmr.msra.gmra.mrb[0].mxu0 %v2115_v8  ;;  %495 = vmatmul.mubr.bf16.vlgmr.msra.gmra.mrb[0].mxu1 %v2115_v8 }
  0x4a   : > { %567 = vmatpush1.bf16.msra.mxu0 %v2192_v11  ;;  %608 = vmatpush1.bf16.msra.mxu1 %v2195_v12 }
  0x4b   : > { %568 = vmatprep.subr.bf16.mxu0 %v2199_v13  ;;  %609 = vmatprep.subr.bf16.mxu1 %v2204_v14 }
  0x4c   : > { %598 = vmatprep.mubr.bf16.mxu0 %v2115_v8  ;;  %639 = vmatprep.mubr.bf16.mxu1 %v2115_v8 }
  0x4e   : > { %569 = vmatpush1.bf16.msra.mxu0 %v2207_v15  ;;  %610 = vmatpush1.bf16.msra.mxu1 %v2211_v16 }
  0x4f   : > { %570 = vmatprep.subr.bf16.mxu0 %v2215_v17  ;;  %611 = vmatprep.subr.bf16.mxu1 %v2218_v18 }
  0x52   : > { %571 = vmatpush1.bf16.msra.mxu0 %v2221_v19  ;;  %612 = vmatpush1.bf16.msra.mxu1 %v2224_v20 }
  0x53   : > { %572 = vmatprep.subr.bf16.mxu0 %v2229_v21  ;;  %613 = vmatprep.subr.bf16.mxu1 %v2234_v22 }
  0x56   : > { %573 = vmatpush1.bf16.msra.mxu0 %v2237_v23  ;;  %614 = vmatpush1.bf16.msra.mxu1 %v2242_v24 }
  0x57   : > { %574 = vmatprep.subr.bf16.mxu0 %v2245_v25  ;;  %615 = vmatprep.subr.bf16.mxu1 %v2250_v26 }
  0x5a   : > { %575 = vmatpush1.bf16.msra.mxu0 %v2253_v27  ;;  %616 = vmatpush1.bf16.msra.mxu1 %v2256_v28 }
  0x5b   : > { %576 = vmatprep.subr.bf16.mxu0 %v2261_v29  ;;  %617 = vmatprep.subr.bf16.mxu1 %v2266_v30 }
  0x5e   : > { %577 = vmatpush1.bf16.msra.mxu0 %v2271_v31  ;;  %618 = vmatpush1.bf16.msra.mxu1 %v2274_v32 }
  0x5f   : > { %578 = vmatprep.subr.bf16.mxu0 %v2279_v33  ;;  %619 = vmatprep.subr.bf16.mxu1 %v2282_v34 }
  0x62   : > { %579 = vmatpush1.bf16.msra.mxu0 %v2287_v35  ;;  %620 = vmatpush1.bf16.msra.mxu1 %v2290_v36 }
  0x63   : > { %580 = vmatprep.subr.bf16.mxu0 %v2295_v37  ;;  %621 = vmatprep.subr.bf16.mxu1 %v2298_v38 }
  0x66   : > { %581 = vmatpush1.bf16.msra.mxu0 %v2303_v39  ;;  %622 = vmatpush1.bf16.msra.mxu1 %v2306_v40 }
  0x67   : > { %711 = vmatprep.subr.bf16.mxu0 %v2185_v9  ;;  %752 = vmatprep.subr.bf16.mxu1 %v2188_v10 }
 0x11c   : > { %v455_v46 = vpop.f32.mrb[0].mxu0  ;;  %v496_v47 = vpop.f32.mrb[0].mxu1 }
 0x11d   : > { %v457_v49 = vpop.f32.mrb[1].mxu0  ;;  %v498_v50 = vpop.f32.mrb[1].mxu1 }
 0x11e   : > { %v507_v51 = vcombine.low %v455_v46, %v457_v49  ;;  %v508_v52 = vcombine.low %v496_v47, %v498_v50  ;;  %v459_v53 = vpop.f32.mrb[2].mxu0  ;;  %v500_v54 = vpop.f32.mrb[2].mxu1 }
 0x11f   : > { %v460_v55 = vpop.f32.mrb[3].mxu0  ;;  %v501_v56 = vpop.f32.mrb[3].mxu1 }
 0x120   : > { %v515_v57 = vrot.slane %v507_v51, %v2359_v48  ;;  %v522_v58 = vrot.slane %v508_v52, %v2359_v48 }
 0x122   : > { %v523_v60 = vcombine.low %v515_v57, %v522_v58 }
 0x124   : > { %v525_v61 = vadd.f32 %v523_v60, %v260_v59 }
 0x126   : > { %v1797_v62 = vmul.f32 -1.442695, %v525_v61  ;;  %v533_v63 = vrot.slane %v525_v61, 2  ;;  %v544_v1 = vrot.slane %v525_v61, 6  ;;  %v541_v4 = vrot.slane %v525_v61, 4 }
 0x128   : > { %1931 = vpow2.f32 %v1797_v62  ;;  %v1798_v0 = vmul.f32 -1.442695, %v533_v63  ;;  %v1799_v2 = vmul.f32 -1.442695, %v544_v1 }
 0x12a   : > { %1933 = vpow2.f32 %v1798_v0 }
 0x12b   : > { %1935 = vpow2.f32 %v1799_v2  ;;  %v564_v2 = vld [vmem:[%s563_s19] sm:$0xff]  ;;  %s1143_s19 = scalar_lea.vmem %s2361_s6, %s1854_s18 [#allocation2] }
 0x132   : > { %v1932_v3 = vpop.eup %1931 }
 0x133   : > { %v529_v5 = vadd.f32 1.0, %v1932_v3 }
 0x134   : > { %v1934_v6 = vpop.eup %1933 }
 0x135   : > { %1937 = vrcp.f32 %v529_v5  ;;  %v538_v7 = vadd.f32 1.0, %v1934_v6  ;;  %v1936_v41 = vpop.eup %1935 }
 0x136   : > { %1939 = vtanh.f32 %v541_v4  ;;  %v549_v45 = vadd.f32 1.0, %v1936_v41 }
 0x137   : > { %1941 = vrcp.f32 %v538_v7 }
 0x138   : > { %1943 = vrcp.f32 %v549_v45 }
 0x13f   : > { %v1938_v42 = vpop.eup %1937 }
 0x140   : > { %v1940_v43 = vpop.eup %1939 }
 0x141   : > { %v1942_v44 = vpop.eup %1941  ;;  %v553_v47 = vmul.f32 %v1940_v43, %v1938_v42 }
 0x142   : > { %v552_v46 = vmul.f32 0.0, %v1942_v44  ;;  %v1944_v50 = vpop.eup %1943 }
 0x144   : > { %v2366_v49 = vadd.f32 %v553_v47, %v552_v46 }
 0x146   : > { %1945 = vtanh.f32 %v2366_v49 }
 0x150   : > { %v1946_v51 = vpop.eup %1945 }
 0x151   : > { %v556_v52 = vmul.f32 %v1946_v51, %v1944_v50 }
 0x153   : > { %559 = vst [vmem:[%s558_s15] sm:$0x3] %v556_v52  ;;  %v565_v53 = vpack.c.bf16 %v556_v52, %v556_v52  ;;  %s1138_s15 = scalar_lea.vmem %s2372_s14, %s1824_s11 [#allocation3] }
 0x155   : > { %599 = vmatmul.mubr.bf16.vlgmr.msra.gmra.mrb[4].mxu0 %v565_v53  ;;  %640 = vmatmul.mubr.bf16.vlgmr.msra.gmra.mrb[4].mxu1 %v565_v53 }
 0x156   : > { %712 = vmatpush1.bf16.msra.mxu0 %v2192_v11  ;;  %753 = vmatpush1.bf16.msra.mxu1 %v2195_v12 }
 0x157   : > { %713 = vmatprep.subr.bf16.mxu0 %v2199_v13  ;;  %754 = vmatprep.subr.bf16.mxu1 %v2204_v14 }
 0x158   : > { %743 = vmatprep.mubr.bf16.mxu0 %v2115_v8  ;;  %784 = vmatprep.mubr.bf16.mxu1 %v2115_v8 }
 0x15a   : > { %714 = vmatpush1.bf16.msra.mxu0 %v2207_v15  ;;  %755 = vmatpush1.bf16.msra.mxu1 %v2211_v16 }
 0x15b   : > { %715 = vmatprep.subr.bf16.mxu0 %v2215_v17  ;;  %756 = vmatprep.subr.bf16.mxu1 %v2218_v18 }
 0x15e   : > { %716 = vmatpush1.bf16.msra.mxu0 %v2221_v19  ;;  %757 = vmatpush1.bf16.msra.mxu1 %v2224_v20 }
 0x15f   : > { %717 = vmatprep.subr.bf16.mxu0 %v2229_v21  ;;  %758 = vmatprep.subr.bf16.mxu1 %v2234_v22 }
 0x162   : > { %718 = vmatpush1.bf16.msra.mxu0 %v2237_v23  ;;  %759 = vmatpush1.bf16.msra.mxu1 %v2242_v24 }
 0x163   : > { %719 = vmatprep.subr.bf16.mxu0 %v2245_v25  ;;  %760 = vmatprep.subr.bf16.mxu1 %v2250_v26 }
 0x166   : > { %720 = vmatpush1.bf16.msra.mxu0 %v2253_v27  ;;  %761 = vmatpush1.bf16.msra.mxu1 %v2256_v28 }
 0x167   : > { %721 = vmatprep.subr.bf16.mxu0 %v2261_v29  ;;  %762 = vmatprep.subr.bf16.mxu1 %v2266_v30 }
 0x16a   : > { %722 = vmatpush1.bf16.msra.mxu0 %v2271_v31  ;;  %763 = vmatpush1.bf16.msra.mxu1 %v2274_v32 }
 0x16b   : > { %723 = vmatprep.subr.bf16.mxu0 %v2279_v33  ;;  %764 = vmatprep.subr.bf16.mxu1 %v2282_v34 }
 0x16e   : > { %724 = vmatpush1.bf16.msra.mxu0 %v2287_v35  ;;  %765 = vmatpush1.bf16.msra.mxu1 %v2290_v36 }
 0x16f   : > { %725 = vmatprep.subr.bf16.mxu0 %v2295_v37  ;;  %766 = vmatprep.subr.bf16.mxu1 %v2298_v38 }
 0x172   : > { %726 = vmatpush1.bf16.msra.mxu0 %v2303_v39  ;;  %767 = vmatpush1.bf16.msra.mxu1 %v2306_v40 }
 0x173   : > { %856 = vmatprep.subr.bf16.mxu0 %v2185_v9  ;;  %897 = vmatprep.subr.bf16.mxu1 %v2188_v10 }
 0x228   : > { %v600_v54 = vpop.f32.mrb[4].mxu0  ;;  %v641_v55 = vpop.f32.mrb[4].mxu1 }
 0x229   : > { %v602_v56 = vpop.f32.mrb[5].mxu0  ;;  %v643_v57 = vpop.f32.mrb[5].mxu1 }
 0x22a   : > { %v652_v58 = vcombine.low %v600_v54, %v602_v56  ;;  %v653_v59 = vcombine.low %v641_v55, %v643_v57  ;;  %v604_v60 = vpop.f32.mrb[6].mxu0  ;;  %v645_v61 = vpop.f32.mrb[6].mxu1 }
 0x22b   : > { %v605_v62 = vpop.f32.mrb[7].mxu0  ;;  %v646_v63 = vpop.f32.mrb[7].mxu1 }
 0x22c   : > { %v660_v0 = vrot.slane %v652_v58, %v2359_v48  ;;  %v667_v1 = vrot.slane %v653_v59, %v2359_v48 }
 0x22e   : > { %v668_v3 = vcombine.low %v660_v0, %v667_v1 }
 0x230   : > { %v670_v4 = vadd.f32 %v668_v3, %v564_v2 }
 0x232   : > { %v1803_v5 = vmul.f32 -1.442695, %v670_v4  ;;  %v678_v6 = vrot.slane %v670_v4, 2  ;;  %v689_v41 = vrot.slane %v670_v4, 6  ;;  %v686_v44 = vrot.slane %v670_v4, 4 }
 0x234   : > { %1947 = vpow2.f32 %v1803_v5  ;;  %v1804_v7 = vmul.f32 -1.442695, %v678_v6  ;;  %v1805_v42 = vmul.f32 -1.442695, %v689_v41 }
 0x236   : > { %1949 = vpow2.f32 %v1804_v7 }
 0x237   : > { %1951 = vpow2.f32 %v1805_v42  ;;  %v709_v42 = vld [vmem:[%s708_s24] sm:$0xff]  ;;  %s1288_s24 = scalar_lea.vmem %s2361_s6, %s1855_s23 [#allocation2] }
 0x23e   : > { %v1948_v43 = vpop.eup %1947 }
 0x23f   : > { %v674_v45 = vadd.f32 1.0, %v1948_v43 }
 0x240   : > { %v1950_v46 = vpop.eup %1949 }
 0x241   : > { %1953 = vrcp.f32 %v674_v45  ;;  %v683_v47 = vadd.f32 1.0, %v1950_v46  ;;  %v1952_v50 = vpop.eup %1951 }
 0x242   : > { %1955 = vtanh.f32 %v686_v44  ;;  %v694_v54 = vadd.f32 1.0, %v1952_v50 }
 0x243   : > { %1957 = vrcp.f32 %v683_v47 }
 0x244   : > { %1959 = vrcp.f32 %v694_v54 }
 0x24b   : > { %v1954_v51 = vpop.eup %1953 }
 0x24c   : > { %v1956_v52 = vpop.eup %1955 }
 0x24d   : > { %v1958_v53 = vpop.eup %1957  ;;  %v698_v56 = vmul.f32 %v1956_v52, %v1954_v51 }
 0x24e   : > { %v697_v55 = vmul.f32 %v1958_v53, %v2366_v49  ;;  %v1960_v58 = vpop.eup %1959 }
 0x250   : > { %v2418_v57 = vadd.f32 %v698_v56, %v697_v55 }
 0x252   : > { %1961 = vtanh.f32 %v2418_v57 }
 0x25c   : > { %v1962_v59 = vpop.eup %1961 }
 0x25d   : > { %v701_v60 = vmul.f32 %v1962_v59, %v1960_v58 }
 0x25f   : > { %704 = vst [vmem:[%s703_s21] sm:$0x3] %v701_v60  ;;  %v710_v61 = vpack.c.bf16 %v701_v60, %v701_v60  ;;  %s1283_s21 = scalar_lea.vmem %s2372_s14, %s1830_s20 [#allocation3] }
 0x261   : > { %744 = vmatmul.mubr.bf16.vlgmr.msra.gmra.mrb[8].mxu0 %v710_v61  ;;  %785 = vmatmul.mubr.bf16.vlgmr.msra.gmra.mrb[8].mxu1 %v710_v61 }
 0x262   : > { %857 = vmatpush1.bf16.msra.mxu0 %v2192_v11  ;;  %898 = vmatpush1.bf16.msra.mxu1 %v2195_v12 }
 0x263   : > { %858 = vmatprep.subr.bf16.mxu0 %v2199_v13  ;;  %899 = vmatprep.subr.bf16.mxu1 %v2204_v14 }
 0x264   : > { %888 = vmatprep.mubr.bf16.mxu0 %v2115_v8  ;;  %929 = vmatprep.mubr.bf16.mxu1 %v2115_v8 }
 0x266   : > { %859 = vmatpush1.bf16.msra.mxu0 %v2207_v15  ;;  %900 = vmatpush1.bf16.msra.mxu1 %v2211_v16 }
 0x267   : > { %860 = vmatprep.subr.bf16.mxu0 %v2215_v17  ;;  %901 = vmatprep.subr.bf16.mxu1 %v2218_v18 }
 0x26a   : > { %861 = vmatpush1.bf16.msra.mxu0 %v2221_v19  ;;  %902 = vmatpush1.bf16.msra.mxu1 %v2224_v20 }
 0x26b   : > { %862 = vmatprep.subr.bf16.mxu0 %v2229_v21  ;;  %903 = vmatprep.subr.bf16.mxu1 %v2234_v22 }
 0x26e   : > { %863 = vmatpush1.bf16.msra.mxu0 %v2237_v23  ;;  %904 = vmatpush1.bf16.msra.mxu1 %v2242_v24 }
 0x26f   : > { %864 = vmatprep.subr.bf16.mxu0 %v2245_v25  ;;  %905 = vmatprep.subr.bf16.mxu1 %v2250_v26 }
 0x272   : > { %865 = vmatpush1.bf16.msra.mxu0 %v2253_v27  ;;  %906 = vmatpush1.bf16.msra.mxu1 %v2256_v28 }
 0x273   : > { %866 = vmatprep.subr.bf16.mxu0 %v2261_v29  ;;  %907 = vmatprep.subr.bf16.mxu1 %v2266_v30 }
 0x276   : > { %867 = vmatpush1.bf16.msra.mxu0 %v2271_v31  ;;  %908 = vmatpush1.bf16.msra.mxu1 %v2274_v32 }
 0x277   : > { %868 = vmatprep.subr.bf16.mxu0 %v2279_v33  ;;  %909 = vmatprep.subr.bf16.mxu1 %v2282_v34 }
 0x27a   : > { %869 = vmatpush1.bf16.msra.mxu0 %v2287_v35  ;;  %910 = vmatpush1.bf16.msra.mxu1 %v2290_v36 }
 0x27b   : > { %870 = vmatprep.subr.bf16.mxu0 %v2295_v37  ;;  %911 = vmatprep.subr.bf16.mxu1 %v2298_v38 }
 0x27e   : > { %871 = vmatpush1.bf16.msra.mxu0 %v2303_v39  ;;  %912 = vmatpush1.bf16.msra.mxu1 %v2306_v40 }
 0x27f   : > { %1001 = vmatprep.subr.bf16.mxu0 %v2185_v9  ;;  %1042 = vmatprep.subr.bf16.mxu1 %v2188_v10 }
 0x334   : > { %v745_v49 = vpop.f32.mrb[8].mxu0  ;;  %v786_v62 = vpop.f32.mrb[8].mxu1 }
 0x335   : > { %v747_v63 = vpop.f32.mrb[9].mxu0  ;;  %v788_v0 = vpop.f32.mrb[9].mxu1 }
 0x336   : > { %v797_v1 = vcombine.low %v745_v49, %v747_v63  ;;  %v798_v2 = vcombine.low %v786_v62, %v788_v0  ;;  %v749_v3 = vpop.f32.mrb[10].mxu0  ;;  %v790_v4 = vpop.f32.mrb[10].mxu1 }
 0x337   : > { %v750_v5 = vpop.f32.mrb[11].mxu0  ;;  %v791_v6 = vpop.f32.mrb[11].mxu1 }
 0x338   : > { %v805_v7 = vrot.slane %v797_v1, %v2359_v48  ;;  %v812_v41 = vrot.slane %v798_v2, %v2359_v48 }
 0x33a   : > { %v813_v43 = vcombine.low %v805_v7, %v812_v41 }
 0x33c   : > { %v815_v44 = vadd.f32 %v813_v43, %v709_v42 }
 0x33e   : > { %v1809_v45 = vmul.f32 -1.442695, %v815_v44  ;;  %v823_v46 = vrot.slane %v815_v44, 2  ;;  %v834_v50 = vrot.slane %v815_v44, 6  ;;  %v831_v53 = vrot.slane %v815_v44, 4 }
 0x340   : > { %1963 = vpow2.f32 %v1809_v45  ;;  %v1810_v47 = vmul.f32 -1.442695, %v823_v46  ;;  %v1811_v51 = vmul.f32 -1.442695, %v834_v50 }
 0x342   : > { %1965 = vpow2.f32 %v1810_v47 }
 0x343   : > { %1967 = vpow2.f32 %v1811_v51  ;;  %v854_v51 = vld [vmem:[%s853_s30] sm:$0xff] }
 0x34a   : > { %v1964_v52 = vpop.eup %1963 }
 0x34b   : > { %v819_v54 = vadd.f32 1.0, %v1964_v52 }
 0x34c   : > { %v1966_v55 = vpop.eup %1965 }
 0x34d   : > { %1969 = vrcp.f32 %v819_v54  ;;  %v828_v56 = vadd.f32 1.0, %v1966_v55  ;;  %v1968_v58 = vpop.eup %1967 }
 0x34e   : > { %1971 = vtanh.f32 %v831_v53  ;;  %v839_v49 = vadd.f32 1.0, %v1968_v58 }
 0x34f   : > { %1973 = vrcp.f32 %v828_v56 }
 0x350   : > { %1975 = vrcp.f32 %v839_v49 }
 0x357   : > { %v1970_v59 = vpop.eup %1969 }
 0x358   : > { %v1972_v60 = vpop.eup %1971 }
 0x359   : > { %v1974_v61 = vpop.eup %1973  ;;  %v843_v63 = vmul.f32 %v1972_v60, %v1970_v59 }
 0x35a   : > { %v842_v62 = vmul.f32 %v1974_v61, %v2418_v57  ;;  %v1976_v1 = vpop.eup %1975 }
 0x35c   : > { %v2466_v0 = vadd.f32 %v843_v63, %v842_v62 }
 0x35e   : > { %1977 = vtanh.f32 %v2466_v0 }
 0x368   : > { %v1978_v2 = vpop.eup %1977 }
 0x369   : > { %v846_v3 = vmul.f32 %v1978_v2, %v1976_v1 }
 0x36b   : > { %849 = vst [vmem:[%s848_s26] sm:$0x3] %v846_v3  ;;  %v855_v4 = vpack.c.bf16 %v846_v3, %v846_v3  ;;  %s2708_s26 = scalar_select %p255_p11, 7, 0 }
 0x36d   : > { %889 = vmatmul.mubr.bf16.vlgmr.msra.gmra.mrb[12].mxu0 %v855_v4  ;;  %930 = vmatmul.mubr.bf16.vlgmr.msra.gmra.mrb[12].mxu1 %v855_v4  ;;  %s1856_s27 = sshll.u32 %s2708_s26, 3 }
 0x36e   : > { %1002 = vmatpush1.bf16.msra.mxu0 %v2192_v11  ;;  %1043 = vmatpush1.bf16.msra.mxu1 %v2195_v12  ;;  %s1433_s28 = scalar_lea.vmem %s2361_s6, %s1856_s27 [#allocation2]  ;;  %s1842_s6 = sshll.u32 %s2708_s26, 1 }
 0x36f   : > { %1003 = vmatprep.subr.bf16.mxu0 %v2199_v13  ;;  %1044 = vmatprep.subr.bf16.mxu1 %v2204_v14  ;;  %s1573_s30 = scalar_lea.vmem %s2372_s14, %s1842_s6 [#allocation3] }
 0x370   : > { %1033 = vmatprep.mubr.bf16.mxu0 %v2115_v8  ;;  %1074 = vmatprep.mubr.bf16.mxu1 %v2115_v8 }
 0x372   : > { %1004 = vmatpush1.bf16.msra.mxu0 %v2207_v15  ;;  %1045 = vmatpush1.bf16.msra.mxu1 %v2211_v16 }
 0x373   : > { %1005 = vmatprep.subr.bf16.mxu0 %v2215_v17  ;;  %1046 = vmatprep.subr.bf16.mxu1 %v2218_v18 }
 0x376   : > { %1006 = vmatpush1.bf16.msra.mxu0 %v2221_v19  ;;  %1047 = vmatpush1.bf16.msra.mxu1 %v2224_v20 }
 0x377   : > { %1007 = vmatprep.subr.bf16.mxu0 %v2229_v21  ;;  %1048 = vmatprep.subr.bf16.mxu1 %v2234_v22 }
 0x37a   : > { %1008 = vmatpush1.bf16.msra.mxu0 %v2237_v23  ;;  %1049 = vmatpush1.bf16.msra.mxu1 %v2242_v24 }
 0x37b   : > { %1009 = vmatprep.subr.bf16.mxu0 %v2245_v25  ;;  %1050 = vmatprep.subr.bf16.mxu1 %v2250_v26 }
 0x37e   : > { %1010 = vmatpush1.bf16.msra.mxu0 %v2253_v27  ;;  %1051 = vmatpush1.bf16.msra.mxu1 %v2256_v28 }
 0x37f   : > { %1011 = vmatprep.subr.bf16.mxu0 %v2261_v29  ;;  %1052 = vmatprep.subr.bf16.mxu1 %v2266_v30 }
 0x382   : > { %1012 = vmatpush1.bf16.msra.mxu0 %v2271_v31  ;;  %1053 = vmatpush1.bf16.msra.mxu1 %v2274_v32 }
 0x383   : > { %1013 = vmatprep.subr.bf16.mxu0 %v2279_v33  ;;  %1054 = vmatprep.subr.bf16.mxu1 %v2282_v34 }
 0x386   : > { %1014 = vmatpush1.bf16.msra.mxu0 %v2287_v35  ;;  %1055 = vmatpush1.bf16.msra.mxu1 %v2290_v36 }
 0x387   : > { %1015 = vmatprep.subr.bf16.mxu0 %v2295_v37  ;;  %1056 = vmatprep.subr.bf16.mxu1 %v2298_v38 }
 0x38a   : > { %1016 = vmatpush1.bf16.msra.mxu0 %v2303_v39  ;;  %1057 = vmatpush1.bf16.msra.mxu1 %v2306_v40 }
 0x38b   : > { %1146 = vmatprep.subr.bf16.mxu0 %v2185_v9  ;;  %1187 = vmatprep.subr.bf16.mxu1 %v2188_v10 }
 0x440   : > { %v890_v57 = vpop.f32.mrb[12].mxu0  ;;  %v931_v5 = vpop.f32.mrb[12].mxu1 }
 0x441   : > { %v892_v6 = vpop.f32.mrb[13].mxu0  ;;  %v933_v7 = vpop.f32.mrb[13].mxu1 }
 0x442   : > { %v942_v41 = vcombine.low %v890_v57, %v892_v6  ;;  %v943_v42 = vcombine.low %v931_v5, %v933_v7  ;;  %v894_v43 = vpop.f32.mrb[14].mxu0  ;;  %v935_v44 = vpop.f32.mrb[14].mxu1 }
 0x443   : > { %v895_v45 = vpop.f32.mrb[15].mxu0  ;;  %v936_v46 = vpop.f32.mrb[15].mxu1 }
 0x444   : > { %v950_v47 = vrot.slane %v942_v41, %v2359_v48  ;;  %v957_v50 = vrot.slane %v943_v42, %v2359_v48 }
 0x446   : > { %v958_v52 = vcombine.low %v950_v47, %v957_v50 }
 0x448   : > { %v960_v53 = vadd.f32 %v958_v52, %v854_v51 }
 0x44a   : > { %v1815_v54 = vmul.f32 -1.442695, %v960_v53  ;;  %v968_v55 = vrot.slane %v960_v53, 2  ;;  %v979_v58 = vrot.slane %v960_v53, 6  ;;  %v976_v61 = vrot.slane %v960_v53, 4 }
 0x44c   : > { %1979 = vpow2.f32 %v1815_v54  ;;  %v1816_v56 = vmul.f32 -1.442695, %v968_v55  ;;  %v1817_v59 = vmul.f32 -1.442695, %v979_v58 }
 0x44e   : > { %1981 = vpow2.f32 %v1816_v56 }
 0x44f   : > { %1983 = vpow2.f32 %v1817_v59 }
 0x456   : > { %v1980_v60 = vpop.eup %1979 }
 0x457   : > { %v964_v49 = vadd.f32 1.0, %v1980_v60 }
 0x458   : > { %v1982_v62 = vpop.eup %1981 }
 0x459   : > { %1985 = vrcp.f32 %v964_v49  ;;  %v973_v63 = vadd.f32 1.0, %v1982_v62  ;;  %v1984_v1 = vpop.eup %1983 }
 0x45a   : > { %1987 = vtanh.f32 %v976_v61  ;;  %v984_v57 = vadd.f32 1.0, %v1984_v1 }
 0x45b   : > { %1989 = vrcp.f32 %v973_v63 }
 0x45c   : > { %1991 = vrcp.f32 %v984_v57  ;;  %v2580_v57 = vld [vmem:[%s2182_s29 + $0x2c] ss:$16 sps:$4 sm:$0xff]  }
 0x463   : > { %v1986_v2 = vpop.eup %1985 }
 0x464   : > { %v1988_v3 = vpop.eup %1987 }
 0x465   : > { %v1990_v4 = vpop.eup %1989  ;;  %v988_v6 = vmul.f32 %v1988_v3, %v1986_v2  ;;  %v2568_v2 = vld [vmem:[%s2182_s29] ss:$16 sps:$4 sm:$0xff]   ;;  %v2572_v3 = vld [vmem:[%s2182_s29 + $0x8] ss:$16 sps:$4 sm:$0xff]  }
 0x466   : > { %v987_v5 = vmul.f32 %v1990_v4, %v2466_v0  ;;  %v1992_v41 = vpop.eup %1991  ;;  %v2576_v4 = vld [vmem:[%s2182_s29 + $0x24] ss:$16 sps:$4 sm:$0xff]  }
 0x468   : > { %v2514_v7 = vadd.f32 %v988_v6, %v987_v5  ;;  %v2586_v5 = vld [vmem:[%s2182_s29 + $0x20] ss:$16 sps:$4 sm:$0xff]   ;;  %v2590_v6 = vld [vmem:[%s2182_s29 + $0x28] ss:$16 sps:$4 sm:$0xff]  }
 0x46a   : > { %1993 = vtanh.f32 %v2514_v7 }
 0x474   : > { %v1994_v42 = vpop.eup %1993 }
 0x475   : > { %v991_v43 = vmul.f32 %v1994_v42, %v1992_v41  ;;  %v2598_v41 = vld [vmem:[%s2182_s29 + $0x4c] ss:$16 sps:$4 sm:$0xff]   ;;  %v2602_v42 = vld [vmem:[%s2182_s29 + $0x40] ss:$16 sps:$4 sm:$0xff]  }
 0x477   : > { %994 = vst [vmem:[%s993_s4] sm:$0x3] %v991_v43  ;;  %v1000_v44 = vpack.c.bf16 %v991_v43, %v991_v43  ;;  %v2606_v43 = vld [vmem:[%s2182_s29 + $0x48] ss:$16 sps:$4 sm:$0xff]  }
 0x479   : > { %1034 = vmatmul.mubr.bf16.vlgmr.msra.gmra.mrb[16].mxu0 %v1000_v44  ;;  %1075 = vmatmul.mubr.bf16.vlgmr.msra.gmra.mrb[16].mxu1 %v1000_v44  ;;  %v2610_v44 = vld [vmem:[%s2182_s29 + $0x64] ss:$16 sps:$4 sm:$0xff]  }
 0x47a   : > { %1147 = vmatpush1.bf16.msra.mxu0 %v2192_v11  ;;  %1188 = vmatpush1.bf16.msra.mxu1 %v2195_v12 }
 0x47b   : > { %1148 = vmatprep.subr.bf16.mxu0 %v2199_v13  ;;  %1189 = vmatprep.subr.bf16.mxu1 %v2204_v14 }
 0x47c   : > { %1178 = vmatprep.mubr.bf16.mxu0 %v2115_v8  ;;  %1219 = vmatprep.mubr.bf16.mxu1 %v2115_v8 }
 0x47e   : > { %1149 = vmatpush1.bf16.msra.mxu0 %v2207_v15  ;;  %1190 = vmatpush1.bf16.msra.mxu1 %v2211_v16 }
 0x47f   : > { %1150 = vmatprep.subr.bf16.mxu0 %v2215_v17  ;;  %1191 = vmatprep.subr.bf16.mxu1 %v2218_v18 }
 0x482   : > { %1151 = vmatpush1.bf16.msra.mxu0 %v2221_v19  ;;  %1192 = vmatpush1.bf16.msra.mxu1 %v2224_v20 }
 0x483   : > { %1152 = vmatprep.subr.bf16.mxu0 %v2229_v21  ;;  %1193 = vmatprep.subr.bf16.mxu1 %v2234_v22  ;;  %v999_v21 = vld [vmem:[%s998_s8] sm:$0xff] }
 0x486   : > { %1153 = vmatpush1.bf16.msra.mxu0 %v2237_v23  ;;  %1194 = vmatpush1.bf16.msra.mxu1 %v2242_v24 }
 0x487   : > { %1154 = vmatprep.subr.bf16.mxu0 %v2245_v25  ;;  %1195 = vmatprep.subr.bf16.mxu1 %v2250_v26 }
 0x48a   : > { %1155 = vmatpush1.bf16.msra.mxu0 %v2253_v27  ;;  %1196 = vmatpush1.bf16.msra.mxu1 %v2256_v28 }
 0x48b   : > { %1156 = vmatprep.subr.bf16.mxu0 %v2261_v29  ;;  %1197 = vmatprep.subr.bf16.mxu1 %v2266_v30 }
 0x48e   : > { %1157 = vmatpush1.bf16.msra.mxu0 %v2271_v31  ;;  %1198 = vmatpush1.bf16.msra.mxu1 %v2274_v32 }
 0x48f   : > { %1158 = vmatprep.subr.bf16.mxu0 %v2279_v33  ;;  %1199 = vmatprep.subr.bf16.mxu1 %v2282_v34 }
 0x492   : > { %1159 = vmatpush1.bf16.msra.mxu0 %v2287_v35  ;;  %1200 = vmatpush1.bf16.msra.mxu1 %v2290_v36 }
 0x493   : > { %1160 = vmatprep.subr.bf16.mxu0 %v2295_v37  ;;  %1201 = vmatprep.subr.bf16.mxu1 %v2298_v38 }
 0x496   : > { %1161 = vmatpush1.bf16.msra.mxu0 %v2303_v39  ;;  %1202 = vmatpush1.bf16.msra.mxu1 %v2306_v40 }
 0x497   : > { %1291 = vmatprep.subr.bf16.mxu0 %v2185_v9  ;;  %1332 = vmatprep.subr.bf16.mxu1 %v2188_v10 }
 0x54c   : > { %v1035_v11 = vpop.f32.mrb[16].mxu0  ;;  %v1076_v12 = vpop.f32.mrb[16].mxu1 }
 0x54d   : > { %v1037_v13 = vpop.f32.mrb[17].mxu0  ;;  %v1078_v14 = vpop.f32.mrb[17].mxu1 }
 0x54e   : > { %v1087_v15 = vcombine.low %v1035_v11, %v1037_v13  ;;  %v1088_v16 = vcombine.low %v1076_v12, %v1078_v14  ;;  %v1039_v17 = vpop.f32.mrb[18].mxu0  ;;  %v1080_v18 = vpop.f32.mrb[18].mxu1  ;;  %v2614_v11 = vld [vmem:[%s2182_s29 + $0x6c] ss:$16 sps:$4 sm:$0xff]   ;;  %v2618_v12 = vld [vmem:[%s2182_s29 + $0x60] ss:$16 sps:$4 sm:$0xff]  }
 0x54f   : > { %v1040_v19 = vpop.f32.mrb[19].mxu0  ;;  %v1081_v20 = vpop.f32.mrb[19].mxu1  ;;  %v2622_v13 = vld [vmem:[%s2182_s29 + $0x68] ss:$16 sps:$4 sm:$0xff]   ;;  %v2626_v14 = vld [vmem:[%s2182_s29 + $0x84] ss:$16 sps:$4 sm:$0xff]  }
 0x550   : > { %v1095_v9 = vrot.slane %v1087_v15, %v2359_v48  ;;  %v1102_v10 = vrot.slane %v1088_v16, %v2359_v48  ;;  %v2630_v15 = vld [vmem:[%s2182_s29 + $0x8c] ss:$16 sps:$4 sm:$0xff]   ;;  %v1144_v16 = vld [vmem:[%s1143_s19] sm:$0xff] }
 0x552   : > { %v1103_v22 = vcombine.low %v1095_v9, %v1102_v10 }
 0x554   : > { %v1105_v23 = vadd.f32 %v1103_v22, %v999_v21 }
 0x556   : > { %v1821_v24 = vmul.f32 -1.442695, %v1105_v23  ;;  %v1113_v25 = vrot.slane %v1105_v23, 2  ;;  %v1124_v0 = vrot.slane %v1105_v23, 6  ;;  %v1121_v47 = vrot.slane %v1105_v23, 4 }
 0x558   : > { %1995 = vpow2.f32 %v1821_v24  ;;  %v1822_v26 = vmul.f32 -1.442695, %v1113_v25  ;;  %v1823_v45 = vmul.f32 -1.442695, %v1124_v0 }
 0x55a   : > { %1997 = vpow2.f32 %v1822_v26 }
 0x55b   : > { %1999 = vpow2.f32 %v1823_v45 }
 0x562   : > { %v1996_v46 = vpop.eup %1995 }
 0x563   : > { %v1109_v50 = vadd.f32 1.0, %v1996_v46 }
 0x564   : > { %v1998_v51 = vpop.eup %1997 }
 0x565   : > { %2001 = vrcp.f32 %v1109_v50  ;;  %v1118_v52 = vadd.f32 1.0, %v1998_v51  ;;  %v2000_v53 = vpop.eup %1999 }
 0x566   : > { %2003 = vtanh.f32 %v1121_v47  ;;  %v1129_v58 = vadd.f32 1.0, %v2000_v53 }
 0x567   : > { %2005 = vrcp.f32 %v1118_v52 }
 0x568   : > { %2007 = vrcp.f32 %v1129_v58 }
 0x56f   : > { %v2002_v54 = vpop.eup %2001 }
 0x570   : > { %v2004_v55 = vpop.eup %2003 }
 0x571   : > { %v2006_v56 = vpop.eup %2005  ;;  %v1133_v60 = vmul.f32 %v2004_v55, %v2002_v54 }
 0x572   : > { %v1132_v59 = vmul.f32 %v2006_v56, %v2514_v7  ;;  %v2008_v49 = vpop.eup %2007  ;;  %v2594_v7 = vld [vmem:[%s2182_s29 + $0x44] ss:$16 sps:$4 sm:$0xff]  }
 0x574   : > { %v2562_v61 = vadd.f32 %v1133_v60, %v1132_v59  ;;  %v2078_v59 = vld [vmem:[%s2182_s29 + $0x88] ss:$16 sps:$4 sm:$0xff]   ;;  %v2079_v60 = vld [vmem:[%s2182_s29 + $0xa4] ss:$16 sps:$4 sm:$0xff]  }
 0x576   : > { %2009 = vtanh.f32 %v2562_v61 }
 0x580   : > { %v2010_v62 = vpop.eup %2009 }
 0x581   : > { %v1136_v63 = vmul.f32 %v2010_v62, %v2008_v49  ;;  %v2081_v49 = vld [vmem:[%s2182_s29 + $0xa0] ss:$16 sps:$4 sm:$0xff]   ;;  %v2082_v62 = vld [vmem:[%s2182_s29 + $0xa8] ss:$16 sps:$4 sm:$0xff]  }
 0x583   : > { %1139 = vst [vmem:[%s1138_s15] sm:$0x3] %v1136_v63  ;;  %v1145_v1 = vpack.c.bf16 %v1136_v63, %v1136_v63  ;;  %v2083_v63 = vld [vmem:[%s2182_s29 + $0xc4] ss:$16 sps:$4 sm:$0xff]  }
 0x585   : > { %1179 = vmatmul.mubr.bf16.vlgmr.msra.gmra.mrb[20].mxu0 %v1145_v1  ;;  %1220 = vmatmul.mubr.bf16.vlgmr.msra.gmra.mrb[20].mxu1 %v1145_v1  ;;  %v2084_v1 = vld [vmem:[%s2182_s29 + $0xcc] ss:$16 sps:$4 sm:$0xff]  }
 0x586   : > { %1292 = vmatpush1.bf16.msra.mxu0 %v2568_v2  ;;  %1333 = vmatpush1.bf16.msra.mxu1 %v2572_v3 }
 0x587   : > { %1293 = vmatprep.subr.bf16.mxu0 %v2576_v4  ;;  %1334 = vmatprep.subr.bf16.mxu1 %v2580_v57 }
 0x588   : > { %1323 = vmatprep.mubr.bf16.mxu0 %v2115_v8  ;;  %1364 = vmatprep.mubr.bf16.mxu1 %v2115_v8 }
 0x58a   : > { %1294 = vmatpush1.bf16.msra.mxu0 %v2586_v5  ;;  %1335 = vmatpush1.bf16.msra.mxu1 %v2590_v6 }
 0x58b   : > { %1295 = vmatprep.subr.bf16.mxu0 %v2594_v7  ;;  %1336 = vmatprep.subr.bf16.mxu1 %v2598_v41 }
 0x58e   : > { %1296 = vmatpush1.bf16.msra.mxu0 %v2602_v42  ;;  %1337 = vmatpush1.bf16.msra.mxu1 %v2606_v43 }
 0x58f   : > { %1297 = vmatprep.subr.bf16.mxu0 %v2610_v44  ;;  %1338 = vmatprep.subr.bf16.mxu1 %v2614_v11 }
 0x592   : > { %1298 = vmatpush1.bf16.msra.mxu0 %v2618_v12  ;;  %1339 = vmatpush1.bf16.msra.mxu1 %v2622_v13 }
 0x593   : > { %1299 = vmatprep.subr.bf16.mxu0 %v2626_v14  ;;  %1340 = vmatprep.subr.bf16.mxu1 %v2630_v15 }
 0x596   : > { %1300 = vmatpush1.bf16.msra.mxu0 %v2253_v27  ;;  %1341 = vmatpush1.bf16.msra.mxu1 %v2256_v28  ;;  %v2075_v27 = vld [vmem:[%s2182_s29 + $0x4] ss:$16 sps:$4 sm:$0xff]   ;;  %v2076_v28 = vld [vmem:[%s2182_s29 + $0xc] ss:$16 sps:$4 sm:$0xff]  }
 0x597   : > { %1301 = vmatprep.subr.bf16.mxu0 %v2261_v29  ;;  %1342 = vmatprep.subr.bf16.mxu1 %v2266_v30 }
 0x59a   : > { %1302 = vmatpush1.bf16.msra.mxu0 %v2271_v31  ;;  %1343 = vmatpush1.bf16.msra.mxu1 %v2274_v32 }
 0x59b   : > { %1303 = vmatprep.subr.bf16.mxu0 %v2279_v33  ;;  %1344 = vmatprep.subr.bf16.mxu1 %v2282_v34 }
 0x59e   : > { %1304 = vmatpush1.bf16.msra.mxu0 %v2287_v35  ;;  %1345 = vmatpush1.bf16.msra.mxu1 %v2290_v36 }
 0x59f   : > { %1305 = vmatprep.subr.bf16.mxu0 %v2295_v37  ;;  %1346 = vmatprep.subr.bf16.mxu1 %v2298_v38 }
 0x5a2   : > { %1306 = vmatpush1.bf16.msra.mxu0 %v2303_v39  ;;  %1347 = vmatpush1.bf16.msra.mxu1 %v2306_v40 }
 0x5a3   : > { %1436 = vmatprep.subr.bf16.mxu0 %v2075_v27  ;;  %1477 = vmatprep.subr.bf16.mxu1 %v2076_v28 }
 0x658   : > { %v1180_v29 = vpop.f32.mrb[20].mxu0  ;;  %v1221_v30 = vpop.f32.mrb[20].mxu1 }
 0x659   : > { %v1182_v31 = vpop.f32.mrb[21].mxu0  ;;  %v1223_v32 = vpop.f32.mrb[21].mxu1 }
 0x65a   : > { %v1232_v33 = vcombine.low %v1180_v29, %v1182_v31  ;;  %v1233_v34 = vcombine.low %v1221_v30, %v1223_v32  ;;  %v1184_v35 = vpop.f32.mrb[22].mxu0  ;;  %v1225_v36 = vpop.f32.mrb[22].mxu1  ;;  %v1289_v29 = vld [vmem:[%s1288_s24] sm:$0xff] }
 0x65b   : > { %v1185_v37 = vpop.f32.mrb[23].mxu0  ;;  %v1226_v38 = vpop.f32.mrb[23].mxu1 }
 0x65c   : > { %v1240_v39 = vrot.slane %v1232_v33, %v2359_v48  ;;  %v1247_v40 = vrot.slane %v1233_v34, %v2359_v48 }
 0x65e   : > { %v1248_v17 = vcombine.low %v1240_v39, %v1247_v40 }
 0x660   : > { %v1250_v18 = vadd.f32 %v1248_v17, %v1144_v16 }
 0x662   : > { %v1827_v19 = vmul.f32 -1.442695, %v1250_v18  ;;  %v1258_v20 = vrot.slane %v1250_v18, 2  ;;  %v1269_v10 = vrot.slane %v1250_v18, 6  ;;  %v1266_v23 = vrot.slane %v1250_v18, 4 }
 0x664   : > { %2011 = vpow2.f32 %v1827_v19  ;;  %v1828_v9 = vmul.f32 -1.442695, %v1258_v20  ;;  %v1829_v21 = vmul.f32 -1.442695, %v1269_v10 }
 0x666   : > { %2013 = vpow2.f32 %v1828_v9 }
 0x667   : > { %2015 = vpow2.f32 %v1829_v21 }
 0x66e   : > { %v2012_v22 = vpop.eup %2011 }
 0x66f   : > { %v1254_v24 = vadd.f32 1.0, %v2012_v22 }
 0x670   : > { %v2014_v25 = vpop.eup %2013 }
 0x671   : > { %2017 = vrcp.f32 %v1254_v24  ;;  %v1263_v26 = vadd.f32 1.0, %v2014_v25  ;;  %v2016_v0 = vpop.eup %2015 }
 0x672   : > { %2019 = vtanh.f32 %v1266_v23  ;;  %v1274_v50 = vadd.f32 1.0, %v2016_v0 }
 0x673   : > { %2021 = vrcp.f32 %v1263_v26 }
 0x674   : > { %2023 = vrcp.f32 %v1274_v50 }
 0x67b   : > { %v2018_v45 = vpop.eup %2017 }
 0x67c   : > { %v2020_v46 = vpop.eup %2019 }
 0x67d   : > { %v2022_v47 = vpop.eup %2021  ;;  %v1278_v52 = vmul.f32 %v2020_v46, %v2018_v45 }
 0x67e   : > { %v1277_v51 = vmul.f32 %v2022_v47, %v2562_v61  ;;  %v2024_v54 = vpop.eup %2023  ;;  %v2080_v61 = vld [vmem:[%s2182_s29 + $0xac] ss:$16 sps:$4 sm:$0xff]  }
 0x680   : > { %v2658_v53 = vadd.f32 %v1278_v52, %v1277_v51 }
 0x682   : > { %2025 = vtanh.f32 %v2658_v53 }
 0x68c   : > { %v2026_v55 = vpop.eup %2025 }
 0x68d   : > { %v1281_v56 = vmul.f32 %v2026_v55, %v2024_v54 }
 0x68f   : > { %1284 = vst [vmem:[%s1283_s21] sm:$0x3] %v1281_v56  ;;  %v1290_v58 = vpack.c.bf16 %v1281_v56, %v1281_v56 }
 0x691   : > { %1324 = vmatmul.mubr.bf16.vlgmr.msra.gmra.mrb[24].mxu0 %v1290_v58  ;;  %1365 = vmatmul.mubr.bf16.vlgmr.msra.gmra.mrb[24].mxu1 %v1290_v58 }
 0x692   : > { %1437 = vmatpush1.bf16.msra.mxu0 %v2568_v2  ;;  %1478 = vmatpush1.bf16.msra.mxu1 %v2572_v3  ;;  %v2085_v2 = vld [vmem:[%s2182_s29 + $0xc0] ss:$16 sps:$4 sm:$0xff]   ;;  %v2086_v3 = vld [vmem:[%s2182_s29 + $0xc8] ss:$16 sps:$4 sm:$0xff]  }
 0x693   : > { %1438 = vmatprep.subr.bf16.mxu0 %v2576_v4  ;;  %1479 = vmatprep.subr.bf16.mxu1 %v2580_v57  ;;  %v2087_v4 = vld [vmem:[%s2182_s29 + $0xe4] ss:$16 sps:$4 sm:$0xff]   ;;  %v2088_v57 = vld [vmem:[%s2182_s29 + $0xec] ss:$16 sps:$4 sm:$0xff]  }
 0x694   : > { %1468 = vmatprep.mubr.bf16.mxu0 %v2115_v8  ;;  %1509 = vmatprep.mubr.bf16.mxu1 %v2115_v8  ;;  %v2077_v8 = vld [vmem:[%s2182_s29 + $0x80] ss:$16 sps:$4 sm:$0xff]  }
 0x696   : > { %1439 = vmatpush1.bf16.msra.mxu0 %v2586_v5  ;;  %1480 = vmatpush1.bf16.msra.mxu1 %v2590_v6  ;;  %v2089_v5 = vld [vmem:[%s2182_s29 + $0xe0] ss:$16 sps:$4 sm:$0xff]   ;;  %v2090_v6 = vld [vmem:[%s2182_s29 + $0xe8] ss:$16 sps:$4 sm:$0xff]   ;;  %s1836_s29 = sshll.u32 %s2697_s22, 1 }
 0x697   : > { %1440 = vmatprep.subr.bf16.mxu0 %v2594_v7  ;;  %1481 = vmatprep.subr.bf16.mxu1 %v2598_v41  ;;  %s1428_s25 = scalar_lea.vmem %s2372_s14, %s1836_s29 [#allocation3] }
 0x69a   : > { %1441 = vmatpush1.bf16.msra.mxu0 %v2602_v42  ;;  %1482 = vmatpush1.bf16.msra.mxu1 %v2606_v43 }
 0x69b   : > { %1442 = vmatprep.subr.bf16.mxu0 %v2610_v44  ;;  %1483 = vmatprep.subr.bf16.mxu1 %v2614_v11 }
 0x69e   : > { %1443 = vmatpush1.bf16.msra.mxu0 %v2618_v12  ;;  %1484 = vmatpush1.bf16.msra.mxu1 %v2622_v13 }
 0x69f   : > { %1444 = vmatprep.subr.bf16.mxu0 %v2626_v14  ;;  %1485 = vmatprep.subr.bf16.mxu1 %v2630_v15 }
 0x6a2   : > { %1445 = vmatpush1.bf16.msra.mxu0 %v2077_v8  ;;  %1486 = vmatpush1.bf16.msra.mxu1 %v2078_v59  ;;  %v1434_v8 = vld [vmem:[%s1433_s28] sm:$0xff] }
 0x6a3   : > { %1446 = vmatprep.subr.bf16.mxu0 %v2079_v60  ;;  %1487 = vmatprep.subr.bf16.mxu1 %v2080_v61 }
 0x6a6   : > { %1447 = vmatpush1.bf16.msra.mxu0 %v2081_v49  ;;  %1488 = vmatpush1.bf16.msra.mxu1 %v2082_v62 }
 0x6a7   : > { %1448 = vmatprep.subr.bf16.mxu0 %v2083_v63  ;;  %1489 = vmatprep.subr.bf16.mxu1 %v2084_v1 }
 0x6aa   : > { %1449 = vmatpush1.bf16.msra.mxu0 %v2085_v2  ;;  %1490 = vmatpush1.bf16.msra.mxu1 %v2086_v3 }
 0x6ab   : > { %1450 = vmatprep.subr.bf16.mxu0 %v2087_v4  ;;  %1491 = vmatprep.subr.bf16.mxu1 %v2088_v57 }
 0x6ae   : > { %1451 = vmatpush1.bf16.msra.mxu0 %v2089_v5  ;;  %1492 = vmatpush1.bf16.msra.mxu1 %v2090_v6 }
 0x764   : > { %v1325_v7 = vpop.f32.mrb[24].mxu0  ;;  %v1366_v41 = vpop.f32.mrb[24].mxu1 }
 0x765   : > { %v1327_v42 = vpop.f32.mrb[25].mxu0  ;;  %v1368_v43 = vpop.f32.mrb[25].mxu1 }
 0x766   : > { %v1377_v44 = vcombine.low %v1325_v7, %v1327_v42  ;;  %v1378_v11 = vcombine.low %v1366_v41, %v1368_v43  ;;  %v1329_v12 = vpop.f32.mrb[26].mxu0  ;;  %v1370_v13 = vpop.f32.mrb[26].mxu1 }
 0x767   : > { %v1330_v14 = vpop.f32.mrb[27].mxu0  ;;  %v1371_v15 = vpop.f32.mrb[27].mxu1 }
 0x768   : > { %v1385_v27 = vrot.slane %v1377_v44, %v2359_v48  ;;  %v1392_v28 = vrot.slane %v1378_v11, %v2359_v48 }
 0x76a   : > { %v1393_v30 = vcombine.low %v1385_v27, %v1392_v28 }
 0x76c   : > { %v1395_v31 = vadd.f32 %v1393_v30, %v1289_v29 }
 0x76e   : > { %v1833_v32 = vmul.f32 -1.442695, %v1395_v31  ;;  %v1403_v33 = vrot.slane %v1395_v31, 2  ;;  %v1414_v35 = vrot.slane %v1395_v31, 6  ;;  %v1411_v38 = vrot.slane %v1395_v31, 4 }
 0x770   : > { %2027 = vpow2.f32 %v1833_v32  ;;  %v1834_v34 = vmul.f32 -1.442695, %v1403_v33  ;;  %v1835_v36 = vmul.f32 -1.442695, %v1414_v35 }
 0x772   : > { %2029 = vpow2.f32 %v1834_v34 }
 0x773   : > { %2031 = vpow2.f32 %v1835_v36 }
 0x77a   : > { %v2028_v37 = vpop.eup %2027 }
 0x77b   : > { %v1399_v39 = vadd.f32 1.0, %v2028_v37 }
 0x77c   : > { %v2030_v40 = vpop.eup %2029 }
 0x77d   : > { %2033 = vrcp.f32 %v1399_v39  ;;  %v1408_v16 = vadd.f32 1.0, %v2030_v40  ;;  %v2032_v17 = vpop.eup %2031 }
 0x77e   : > { %2035 = vtanh.f32 %v1411_v38  ;;  %v1419_v9 = vadd.f32 1.0, %v2032_v17 }
 0x77f   : > { %2037 = vrcp.f32 %v1408_v16 }
 0x780   : > { %2039 = vrcp.f32 %v1419_v9 }
 0x787   : > { %v2034_v18 = vpop.eup %2033 }
 0x788   : > { %v2036_v19 = vpop.eup %2035 }
 0x789   : > { %v2038_v20 = vpop.eup %2037  ;;  %v1423_v21 = vmul.f32 %v2036_v19, %v2034_v18 }
 0x78a   : > { %v1422_v10 = vmul.f32 %v2038_v20, %v2658_v53  ;;  %v2040_v23 = vpop.eup %2039 }
 0x78c   : > { %v1424_v22 = vadd.f32 %v1423_v21, %v1422_v10 }
 0x78e   : > { %2041 = vtanh.f32 %v1424_v22 }
 0x798   : > { %v2042_v24 = vpop.eup %2041 }
 0x799   : > { %v1426_v25 = vmul.f32 %v2042_v24, %v2040_v23 }
 0x79b   : > { %1429 = vst [vmem:[%s1428_s25] sm:$0x3] %v1426_v25  ;;  %v1435_v26 = vpack.c.bf16 %v1426_v25, %v1426_v25 }
 0x79d   : > { %1469 = vmatmul.mubr.bf16.vlgmr.msra.gmra.mrb[28].mxu0 %v1435_v26  ;;  %1510 = vmatmul.mubr.bf16.vlgmr.msra.gmra.mrb[28].mxu1 %v1435_v26 }
 0x870   : > { %v1470_v0 = vpop.f32.mrb[28].mxu0  ;;  %v1511_v45 = vpop.f32.mrb[28].mxu1 }
 0x871   : > { %v1472_v46 = vpop.f32.mrb[29].mxu0  ;;  %v1513_v47 = vpop.f32.mrb[29].mxu1 }
 0x872   : > { %v1522_v50 = vcombine.low %v1470_v0, %v1472_v46  ;;  %v1523_v51 = vcombine.low %v1511_v45, %v1513_v47  ;;  %v1474_v52 = vpop.f32.mrb[30].mxu0  ;;  %v1515_v53 = vpop.f32.mrb[30].mxu1 }
 0x873   : > { %v1475_v54 = vpop.f32.mrb[31].mxu0  ;;  %v1516_v55 = vpop.f32.mrb[31].mxu1 }
 0x874   : > { %v1530_v56 = vrot.slane %v1522_v50, %v2359_v48  ;;  %v1537_v58 = vrot.slane %v1523_v51, %v2359_v48 }
 0x876   : > { %v1538_v59 = vcombine.low %v1530_v56, %v1537_v58 }
 0x878   : > { %v1540_v60 = vadd.f32 %v1538_v59, %v1434_v8 }
 0x87a   : > { %v1839_v61 = vmul.f32 -1.442695, %v1540_v60  ;;  %v1548_v49 = vrot.slane %v1540_v60, 2  ;;  %v1559_v63 = vrot.slane %v1540_v60, 6  ;;  %v1556_v3 = vrot.slane %v1540_v60, 4 }
 0x87c   : > { %2043 = vpow2.f32 %v1839_v61  ;;  %v1840_v62 = vmul.f32 -1.442695, %v1548_v49  ;;  %v1841_v1 = vmul.f32 -1.442695, %v1559_v63 }
 0x87e   : > { %2045 = vpow2.f32 %v1840_v62 }
 0x87f   : > { %2047 = vpow2.f32 %v1841_v1 }
 0x886   : > { %v2044_v2 = vpop.eup %2043 }
 0x887   : > { %v1544_v4 = vadd.f32 1.0, %v2044_v2 }
 0x888   : > { %v2046_v57 = vpop.eup %2045 }
 0x889   : > { %2049 = vrcp.f32 %v1544_v4  ;;  %v1553_v5 = vadd.f32 1.0, %v2046_v57  ;;  %v2048_v48 = vpop.eup %2047 }
 0x88a   : > { %2051 = vtanh.f32 %v1556_v3  ;;  %v1564_v42 = vadd.f32 1.0, %v2048_v48 }
 0x88b   : > { %2053 = vrcp.f32 %v1553_v5 }
 0x88c   : > { %2055 = vrcp.f32 %v1564_v42 }
 0x893   : > { %v2050_v6 = vpop.eup %2049 }
 0x894   : > { %v2052_v7 = vpop.eup %2051 }
 0x895   : > { %v2054_v41 = vpop.eup %2053  ;;  %v1568_v44 = vmul.f32 %v2052_v7, %v2050_v6 }
 0x896   : > { %v1567_v43 = vmul.f32 %v2054_v41, %v1424_v22  ;;  %v2056_v12 = vpop.eup %2055 }
 0x898   : > { %v1569_v11 = vadd.f32 %v1568_v44, %v1567_v43 }
 0x89a   : > { %2057 = vtanh.f32 %v1569_v11 }
 0x8a1   : > { %1581 = sbr.rel (!%p2163_p5) target bundleno = 2228 (0x8b4), region = 70 }
 0x8a4   : > { %v2058_v13 = vpop.eup %2057 }
 0x8a5   : > { %v1571_v14 = vmul.f32 %v2058_v13, %v2056_v12 }
 0x8a7   : > { %1574 = vst [vmem:[%s1573_s30] sm:$0x3] %v1571_v14 }
 0x8ae   : > { %v1599_v15 = vld [vmem:[%s2372_s14] sm:$0x3]  ;;  %v1601_v27 = vld [vmem:[%s2372_s14 + $0x2] sm:$0x3]  ;;  %v1603_v28 = vld [vmem:[%s2372_s14 + $0x4] sm:$0x3] }
 0x8af   : > { %v1605_v29 = vld [vmem:[%s2372_s14 + $0x6] sm:$0x3]  ;;  %v1607_v30 = vld [vmem:[%s2372_s14 + $0x8] sm:$0x3]  ;;  %1600 = vst [vmem:[%s1583_s7] sm:$0x3] %v1599_v15 }
 0x8b0   : > { %1602 = vst [vmem:[%s1583_s7 + $0x4] sm:$0x3] %v1601_v27  ;;  %1604 = vst [vmem:[%s1583_s7 + $0x8] sm:$0x3] %v1603_v28  ;;  %v1609_v31 = vld [vmem:[%s2372_s14 + $0xa] sm:$0x3] }
 0x8b1   : > { %1606 = vst [vmem:[%s1583_s7 + $0xc] sm:$0x3] %v1605_v29  ;;  %1608 = vst [vmem:[%s1583_s7 + $0x10] sm:$0x3] %v1607_v30  ;;  %v1611_v32 = vld [vmem:[%s2372_s14 + $0xc] sm:$0x3] }
 0x8b2   : > { %v1613_v33 = vld [vmem:[%s2372_s14 + $0xe] sm:$0x3]  ;;  %1610 = vst [vmem:[%s1583_s7 + $0x14] sm:$0x3] %v1609_v31  ;;  %1612 = vst [vmem:[%s1583_s7 + $0x18] sm:$0x3] %v1611_v32 }
 0x8b3   : > { %1614 = vst [vmem:[%s1583_s7 + $0x1c] sm:$0x3] %v1613_v33 }
 0x8b4 PF: > { %p9_p12 = scmp.ge.s32.totalorder %s2151_s13, 4   ;;  %s2744_s9 = smov %s2109_s10 }
 0x8b5   : > { %s2745_s10 = smov %s2161_s16  ;;  %s2746_s11 = smov %s2151_s13 }
 0x8b6   :  { %11 = sbr.rel (!%p9_p12) target bundleno = 2 (0x2), region = 161 }

// kernel: lstm_model_forward.7
= control target key start
LH: loop header
LB: loop body
LE: loop exit
PB: predicated region body
PF: predicated region fallthrough
CT: control target
= control target key end

     0   :  { %s2259_s12 = smov 0   ;;  %s2261_s13 = smov 0   ;;  %s2845_s0 = inlined_call_operand.vmem [shape: f32[8,2,1024], index: 0, kind: input, shape index: {}]   ;;  %s2846_s1 = inlined_call_operand.vmem [shape: bf16[2,128,512], index: 1, kind: input, shape index: {}]   ;;  %s2847_s2 = inlined_call_operand.vmem [shape: f32[2,128,6], index: 2, kind: input, shape index: {}]   ;;  %s2848_s3 = inlined_call_operand.vmem [shape: f32[2,2,6], index: 3, kind: output, shape index: {}]  }
   0x1   :  { %s2263_s14 = smov 0  }
   0x2 LB: > { %s2275_s15 = sadd.s32 4294967295, %s2232_s14   ;;  %s2278_s16 = sadd.s32 1, %s2232_s14   ;;  %s2232_s14 = sphi %s2263_s14, %s2851_s14   ;;  %s2228_s13 = sphi %s2261_s13, %s2850_s13   ;;  %s2224_s12 = sphi %s2259_s12, %s2849_s12  }
   0x3   : > { %s17_s17 = ssub.s32 %s2232_s14, %s2278_s16  ;;  %s20_s18 = sadd.s32 1, %s2228_s13 }
   0x4   : > { %p18_p0 = scmp.eq.s32.totalorder %s17_s17, 0  ;;  %p27_p1 = scmp.ne.s32.totalorder %s2228_s13, %s2224_s12 }
   0x5   : > { %p28_p2 = scmp.eq.s32.totalorder %s2232_s14, 0  ;;  %p1801_p4 = scmp.ge.s32.totalorder %s2232_s14, 2 }
   0x6   : > { %s2287_s19 = scalar_select %p18_p0, %s2228_s13, %s20_s18  }
   0x7   : > { %p29_p3 = por %p28_p2, %p27_p1  ;;  %131 = sbr.rel (%p1801_p4) target bundleno = 22 (0x16), region = 16 }
   0xe   : > { %134 = sbr.rel (!%p29_p3) target bundleno = 22 (0x16), region = 20  ;;  %s136_s20 = sand.u32 (%p29_p3), 1, %s2228_s13  }
   0xf   : > { %s1886_s21 = sshll.u32 (%p29_p3), %s2232_s14, 3  ;;  %s1802_s22 = sshll.u32 (%p29_p3), %s136_s20, 6 }
  0x10   : > { %s141_s25 = scalar_lea.vmem (%p29_p3), %s2845_s0, %s1886_s21  ;;  %s138_s26 = scalar_lea.vmem (%p29_p3), [#allocation2], %s1802_s22 }
  0x11   : > { %v183_v0 = vld [vmem:[%s141_s25] sm:$0xff] (%p29_p3)  ;;  %v185_v1 = vld [vmem:[%s141_s25 + $0x10] sm:$0xff] (%p29_p3) }
  0x12   : > { %v187_v2 = vld [vmem:[%s141_s25 + $0x20] sm:$0xff] (%p29_p3)  ;;  %184 = vst [vmem:[%s138_s26] sm:$0xff] (%p29_p3), %v183_v0  ;;  %186 = vst [vmem:[%s138_s26 + $0x8] sm:$0xff] (%p29_p3), %v185_v1  ;;  %v189_v3 = vld [vmem:[%s141_s25 + $0x30] sm:$0xff] (%p29_p3) }
  0x13   : > { %188 = vst [vmem:[%s138_s26 + $0x10] sm:$0xff] (%p29_p3), %v187_v2  ;;  %v191_v4 = vld [vmem:[%s141_s25 + $0x40] sm:$0xff] (%p29_p3)  ;;  %v193_v5 = vld [vmem:[%s141_s25 + $0x50] sm:$0xff] (%p29_p3)  ;;  %190 = vst [vmem:[%s138_s26 + $0x18] sm:$0xff] (%p29_p3), %v189_v3 }
  0x14   : > { %192 = vst [vmem:[%s138_s26 + $0x20] sm:$0xff] (%p29_p3), %v191_v4  ;;  %194 = vst [vmem:[%s138_s26 + $0x28] sm:$0xff] (%p29_p3), %v193_v5  ;;  %v195_v6 = vld [vmem:[%s141_s25 + $0x60] sm:$0xff] (%p29_p3)  ;;  %v197_v7 = vld [vmem:[%s141_s25 + $0x70] sm:$0xff] (%p29_p3) }
  0x15   : > { %196 = vst [vmem:[%s138_s26 + $0x30] sm:$0xff] %v195_v6  ;;  %198 = vst [vmem:[%s138_s26 + $0x38] sm:$0xff] %v197_v7 }
  0x16 PF: > { %p1805_p5 = scmp.ge.s32.totalorder %s2232_s14, 1  ;;  %p219_p6 = scmp.lt.s32.totalorder %s2232_s14, 3 }
  0x18   : > { %p220_p7 = pnand %p1805_p5, %p219_p6 }
  0x19   : > { %p259_p8 = scmp.lt.s32.totalorder (!%p220_p7), %s2275_s15, 1  ;;  %v2234_v8 = vmov (!%p220_p7), 0   ;;  %p306_p9 = scmp.eq.s32.totalorder (!%p220_p7), %s2275_s15, 0  ;;  %v2235_v41 = vmov (!%p220_p7), 1983009808   ;;  %v563_v43 = vlaneseq (!%p220_p7)  ;;  %vm2237_vm0 = vmmov (!%p220_p7), 0  }
  0x1a   : > { %223 = sbr.rel (%p220_p7) target bundleno = 2429 (0x97d), region = 66  ;;  %504 = vmatprep.mubr.bf16.mxu0 (!%p220_p7), %v2234_v8  ;;  %545 = vmatprep.mubr.bf16.mxu1 (!%p220_p7), %v2234_v8  ;;  %v561_v42 = vunpack.c.l.s4 (!%p220_p7), %v2235_v41  ;;  %s226_s5 = sand.u32 (!%p220_p7), 1, %s2224_s12   ;;  %vm1697_vm1 = vcmask (!%p220_p7), 41984  }
  0x1b   : > { %v564_v45 = vshrl.u32 (!%p220_p7), %v563_v43, 7  ;;  %s1806_s7 = sshll.u32 (!%p220_p7), %s226_s5, 6 }
  0x1c   : > { %v562_v44 = vunpack.c.0.s8 (!%p220_p7), %v561_v42  ;;  %s2481_s9 = scalar_lea.vmem (!%p220_p7), [#allocation2], %s1806_s7 }
  0x1e   : > { %v2479_v48 = vsub.s32 (!%p220_p7), %v562_v44, %v564_v45 }
  0x21   : > { %s2301_s27 = scalar_select %p259_p8, %s2275_s15, 1 }
  0x22   : > { %s307_s6 = scalar_select %p306_p9, 0, 7 }
  0x23   : > { %s1887_s28 = sshll.u32 %s2301_s27, 8  ;;  %s1811_s15 = sshll.u32 %s2301_s27, 1 }
  0x24   : > { %s2307_s4 = scalar_lea.vmem %s2846_s1, %s1887_s28  ;;  %s1889_s8 = sshll.u32 %s307_s6, 3 }
  0x25   : > { %v2310_v9 = vld [vmem:[%s2307_s4 + $0x4] ss:$16 sps:$4 sm:$0xff]   ;;  %v2313_v10 = vld [vmem:[%s2307_s4 + $0xc] ss:$16 sps:$4 sm:$0xff]   ;;  %v2317_v11 = vld [vmem:[%s2307_s4] ss:$16 sps:$4 sm:$0xff]   ;;  %s310_s10 = scalar_lea.vmem %s2481_s9, %s1889_s8 [#allocation2] }
  0x26   : > { %472 = vmatprep.subr.bf16.mxu0 %v2310_v9  ;;  %v2320_v12 = vld [vmem:[%s2307_s4 + $0x8] ss:$16 sps:$4 sm:$0xff]   ;;  %513 = vmatprep.subr.bf16.mxu1 %v2313_v10  ;;  %v2324_v13 = vld [vmem:[%s2307_s4 + $0x24] ss:$16 sps:$4 sm:$0xff]   ;;  %v2329_v14 = vld [vmem:[%s2307_s4 + $0x2c] ss:$16 sps:$4 sm:$0xff]  }
  0x27   : > { %473 = vmatpush1.bf16.msra.mxu0 %v2317_v11  ;;  %514 = vmatpush1.bf16.msra.mxu1 %v2320_v12  ;;  %v2332_v15 = vld [vmem:[%s2307_s4 + $0x20] ss:$16 sps:$4 sm:$0xff]   ;;  %v2336_v16 = vld [vmem:[%s2307_s4 + $0x28] ss:$16 sps:$4 sm:$0xff]   ;;  %v2340_v17 = vld [vmem:[%s2307_s4 + $0x44] ss:$16 sps:$4 sm:$0xff]  }
  0x28   : > { %474 = vmatprep.subr.bf16.mxu0 %v2324_v13  ;;  %515 = vmatprep.subr.bf16.mxu1 %v2329_v14  ;;  %v2343_v18 = vld [vmem:[%s2307_s4 + $0x4c] ss:$16 sps:$4 sm:$0xff]   ;;  %v2346_v19 = vld [vmem:[%s2307_s4 + $0x40] ss:$16 sps:$4 sm:$0xff]   ;;  %v2349_v20 = vld [vmem:[%s2307_s4 + $0x48] ss:$16 sps:$4 sm:$0xff]  }
  0x29   : > { %v2354_v21 = vld [vmem:[%s2307_s4 + $0x64] ss:$16 sps:$4 sm:$0xff]   ;;  %v2359_v22 = vld [vmem:[%s2307_s4 + $0x6c] ss:$16 sps:$4 sm:$0xff]   ;;  %v2362_v23 = vld [vmem:[%s2307_s4 + $0x60] ss:$16 sps:$4 sm:$0xff]  }
  0x2a   : > { %v2367_v24 = vld [vmem:[%s2307_s4 + $0x68] ss:$16 sps:$4 sm:$0xff]   ;;  %v2370_v25 = vld [vmem:[%s2307_s4 + $0x84] ss:$16 sps:$4 sm:$0xff]   ;;  %v2375_v26 = vld [vmem:[%s2307_s4 + $0x8c] ss:$16 sps:$4 sm:$0xff]  }
  0x2b   : > { %475 = vmatpush1.bf16.msra.mxu0 %v2332_v15  ;;  %516 = vmatpush1.bf16.msra.mxu1 %v2336_v16  ;;  %v2378_v27 = vld [vmem:[%s2307_s4 + $0x80] ss:$16 sps:$4 sm:$0xff]   ;;  %v2381_v28 = vld [vmem:[%s2307_s4 + $0x88] ss:$16 sps:$4 sm:$0xff]   ;;  %v2386_v29 = vld [vmem:[%s2307_s4 + $0xa4] ss:$16 sps:$4 sm:$0xff]  }
  0x2c   : > { %476 = vmatprep.subr.bf16.mxu0 %v2340_v17  ;;  %517 = vmatprep.subr.bf16.mxu1 %v2343_v18  ;;  %v2391_v30 = vld [vmem:[%s2307_s4 + $0xac] ss:$16 sps:$4 sm:$0xff]   ;;  %v2396_v31 = vld [vmem:[%s2307_s4 + $0xa0] ss:$16 sps:$4 sm:$0xff]   ;;  %v2399_v32 = vld [vmem:[%s2307_s4 + $0xa8] ss:$16 sps:$4 sm:$0xff]  }
  0x2d   : > { %v2404_v33 = vld [vmem:[%s2307_s4 + $0xc4] ss:$16 sps:$4 sm:$0xff]   ;;  %v2407_v34 = vld [vmem:[%s2307_s4 + $0xcc] ss:$16 sps:$4 sm:$0xff]   ;;  %v2412_v35 = vld [vmem:[%s2307_s4 + $0xc0] ss:$16 sps:$4 sm:$0xff]  }
  0x2e   : > { %v2415_v36 = vld [vmem:[%s2307_s4 + $0xc8] ss:$16 sps:$4 sm:$0xff]   ;;  %v2420_v37 = vld [vmem:[%s2307_s4 + $0xe4] ss:$16 sps:$4 sm:$0xff]   ;;  %v2423_v38 = vld [vmem:[%s2307_s4 + $0xec] ss:$16 sps:$4 sm:$0xff]  }
  0x2f   : > { %477 = vmatpush1.bf16.msra.mxu0 %v2346_v19  ;;  %518 = vmatpush1.bf16.msra.mxu1 %v2349_v20  ;;  %v2428_v39 = vld [vmem:[%s2307_s4 + $0xe0] ss:$16 sps:$4 sm:$0xff]   ;;  %v2431_v40 = vld [vmem:[%s2307_s4 + $0xe8] ss:$16 sps:$4 sm:$0xff]   ;;  %s609_s11 = scalar_select %p306_p9, 1, 6 }
  0x30   : > { %478 = vmatprep.subr.bf16.mxu0 %v2354_v21  ;;  %519 = vmatprep.subr.bf16.mxu1 %v2359_v22  ;;  %v311_v59 = vld [vmem:[%s310_s10] sm:$0xff]  ;;  %s752_s17 = scalar_select %p306_p9, 2, 5 }
  0x31   : > { %s1890_s12 = sshll.u32 %s609_s11, 3 }
  0x32   : > { %s612_s14 = scalar_lea.vmem %s2481_s9, %s1890_s12 [#allocation2]  ;;  %s1891_s18 = sshll.u32 %s752_s17, 3 }
  0x33   : > { %479 = vmatpush1.bf16.msra.mxu0 %v2362_v23  ;;  %520 = vmatpush1.bf16.msra.mxu1 %v2367_v24  ;;  %s755_s20 = scalar_lea.vmem %s2481_s9, %s1891_s18 [#allocation2] }
  0x34   : > { %480 = vmatprep.subr.bf16.mxu0 %v2370_v25  ;;  %521 = vmatprep.subr.bf16.mxu1 %v2375_v26  ;;  %s895_s21 = scalar_select %p306_p9, 3, 4 }
  0x35   : > { %s1038_s24 = scalar_select %p306_p9, 4, 3 }
  0x36   : > { %s1892_s22 = sshll.u32 %s895_s21, 3 }
  0x37   : > { %481 = vmatpush1.bf16.msra.mxu0 %v2378_v27  ;;  %522 = vmatpush1.bf16.msra.mxu1 %v2381_v28  ;;  %s898_s23 = scalar_lea.vmem %s2481_s9, %s1892_s22 [#allocation2]  ;;  %s1893_s25 = sshll.u32 %s1038_s24, 3 }
  0x38   : > { %482 = vmatprep.subr.bf16.mxu0 %v2386_v29  ;;  %523 = vmatprep.subr.bf16.mxu1 %v2391_v30  ;;  %s1041_s26 = scalar_lea.vmem %s2481_s9, %s1893_s25 [#allocation2] }
  0x39   : > { %s1181_s28 = scalar_select %p306_p9, 5, 2 }
  0x3a   : > { %s1324_s5 = scalar_select %p306_p9, 6, 1 }
  0x3b   : > { %483 = vmatpush1.bf16.msra.mxu0 %v2396_v31  ;;  %524 = vmatpush1.bf16.msra.mxu1 %v2399_v32  ;;  %s1894_s29 = sshll.u32 %s1181_s28, 3 }
  0x3c   : > { %484 = vmatprep.subr.bf16.mxu0 %v2404_v33  ;;  %525 = vmatprep.subr.bf16.mxu1 %v2407_v34  ;;  %s1184_s30 = scalar_lea.vmem %s2481_s9, %s1894_s29 [#allocation2]  ;;  %s1895_s6 = sshll.u32 %s1324_s5, 3 }
  0x3d   : > { %s1327_s7 = scalar_lea.vmem %s2481_s9, %s1895_s6 [#allocation2] }
  0x3e   : > { %s1467_s12 = scalar_select %p306_p9, 7, 0 }
  0x3f   : > { %485 = vmatpush1.bf16.msra.mxu0 %v2412_v35  ;;  %526 = vmatpush1.bf16.msra.mxu1 %v2415_v36 }
  0x40   : > { %486 = vmatprep.subr.bf16.mxu0 %v2420_v37  ;;  %527 = vmatprep.subr.bf16.mxu1 %v2423_v38 }
  0x43   : > { %487 = vmatpush1.bf16.msra.mxu0 %v2428_v39  ;;  %528 = vmatpush1.bf16.msra.mxu1 %v2431_v40 }
  0x44   : > { %615 = vmatprep.subr.bf16.mxu0 %v2310_v9  ;;  %656 = vmatprep.subr.bf16.mxu1 %v2313_v10 }
  0x46   : > { %505 = vmatmul.mubr.bf16.vlgmr.msra.gmra.mrb[0].mxu0 %v2234_v8  ;;  %546 = vmatmul.mubr.bf16.vlgmr.msra.gmra.mrb[0].mxu1 %v2234_v8 }
  0x47   : > { %616 = vmatpush1.bf16.msra.mxu0 %v2317_v11  ;;  %657 = vmatpush1.bf16.msra.mxu1 %v2320_v12 }
  0x48   : > { %617 = vmatprep.subr.bf16.mxu0 %v2324_v13  ;;  %658 = vmatprep.subr.bf16.mxu1 %v2329_v14 }
  0x49   : > { %647 = vmatprep.mubr.bf16.mxu0 %v2234_v8  ;;  %688 = vmatprep.mubr.bf16.mxu1 %v2234_v8 }
  0x4b   : > { %618 = vmatpush1.bf16.msra.mxu0 %v2332_v15  ;;  %659 = vmatpush1.bf16.msra.mxu1 %v2336_v16 }
  0x4c   : > { %619 = vmatprep.subr.bf16.mxu0 %v2340_v17  ;;  %660 = vmatprep.subr.bf16.mxu1 %v2343_v18 }
  0x4f   : > { %620 = vmatpush1.bf16.msra.mxu0 %v2346_v19  ;;  %661 = vmatpush1.bf16.msra.mxu1 %v2349_v20 }
  0x50   : > { %621 = vmatprep.subr.bf16.mxu0 %v2354_v21  ;;  %662 = vmatprep.subr.bf16.mxu1 %v2359_v22 }
  0x53   : > { %622 = vmatpush1.bf16.msra.mxu0 %v2362_v23  ;;  %663 = vmatpush1.bf16.msra.mxu1 %v2367_v24 }
  0x54   : > { %623 = vmatprep.subr.bf16.mxu0 %v2370_v25  ;;  %664 = vmatprep.subr.bf16.mxu1 %v2375_v26 }
  0x57   : > { %624 = vmatpush1.bf16.msra.mxu0 %v2378_v27  ;;  %665 = vmatpush1.bf16.msra.mxu1 %v2381_v28 }
  0x58   : > { %625 = vmatprep.subr.bf16.mxu0 %v2386_v29  ;;  %666 = vmatprep.subr.bf16.mxu1 %v2391_v30 }
  0x5b   : > { %626 = vmatpush1.bf16.msra.mxu0 %v2396_v31  ;;  %667 = vmatpush1.bf16.msra.mxu1 %v2399_v32 }
  0x5c   : > { %627 = vmatprep.subr.bf16.mxu0 %v2404_v33  ;;  %668 = vmatprep.subr.bf16.mxu1 %v2407_v34 }
  0x5f   : > { %628 = vmatpush1.bf16.msra.mxu0 %v2412_v35  ;;  %669 = vmatpush1.bf16.msra.mxu1 %v2415_v36 }
  0x60   : > { %629 = vmatprep.subr.bf16.mxu0 %v2420_v37  ;;  %670 = vmatprep.subr.bf16.mxu1 %v2423_v38 }
  0x63   : > { %630 = vmatpush1.bf16.msra.mxu0 %v2428_v39  ;;  %671 = vmatpush1.bf16.msra.mxu1 %v2431_v40 }
  0x64   : > { %758 = vmatprep.subr.bf16.mxu0 %v2310_v9  ;;  %799 = vmatprep.subr.bf16.mxu1 %v2313_v10 }
 0x119   : > { %v506_v46 = vpop.f32.mrb[0].mxu0  ;;  %v547_v47 = vpop.f32.mrb[0].mxu1 }
 0x11a   : > { %v508_v49 = vpop.f32.mrb[1].mxu0  ;;  %v549_v50 = vpop.f32.mrb[1].mxu1 }
 0x11b   : > { %v558_v51 = vcombine.low %v506_v46, %v508_v49  ;;  %v559_v52 = vcombine.low %v547_v47, %v549_v50  ;;  %v510_v53 = vpop.f32.mrb[2].mxu0  ;;  %v551_v54 = vpop.f32.mrb[2].mxu1 }
 0x11c   : > { %v511_v55 = vpop.f32.mrb[3].mxu0  ;;  %v552_v56 = vpop.f32.mrb[3].mxu1 }
 0x11d   : > { %v566_v57 = vrot.slane %v558_v51, %v2479_v48  ;;  %v573_v58 = vrot.slane %v559_v52, %v2479_v48 }
 0x11f   : > { %v574_v60 = vcombine.low %v566_v57, %v573_v58 }
 0x121   : > { %v576_v61 = vadd.f32 %v574_v60, %v311_v59 }
 0x123   : > { %v1846_v62 = vmul.f32 -1.442695, %v576_v61  ;;  %v584_v63 = vrot.slane %v576_v61, 2  ;;  %v595_v1 = vrot.slane %v576_v61, 6  ;;  %v592_v4 = vrot.slane %v576_v61, 4 }
 0x125   : > { %2050 = vpow2.f32 %v1846_v62  ;;  %v1847_v0 = vmul.f32 -1.442695, %v584_v63  ;;  %v1848_v2 = vmul.f32 -1.442695, %v595_v1 }
 0x127   : > { %2052 = vpow2.f32 %v1847_v0 }
 0x128   : > { %2054 = vpow2.f32 %v1848_v2  ;;  %v613_v2 = vld [vmem:[%s612_s14] sm:$0xff]  ;;  %s1896_s14 = sshll.u32 %s1467_s12, 3 }
 0x129   : > { %s1470_s17 = scalar_lea.vmem %s2481_s9, %s1896_s14 [#allocation2] }
 0x12f   : > { %v2051_v3 = vpop.eup %2050 }
 0x130   : > { %v580_v5 = vadd.f32 1.0, %v2051_v3 }
 0x131   : > { %v2053_v6 = vpop.eup %2052 }
 0x132   : > { %2056 = vrcp.f32 %v580_v5  ;;  %v589_v7 = vadd.f32 1.0, %v2053_v6  ;;  %v2055_v41 = vpop.eup %2054 }
 0x133   : > { %2058 = vtanh.f32 %v592_v4  ;;  %v600_v45 = vadd.f32 1.0, %v2055_v41 }
 0x134   : > { %2060 = vrcp.f32 %v589_v7 }
 0x135   : > { %2062 = vrcp.f32 %v600_v45 }
 0x13c   : > { %v2057_v42 = vpop.eup %2056 }
 0x13d   : > { %v2059_v43 = vpop.eup %2058 }
 0x13e   : > { %v2061_v44 = vpop.eup %2060  ;;  %v604_v47 = vmul.f32 %v2059_v43, %v2057_v42 }
 0x13f   : > { %v603_v46 = vmul.f32 0.0, %v2061_v44  ;;  %v2063_v50 = vpop.eup %2062 }
 0x141   : > { %v2486_v49 = vadd.f32 %v604_v47, %v603_v46 }
 0x143   : > { %2064 = vtanh.f32 %v2486_v49 }
 0x14d   : > { %v2065_v51 = vpop.eup %2064 }
 0x14e   : > { %v2489_v52 = vmul.f32 %v2065_v51, %v2063_v50 }
 0x150   : > { %v614_v53 = vpack.c.bf16 %v2489_v52, %v2489_v52 }
 0x152   : > { %648 = vmatmul.mubr.bf16.vlgmr.msra.gmra.mrb[4].mxu0 %v614_v53  ;;  %689 = vmatmul.mubr.bf16.vlgmr.msra.gmra.mrb[4].mxu1 %v614_v53 }
 0x153   : > { %759 = vmatpush1.bf16.msra.mxu0 %v2317_v11  ;;  %800 = vmatpush1.bf16.msra.mxu1 %v2320_v12 }
 0x154   : > { %760 = vmatprep.subr.bf16.mxu0 %v2324_v13  ;;  %801 = vmatprep.subr.bf16.mxu1 %v2329_v14 }
 0x155   : > { %790 = vmatprep.mubr.bf16.mxu0 %v2234_v8  ;;  %831 = vmatprep.mubr.bf16.mxu1 %v2234_v8 }
 0x157   : > { %761 = vmatpush1.bf16.msra.mxu0 %v2332_v15  ;;  %802 = vmatpush1.bf16.msra.mxu1 %v2336_v16 }
 0x158   : > { %762 = vmatprep.subr.bf16.mxu0 %v2340_v17  ;;  %803 = vmatprep.subr.bf16.mxu1 %v2343_v18 }
 0x15b   : > { %763 = vmatpush1.bf16.msra.mxu0 %v2346_v19  ;;  %804 = vmatpush1.bf16.msra.mxu1 %v2349_v20 }
 0x15c   : > { %764 = vmatprep.subr.bf16.mxu0 %v2354_v21  ;;  %805 = vmatprep.subr.bf16.mxu1 %v2359_v22 }
 0x15f   : > { %765 = vmatpush1.bf16.msra.mxu0 %v2362_v23  ;;  %806 = vmatpush1.bf16.msra.mxu1 %v2367_v24 }
 0x160   : > { %766 = vmatprep.subr.bf16.mxu0 %v2370_v25  ;;  %807 = vmatprep.subr.bf16.mxu1 %v2375_v26 }
 0x163   : > { %767 = vmatpush1.bf16.msra.mxu0 %v2378_v27  ;;  %808 = vmatpush1.bf16.msra.mxu1 %v2381_v28 }
 0x164   : > { %768 = vmatprep.subr.bf16.mxu0 %v2386_v29  ;;  %809 = vmatprep.subr.bf16.mxu1 %v2391_v30 }
 0x167   : > { %769 = vmatpush1.bf16.msra.mxu0 %v2396_v31  ;;  %810 = vmatpush1.bf16.msra.mxu1 %v2399_v32 }
 0x168   : > { %770 = vmatprep.subr.bf16.mxu0 %v2404_v33  ;;  %811 = vmatprep.subr.bf16.mxu1 %v2407_v34 }
 0x16b   : > { %771 = vmatpush1.bf16.msra.mxu0 %v2412_v35  ;;  %812 = vmatpush1.bf16.msra.mxu1 %v2415_v36 }
 0x16c   : > { %772 = vmatprep.subr.bf16.mxu0 %v2420_v37  ;;  %813 = vmatprep.subr.bf16.mxu1 %v2423_v38 }
 0x16f   : > { %773 = vmatpush1.bf16.msra.mxu0 %v2428_v39  ;;  %814 = vmatpush1.bf16.msra.mxu1 %v2431_v40 }
 0x170   : > { %901 = vmatprep.subr.bf16.mxu0 %v2310_v9  ;;  %942 = vmatprep.subr.bf16.mxu1 %v2313_v10 }
 0x225   : > { %v649_v54 = vpop.f32.mrb[4].mxu0  ;;  %v690_v55 = vpop.f32.mrb[4].mxu1 }
 0x226   : > { %v651_v56 = vpop.f32.mrb[5].mxu0  ;;  %v692_v57 = vpop.f32.mrb[5].mxu1 }
 0x227   : > { %v701_v58 = vcombine.low %v649_v54, %v651_v56  ;;  %v702_v59 = vcombine.low %v690_v55, %v692_v57  ;;  %v653_v60 = vpop.f32.mrb[6].mxu0  ;;  %v694_v61 = vpop.f32.mrb[6].mxu1 }
 0x228   : > { %v654_v62 = vpop.f32.mrb[7].mxu0  ;;  %v695_v63 = vpop.f32.mrb[7].mxu1 }
 0x229   : > { %v709_v0 = vrot.slane %v701_v58, %v2479_v48  ;;  %v716_v1 = vrot.slane %v702_v59, %v2479_v48 }
 0x22b   : > { %v717_v3 = vcombine.low %v709_v0, %v716_v1 }
 0x22d   : > { %v719_v4 = vadd.f32 %v717_v3, %v613_v2 }
 0x22f   : > { %v1851_v5 = vmul.f32 -1.442695, %v719_v4  ;;  %v727_v6 = vrot.slane %v719_v4, 2  ;;  %v738_v41 = vrot.slane %v719_v4, 6  ;;  %v735_v44 = vrot.slane %v719_v4, 4 }
 0x231   : > { %2066 = vpow2.f32 %v1851_v5  ;;  %v1852_v7 = vmul.f32 -1.442695, %v727_v6  ;;  %v1853_v42 = vmul.f32 -1.442695, %v738_v41 }
 0x233   : > { %2068 = vpow2.f32 %v1852_v7 }
 0x234   : > { %2070 = vpow2.f32 %v1853_v42 }
 0x23b   : > { %v2067_v43 = vpop.eup %2066 }
 0x23c   : > { %v723_v45 = vadd.f32 1.0, %v2067_v43  ;;  %v756_v43 = vld [vmem:[%s755_s20] sm:$0xff]  ;;  %s272_s20 = scalar_lea.vmem %s2848_s3, %s1811_s15 }
 0x23d   : > { %v2069_v46 = vpop.eup %2068 }
 0x23e   : > { %2072 = vrcp.f32 %v723_v45  ;;  %v732_v47 = vadd.f32 1.0, %v2069_v46  ;;  %v2071_v50 = vpop.eup %2070 }
 0x23f   : > { %2074 = vtanh.f32 %v735_v44  ;;  %v743_v55 = vadd.f32 1.0, %v2071_v50 }
 0x240   : > { %2076 = vrcp.f32 %v732_v47 }
 0x241   : > { %2078 = vrcp.f32 %v743_v55 }
 0x248   : > { %v2073_v51 = vpop.eup %2072 }
 0x249   : > { %v2075_v53 = vpop.eup %2074 }
 0x24a   : > { %v2077_v54 = vpop.eup %2076  ;;  %v747_v57 = vmul.f32 %v2075_v53, %v2073_v51 }
 0x24b   : > { %v746_v56 = vmul.f32 %v2077_v54, %v2486_v49  ;;  %v2079_v59 = vpop.eup %2078 }
 0x24d   : > { %v2533_v58 = vadd.f32 %v747_v57, %v746_v56 }
 0x24f   : > { %2080 = vtanh.f32 %v2533_v58 }
 0x259   : > { %v2081_v60 = vpop.eup %2080 }
 0x25a   : > { %v2536_v61 = vmul.f32 %v2081_v60, %v2079_v59 }
 0x25c   : > { %v757_v62 = vpack.c.bf16 %v2536_v61, %v2536_v61 }
 0x25e   : > { %791 = vmatmul.mubr.bf16.vlgmr.msra.gmra.mrb[8].mxu0 %v757_v62  ;;  %832 = vmatmul.mubr.bf16.vlgmr.msra.gmra.mrb[8].mxu1 %v757_v62 }
 0x25f   : > { %902 = vmatpush1.bf16.msra.mxu0 %v2317_v11  ;;  %943 = vmatpush1.bf16.msra.mxu1 %v2320_v12 }
 0x260   : > { %903 = vmatprep.subr.bf16.mxu0 %v2324_v13  ;;  %944 = vmatprep.subr.bf16.mxu1 %v2329_v14 }
 0x261   : > { %933 = vmatprep.mubr.bf16.mxu0 %v2234_v8  ;;  %974 = vmatprep.mubr.bf16.mxu1 %v2234_v8 }
 0x263   : > { %904 = vmatpush1.bf16.msra.mxu0 %v2332_v15  ;;  %945 = vmatpush1.bf16.msra.mxu1 %v2336_v16 }
 0x264   : > { %905 = vmatprep.subr.bf16.mxu0 %v2340_v17  ;;  %946 = vmatprep.subr.bf16.mxu1 %v2343_v18 }
 0x267   : > { %906 = vmatpush1.bf16.msra.mxu0 %v2346_v19  ;;  %947 = vmatpush1.bf16.msra.mxu1 %v2349_v20 }
 0x268   : > { %907 = vmatprep.subr.bf16.mxu0 %v2354_v21  ;;  %948 = vmatprep.subr.bf16.mxu1 %v2359_v22 }
 0x26b   : > { %908 = vmatpush1.bf16.msra.mxu0 %v2362_v23  ;;  %949 = vmatpush1.bf16.msra.mxu1 %v2367_v24 }
 0x26c   : > { %909 = vmatprep.subr.bf16.mxu0 %v2370_v25  ;;  %950 = vmatprep.subr.bf16.mxu1 %v2375_v26 }
 0x26f   : > { %910 = vmatpush1.bf16.msra.mxu0 %v2378_v27  ;;  %951 = vmatpush1.bf16.msra.mxu1 %v2381_v28 }
 0x270   : > { %911 = vmatprep.subr.bf16.mxu0 %v2386_v29  ;;  %952 = vmatprep.subr.bf16.mxu1 %v2391_v30 }
 0x273   : > { %912 = vmatpush1.bf16.msra.mxu0 %v2396_v31  ;;  %953 = vmatpush1.bf16.msra.mxu1 %v2399_v32 }
 0x274   : > { %913 = vmatprep.subr.bf16.mxu0 %v2404_v33  ;;  %954 = vmatprep.subr.bf16.mxu1 %v2407_v34 }
 0x277   : > { %914 = vmatpush1.bf16.msra.mxu0 %v2412_v35  ;;  %955 = vmatpush1.bf16.msra.mxu1 %v2415_v36 }
 0x278   : > { %915 = vmatprep.subr.bf16.mxu0 %v2420_v37  ;;  %956 = vmatprep.subr.bf16.mxu1 %v2423_v38 }
 0x27b   : > { %916 = vmatpush1.bf16.msra.mxu0 %v2428_v39  ;;  %957 = vmatpush1.bf16.msra.mxu1 %v2431_v40 }
 0x27c   : > { %1044 = vmatprep.subr.bf16.mxu0 %v2310_v9  ;;  %1085 = vmatprep.subr.bf16.mxu1 %v2313_v10 }
 0x331   : > { %v792_v49 = vpop.f32.mrb[8].mxu0  ;;  %v833_v63 = vpop.f32.mrb[8].mxu1 }
 0x332   : > { %v794_v0 = vpop.f32.mrb[9].mxu0  ;;  %v835_v1 = vpop.f32.mrb[9].mxu1 }
 0x333   : > { %v844_v2 = vcombine.low %v792_v49, %v794_v0  ;;  %v845_v3 = vcombine.low %v833_v63, %v835_v1  ;;  %v796_v4 = vpop.f32.mrb[10].mxu0  ;;  %v837_v5 = vpop.f32.mrb[10].mxu1 }
 0x334   : > { %v797_v6 = vpop.f32.mrb[11].mxu0  ;;  %v838_v7 = vpop.f32.mrb[11].mxu1 }
 0x335   : > { %v852_v41 = vrot.slane %v844_v2, %v2479_v48  ;;  %v859_v42 = vrot.slane %v845_v3, %v2479_v48  ;;  %v751_v6 = vadd.f32 %v2536_v61, %v2489_v52 }
 0x337   : > { %v860_v44 = vcombine.low %v852_v41, %v859_v42 }
 0x339   : > { %v862_v45 = vadd.f32 %v860_v44, %v756_v43 }
 0x33b   : > { %v1856_v46 = vmul.f32 -1.442695, %v862_v45  ;;  %v870_v47 = vrot.slane %v862_v45, 2  ;;  %v881_v51 = vrot.slane %v862_v45, 6  ;;  %v878_v55 = vrot.slane %v862_v45, 4 }
 0x33d   : > { %2082 = vpow2.f32 %v1856_v46  ;;  %v1857_v50 = vmul.f32 -1.442695, %v870_v47  ;;  %v1858_v53 = vmul.f32 -1.442695, %v881_v51 }
 0x33f   : > { %2084 = vpow2.f32 %v1857_v50 }
 0x340   : > { %2086 = vpow2.f32 %v1858_v53 }
 0x347   : > { %v2083_v54 = vpop.eup %2082 }
 0x348   : > { %v866_v56 = vadd.f32 1.0, %v2083_v54 }
 0x349   : > { %v2085_v57 = vpop.eup %2084 }
 0x34a   : > { %2088 = vrcp.f32 %v866_v56  ;;  %v875_v59 = vadd.f32 1.0, %v2085_v57  ;;  %v2087_v60 = vpop.eup %2086 }
 0x34b   : > { %2090 = vtanh.f32 %v878_v55  ;;  %v886_v0 = vadd.f32 1.0, %v2087_v60  ;;  %v899_v55 = vld [vmem:[%s898_s23] sm:$0xff] }
 0x34c   : > { %2092 = vrcp.f32 %v875_v59 }
 0x34d   : > { %2094 = vrcp.f32 %v886_v0 }
 0x354   : > { %v2089_v62 = vpop.eup %2088 }
 0x355   : > { %v2091_v49 = vpop.eup %2090 }
 0x356   : > { %v2093_v63 = vpop.eup %2092  ;;  %v890_v2 = vmul.f32 %v2091_v49, %v2089_v62 }
 0x357   : > { %v889_v1 = vmul.f32 %v2093_v63, %v2533_v58  ;;  %v2095_v4 = vpop.eup %2094 }
 0x359   : > { %v2580_v3 = vadd.f32 %v890_v2, %v889_v1 }
 0x35b   : > { %2096 = vtanh.f32 %v2580_v3 }
 0x365   : > { %v2097_v5 = vpop.eup %2096 }
 0x366   : > { %v893_v7 = vmul.f32 %v2097_v5, %v2095_v4 }
 0x368   : > { %v2585_v41 = vadd.f32 %v893_v7, %v751_v6  ;;  %v900_v42 = vpack.c.bf16 %v893_v7, %v893_v7 }
 0x36a   : > { %934 = vmatmul.mubr.bf16.vlgmr.msra.gmra.mrb[12].mxu0 %v900_v42  ;;  %975 = vmatmul.mubr.bf16.vlgmr.msra.gmra.mrb[12].mxu1 %v900_v42 }
 0x36b   : > { %1045 = vmatpush1.bf16.msra.mxu0 %v2317_v11  ;;  %1086 = vmatpush1.bf16.msra.mxu1 %v2320_v12 }
 0x36c   : > { %1046 = vmatprep.subr.bf16.mxu0 %v2324_v13  ;;  %1087 = vmatprep.subr.bf16.mxu1 %v2329_v14 }
 0x36d   : > { %1076 = vmatprep.mubr.bf16.mxu0 %v2234_v8  ;;  %1117 = vmatprep.mubr.bf16.mxu1 %v2234_v8 }
 0x36f   : > { %1047 = vmatpush1.bf16.msra.mxu0 %v2332_v15  ;;  %1088 = vmatpush1.bf16.msra.mxu1 %v2336_v16 }
 0x370   : > { %1048 = vmatprep.subr.bf16.mxu0 %v2340_v17  ;;  %1089 = vmatprep.subr.bf16.mxu1 %v2343_v18 }
 0x373   : > { %1049 = vmatpush1.bf16.msra.mxu0 %v2346_v19  ;;  %1090 = vmatpush1.bf16.msra.mxu1 %v2349_v20 }
 0x374   : > { %1050 = vmatprep.subr.bf16.mxu0 %v2354_v21  ;;  %1091 = vmatprep.subr.bf16.mxu1 %v2359_v22 }
 0x377   : > { %1051 = vmatpush1.bf16.msra.mxu0 %v2362_v23  ;;  %1092 = vmatpush1.bf16.msra.mxu1 %v2367_v24 }
 0x378   : > { %1052 = vmatprep.subr.bf16.mxu0 %v2370_v25  ;;  %1093 = vmatprep.subr.bf16.mxu1 %v2375_v26 }
 0x37b   : > { %1053 = vmatpush1.bf16.msra.mxu0 %v2378_v27  ;;  %1094 = vmatpush1.bf16.msra.mxu1 %v2381_v28 }
 0x37c   : > { %1054 = vmatprep.subr.bf16.mxu0 %v2386_v29  ;;  %1095 = vmatprep.subr.bf16.mxu1 %v2391_v30 }
 0x37f   : > { %1055 = vmatpush1.bf16.msra.mxu0 %v2396_v31  ;;  %1096 = vmatpush1.bf16.msra.mxu1 %v2399_v32 }
 0x380   : > { %1056 = vmatprep.subr.bf16.mxu0 %v2404_v33  ;;  %1097 = vmatprep.subr.bf16.mxu1 %v2407_v34 }
 0x383   : > { %1057 = vmatpush1.bf16.msra.mxu0 %v2412_v35  ;;  %1098 = vmatpush1.bf16.msra.mxu1 %v2415_v36 }
 0x384   : > { %1058 = vmatprep.subr.bf16.mxu0 %v2420_v37  ;;  %1099 = vmatprep.subr.bf16.mxu1 %v2423_v38 }
 0x387   : > { %1059 = vmatpush1.bf16.msra.mxu0 %v2428_v39  ;;  %1100 = vmatpush1.bf16.msra.mxu1 %v2431_v40 }
 0x388   : > { %1187 = vmatprep.subr.bf16.mxu0 %v2310_v9  ;;  %1228 = vmatprep.subr.bf16.mxu1 %v2313_v10 }
 0x43d   : > { %v935_v52 = vpop.f32.mrb[12].mxu0  ;;  %v976_v58 = vpop.f32.mrb[12].mxu1 }
 0x43e   : > { %v937_v61 = vpop.f32.mrb[13].mxu0  ;;  %v978_v43 = vpop.f32.mrb[13].mxu1 }
 0x43f   : > { %v987_v44 = vcombine.low %v935_v52, %v937_v61  ;;  %v988_v45 = vcombine.low %v976_v58, %v978_v43  ;;  %v939_v46 = vpop.f32.mrb[14].mxu0  ;;  %v980_v47 = vpop.f32.mrb[14].mxu1 }
 0x440   : > { %v940_v50 = vpop.f32.mrb[15].mxu0  ;;  %v981_v51 = vpop.f32.mrb[15].mxu1 }
 0x441   : > { %v995_v53 = vrot.slane %v987_v44, %v2479_v48  ;;  %v1002_v54 = vrot.slane %v988_v45, %v2479_v48 }
 0x443   : > { %v1003_v56 = vcombine.low %v995_v53, %v1002_v54 }
 0x445   : > { %v1005_v57 = vadd.f32 %v1003_v56, %v899_v55 }
 0x447   : > { %v1861_v59 = vmul.f32 -1.442695, %v1005_v57  ;;  %v1013_v60 = vrot.slane %v1005_v57, 2  ;;  %v1024_v49 = vrot.slane %v1005_v57, 6  ;;  %v1021_v1 = vrot.slane %v1005_v57, 4 }
 0x449   : > { %2098 = vpow2.f32 %v1861_v59  ;;  %v1862_v62 = vmul.f32 -1.442695, %v1013_v60  ;;  %v1863_v63 = vmul.f32 -1.442695, %v1024_v49 }
 0x44b   : > { %2100 = vpow2.f32 %v1862_v62 }
 0x44c   : > { %2102 = vpow2.f32 %v1863_v63 }
 0x453   : > { %v2099_v0 = vpop.eup %2098 }
 0x454   : > { %v1009_v2 = vadd.f32 1.0, %v2099_v0 }
 0x455   : > { %v2101_v4 = vpop.eup %2100 }
 0x456   : > { %2104 = vrcp.f32 %v1009_v2  ;;  %v1018_v5 = vadd.f32 1.0, %v2101_v4  ;;  %v2103_v6 = vpop.eup %2102 }
 0x457   : > { %2106 = vtanh.f32 %v1021_v1  ;;  %v1029_v58 = vadd.f32 1.0, %v2103_v6 }
 0x458   : > { %2108 = vrcp.f32 %v1018_v5 }
 0x459   : > { %2110 = vrcp.f32 %v1029_v58 }
 0x460   : > { %v2105_v7 = vpop.eup %2104 }
 0x461   : > { %v2107_v42 = vpop.eup %2106 }
 0x462   : > { %v2109_v52 = vpop.eup %2108  ;;  %v1033_v43 = vmul.f32 %v2107_v42, %v2105_v7 }
 0x463   : > { %v1032_v61 = vmul.f32 %v2109_v52, %v2580_v3  ;;  %v2111_v45 = vpop.eup %2110  ;;  %v1042_v3 = vld [vmem:[%s1041_s26] sm:$0xff] }
 0x465   : > { %v2627_v44 = vadd.f32 %v1033_v43, %v1032_v61 }
 0x467   : > { %2112 = vtanh.f32 %v2627_v44 }
 0x471   : > { %v2113_v46 = vpop.eup %2112 }
 0x472   : > { %v1036_v47 = vmul.f32 %v2113_v46, %v2111_v45  ;;  %v2684_v46 = vld [vmem:[%s2307_s4 + $0x8] ss:$16 sps:$4 sm:$0xff]  }
 0x474   : > { %v2631_v50 = vadd.f32 %v1036_v47, %v2585_v41  ;;  %v1043_v51 = vpack.c.bf16 %v1036_v47, %v1036_v47  ;;  %v2688_v47 = vld [vmem:[%s2307_s4 + $0x24] ss:$16 sps:$4 sm:$0xff]  }
 0x476   : > { %1077 = vmatmul.mubr.bf16.vlgmr.msra.gmra.mrb[16].mxu0 %v1043_v51  ;;  %1118 = vmatmul.mubr.bf16.vlgmr.msra.gmra.mrb[16].mxu1 %v1043_v51  ;;  %v2698_v51 = vld [vmem:[%s2307_s4 + $0x20] ss:$16 sps:$4 sm:$0xff]  }
 0x477   : > { %1188 = vmatpush1.bf16.msra.mxu0 %v2317_v11  ;;  %1229 = vmatpush1.bf16.msra.mxu1 %v2320_v12 }
 0x478   : > { %1189 = vmatprep.subr.bf16.mxu0 %v2324_v13  ;;  %1230 = vmatprep.subr.bf16.mxu1 %v2329_v14 }
 0x479   : > { %1219 = vmatprep.mubr.bf16.mxu0 %v2234_v8  ;;  %1260 = vmatprep.mubr.bf16.mxu1 %v2234_v8 }
 0x47b   : > { %1190 = vmatpush1.bf16.msra.mxu0 %v2332_v15  ;;  %1231 = vmatpush1.bf16.msra.mxu1 %v2336_v16 }
 0x47c   : > { %1191 = vmatprep.subr.bf16.mxu0 %v2340_v17  ;;  %1232 = vmatprep.subr.bf16.mxu1 %v2343_v18 }
 0x47f   : > { %1192 = vmatpush1.bf16.msra.mxu0 %v2346_v19  ;;  %1233 = vmatpush1.bf16.msra.mxu1 %v2349_v20 }
 0x480   : > { %1193 = vmatprep.subr.bf16.mxu0 %v2354_v21  ;;  %1234 = vmatprep.subr.bf16.mxu1 %v2359_v22 }
 0x483   : > { %1194 = vmatpush1.bf16.msra.mxu0 %v2362_v23  ;;  %1235 = vmatpush1.bf16.msra.mxu1 %v2367_v24 }
 0x484   : > { %1195 = vmatprep.subr.bf16.mxu0 %v2370_v25  ;;  %1236 = vmatprep.subr.bf16.mxu1 %v2375_v26 }
 0x487   : > { %1196 = vmatpush1.bf16.msra.mxu0 %v2378_v27  ;;  %1237 = vmatpush1.bf16.msra.mxu1 %v2381_v28 }
 0x488   : > { %1197 = vmatprep.subr.bf16.mxu0 %v2386_v29  ;;  %1238 = vmatprep.subr.bf16.mxu1 %v2391_v30 }
 0x48b   : > { %1198 = vmatpush1.bf16.msra.mxu0 %v2396_v31  ;;  %1239 = vmatpush1.bf16.msra.mxu1 %v2399_v32 }
 0x48c   : > { %1199 = vmatprep.subr.bf16.mxu0 %v2404_v33  ;;  %1240 = vmatprep.subr.bf16.mxu1 %v2407_v34 }
 0x48f   : > { %1200 = vmatpush1.bf16.msra.mxu0 %v2412_v35  ;;  %1241 = vmatpush1.bf16.msra.mxu1 %v2415_v36 }
 0x490   : > { %1201 = vmatprep.subr.bf16.mxu0 %v2420_v37  ;;  %1242 = vmatprep.subr.bf16.mxu1 %v2423_v38 }
 0x493   : > { %1202 = vmatpush1.bf16.msra.mxu0 %v2428_v39  ;;  %1243 = vmatpush1.bf16.msra.mxu1 %v2431_v40 }
 0x494   : > { %1330 = vmatprep.subr.bf16.mxu0 %v2310_v9  ;;  %1371 = vmatprep.subr.bf16.mxu1 %v2313_v10 }
 0x549   : > { %v1078_v11 = vpop.f32.mrb[16].mxu0  ;;  %v1119_v12 = vpop.f32.mrb[16].mxu1 }
 0x54a   : > { %v1080_v13 = vpop.f32.mrb[17].mxu0  ;;  %v1121_v14 = vpop.f32.mrb[17].mxu1 }
 0x54b   : > { %v1130_v15 = vcombine.low %v1078_v11, %v1080_v13  ;;  %v1131_v16 = vcombine.low %v1119_v12, %v1121_v14  ;;  %v1082_v17 = vpop.f32.mrb[18].mxu0  ;;  %v1123_v18 = vpop.f32.mrb[18].mxu1  ;;  %v2702_v11 = vld [vmem:[%s2307_s4 + $0x28] ss:$16 sps:$4 sm:$0xff]   ;;  %v2706_v12 = vld [vmem:[%s2307_s4 + $0x44] ss:$16 sps:$4 sm:$0xff]  }
 0x54c   : > { %v1083_v19 = vpop.f32.mrb[19].mxu0  ;;  %v1124_v20 = vpop.f32.mrb[19].mxu1  ;;  %v2710_v13 = vld [vmem:[%s2307_s4 + $0x4c] ss:$16 sps:$4 sm:$0xff]   ;;  %v2714_v14 = vld [vmem:[%s2307_s4 + $0x40] ss:$16 sps:$4 sm:$0xff]  }
 0x54d   : > { %v1138_v21 = vrot.slane %v1130_v15, %v2479_v48  ;;  %v1145_v9 = vrot.slane %v1131_v16, %v2479_v48  ;;  %v2718_v15 = vld [vmem:[%s2307_s4 + $0x48] ss:$16 sps:$4 sm:$0xff]   ;;  %v2722_v16 = vld [vmem:[%s2307_s4 + $0x64] ss:$16 sps:$4 sm:$0xff]  }
 0x54f   : > { %v1146_v10 = vcombine.low %v1138_v21, %v1145_v9 }
 0x551   : > { %v1148_v41 = vadd.f32 %v1146_v10, %v1042_v3 }
 0x553   : > { %v1866_v53 = vmul.f32 -1.442695, %v1148_v41  ;;  %v1156_v54 = vrot.slane %v1148_v41, 2  ;;  %v1167_v56 = vrot.slane %v1148_v41, 6  ;;  %v1164_v60 = vrot.slane %v1148_v41, 4 }
 0x555   : > { %2114 = vpow2.f32 %v1866_v53  ;;  %v1867_v55 = vmul.f32 -1.442695, %v1156_v54  ;;  %v1868_v57 = vmul.f32 -1.442695, %v1167_v56 }
 0x557   : > { %2116 = vpow2.f32 %v1867_v55 }
 0x558   : > { %2118 = vpow2.f32 %v1868_v57 }
 0x55f   : > { %v2115_v59 = vpop.eup %2114 }
 0x560   : > { %v1152_v62 = vadd.f32 1.0, %v2115_v59 }
 0x561   : > { %v2117_v49 = vpop.eup %2116 }
 0x562   : > { %2120 = vrcp.f32 %v1152_v62  ;;  %v1161_v63 = vadd.f32 1.0, %v2117_v49  ;;  %v2119_v0 = vpop.eup %2118 }
 0x563   : > { %2122 = vtanh.f32 %v1164_v60  ;;  %v1172_v5 = vadd.f32 1.0, %v2119_v0 }
 0x564   : > { %2124 = vrcp.f32 %v1161_v63 }
 0x565   : > { %2126 = vrcp.f32 %v1172_v5  ;;  %v2194_v5 = vld [vmem:[%s2307_s4 + $0x84] ss:$16 sps:$4 sm:$0xff]  }
 0x56c   : > { %v2121_v1 = vpop.eup %2120 }
 0x56d   : > { %v2123_v2 = vpop.eup %2122 }
 0x56e   : > { %v2125_v4 = vpop.eup %2124  ;;  %v1176_v7 = vmul.f32 %v2123_v2, %v2121_v1  ;;  %v2191_v2 = vld [vmem:[%s2307_s4 + $0x6c] ss:$16 sps:$4 sm:$0xff]  }
 0x56f   : > { %v1175_v6 = vmul.f32 %v2125_v4, %v2627_v44  ;;  %v2127_v52 = vpop.eup %2126  ;;  %v2680_v44 = vld [vmem:[%s2307_s4] ss:$16 sps:$4 sm:$0xff]   ;;  %v2193_v4 = vld [vmem:[%s2307_s4 + $0x68] ss:$16 sps:$4 sm:$0xff]  }
 0x571   : > { %v2673_v42 = vadd.f32 %v1176_v7, %v1175_v6  ;;  %v2195_v6 = vld [vmem:[%s2307_s4 + $0x8c] ss:$16 sps:$4 sm:$0xff]   ;;  %v2196_v7 = vld [vmem:[%s2307_s4 + $0x80] ss:$16 sps:$4 sm:$0xff]  }
 0x573   : > { %2128 = vtanh.f32 %v2673_v42 }
 0x57d   : > { %v2129_v58 = vpop.eup %2128 }
 0x57e   : > { %v1179_v61 = vmul.f32 %v2129_v58, %v2127_v52  ;;  %v2198_v52 = vld [vmem:[%s2307_s4 + $0xa4] ss:$16 sps:$4 sm:$0xff]   ;;  %v2199_v58 = vld [vmem:[%s2307_s4 + $0xac] ss:$16 sps:$4 sm:$0xff]  }
 0x580   : > { %v2677_v43 = vadd.f32 %v1179_v61, %v2631_v50  ;;  %v1186_v45 = vpack.c.bf16 %v1179_v61, %v1179_v61  ;;  %v2692_v50 = vld [vmem:[%s2307_s4 + $0x2c] ss:$16 sps:$4 sm:$0xff]   ;;  %v2200_v61 = vld [vmem:[%s2307_s4 + $0xa0] ss:$16 sps:$4 sm:$0xff]  }
 0x582   : > { %1220 = vmatmul.mubr.bf16.vlgmr.msra.gmra.mrb[20].mxu0 %v1186_v45  ;;  %1261 = vmatmul.mubr.bf16.vlgmr.msra.gmra.mrb[20].mxu1 %v1186_v45  ;;  %v2202_v45 = vld [vmem:[%s2307_s4 + $0xc4] ss:$16 sps:$4 sm:$0xff]  }
 0x583   : > { %1331 = vmatpush1.bf16.msra.mxu0 %v2680_v44  ;;  %1372 = vmatpush1.bf16.msra.mxu1 %v2684_v46 }
 0x584   : > { %1332 = vmatprep.subr.bf16.mxu0 %v2688_v47  ;;  %1373 = vmatprep.subr.bf16.mxu1 %v2692_v50 }
 0x585   : > { %1362 = vmatprep.mubr.bf16.mxu0 %v2234_v8  ;;  %1403 = vmatprep.mubr.bf16.mxu1 %v2234_v8 }
 0x587   : > { %1333 = vmatpush1.bf16.msra.mxu0 %v2698_v51  ;;  %1374 = vmatpush1.bf16.msra.mxu1 %v2702_v11 }
 0x588   : > { %1334 = vmatprep.subr.bf16.mxu0 %v2706_v12  ;;  %1375 = vmatprep.subr.bf16.mxu1 %v2710_v13 }
 0x58b   : > { %1335 = vmatpush1.bf16.msra.mxu0 %v2714_v14  ;;  %1376 = vmatpush1.bf16.msra.mxu1 %v2718_v15 }
 0x58c   : > { %1336 = vmatprep.subr.bf16.mxu0 %v2722_v16  ;;  %1377 = vmatprep.subr.bf16.mxu1 %v2359_v22  ;;  %v2189_v22 = vld [vmem:[%s2307_s4 + $0x4] ss:$16 sps:$4 sm:$0xff]  }
 0x58f   : > { %1337 = vmatpush1.bf16.msra.mxu0 %v2362_v23  ;;  %1378 = vmatpush1.bf16.msra.mxu1 %v2367_v24  ;;  %v2190_v23 = vld [vmem:[%s2307_s4 + $0xc] ss:$16 sps:$4 sm:$0xff]  }
 0x590   : > { %1338 = vmatprep.subr.bf16.mxu0 %v2370_v25  ;;  %1379 = vmatprep.subr.bf16.mxu1 %v2375_v26 }
 0x593   : > { %1339 = vmatpush1.bf16.msra.mxu0 %v2378_v27  ;;  %1380 = vmatpush1.bf16.msra.mxu1 %v2381_v28 }
 0x594   : > { %1340 = vmatprep.subr.bf16.mxu0 %v2386_v29  ;;  %1381 = vmatprep.subr.bf16.mxu1 %v2391_v30 }
 0x597   : > { %1341 = vmatpush1.bf16.msra.mxu0 %v2396_v31  ;;  %1382 = vmatpush1.bf16.msra.mxu1 %v2399_v32 }
 0x598   : > { %1342 = vmatprep.subr.bf16.mxu0 %v2404_v33  ;;  %1383 = vmatprep.subr.bf16.mxu1 %v2407_v34 }
 0x59b   : > { %1343 = vmatpush1.bf16.msra.mxu0 %v2412_v35  ;;  %1384 = vmatpush1.bf16.msra.mxu1 %v2415_v36  ;;  %v1185_v36 = vld [vmem:[%s1184_s30] sm:$0xff] }
 0x59c   : > { %1344 = vmatprep.subr.bf16.mxu0 %v2420_v37  ;;  %1385 = vmatprep.subr.bf16.mxu1 %v2423_v38 }
 0x59f   : > { %1345 = vmatpush1.bf16.msra.mxu0 %v2428_v39  ;;  %1386 = vmatpush1.bf16.msra.mxu1 %v2431_v40 }
 0x5a0   : > { %1473 = vmatprep.subr.bf16.mxu0 %v2189_v22  ;;  %1514 = vmatprep.subr.bf16.mxu1 %v2190_v23 }
 0x655   : > { %v1221_v24 = vpop.f32.mrb[20].mxu0  ;;  %v1262_v25 = vpop.f32.mrb[20].mxu1 }
 0x656   : > { %v1223_v26 = vpop.f32.mrb[21].mxu0  ;;  %v1264_v27 = vpop.f32.mrb[21].mxu1 }
 0x657   : > { %v1273_v28 = vcombine.low %v1221_v24, %v1223_v26  ;;  %v1274_v29 = vcombine.low %v1262_v25, %v1264_v27  ;;  %v1225_v30 = vpop.f32.mrb[22].mxu0  ;;  %v1266_v31 = vpop.f32.mrb[22].mxu1 }
 0x658   : > { %v1226_v32 = vpop.f32.mrb[23].mxu0  ;;  %v1267_v33 = vpop.f32.mrb[23].mxu1  ;;  %v1328_v30 = vld [vmem:[%s1327_s7] sm:$0xff] }
 0x659   : > { %v1281_v34 = vrot.slane %v1273_v28, %v2479_v48  ;;  %v1288_v35 = vrot.slane %v1274_v29, %v2479_v48 }
 0x65b   : > { %v1289_v37 = vcombine.low %v1281_v34, %v1288_v35 }
 0x65d   : > { %v1291_v38 = vadd.f32 %v1289_v37, %v1185_v36 }
 0x65f   : > { %v1871_v39 = vmul.f32 -1.442695, %v1291_v38  ;;  %v1299_v40 = vrot.slane %v1291_v38, 2  ;;  %v1310_v18 = vrot.slane %v1291_v38, 6  ;;  %v1307_v21 = vrot.slane %v1291_v38, 4 }
 0x661   : > { %2130 = vpow2.f32 %v1871_v39  ;;  %v1872_v17 = vmul.f32 -1.442695, %v1299_v40  ;;  %v1873_v19 = vmul.f32 -1.442695, %v1310_v18 }
 0x663   : > { %2132 = vpow2.f32 %v1872_v17 }
 0x664   : > { %2134 = vpow2.f32 %v1873_v19 }
 0x66b   : > { %v2131_v20 = vpop.eup %2130 }
 0x66c   : > { %v1295_v9 = vadd.f32 1.0, %v2131_v20 }
 0x66d   : > { %v2133_v3 = vpop.eup %2132 }
 0x66e   : > { %2136 = vrcp.f32 %v1295_v9  ;;  %v1304_v10 = vadd.f32 1.0, %v2133_v3  ;;  %v2135_v41 = vpop.eup %2134 }
 0x66f   : > { %2138 = vtanh.f32 %v1307_v21  ;;  %v1315_v56 = vadd.f32 1.0, %v2135_v41 }
 0x670   : > { %2140 = vrcp.f32 %v1304_v10 }
 0x671   : > { %2142 = vrcp.f32 %v1315_v56 }
 0x678   : > { %v2137_v53 = vpop.eup %2136 }
 0x679   : > { %v2139_v54 = vpop.eup %2138 }
 0x67a   : > { %v2141_v55 = vpop.eup %2140  ;;  %v1319_v59 = vmul.f32 %v2139_v54, %v2137_v53 }
 0x67b   : > { %v1318_v57 = vmul.f32 %v2141_v55, %v2673_v42  ;;  %v2143_v62 = vpop.eup %2142  ;;  %v2197_v42 = vld [vmem:[%s2307_s4 + $0x88] ss:$16 sps:$4 sm:$0xff]  }
 0x67d   : > { %v2752_v60 = vadd.f32 %v1319_v59, %v1318_v57 }
 0x67f   : > { %2144 = vtanh.f32 %v2752_v60 }
 0x689   : > { %v2145_v49 = vpop.eup %2144 }
 0x68a   : > { %v1322_v63 = vmul.f32 %v2145_v49, %v2143_v62 }
 0x68c   : > { %v2756_v0 = vadd.f32 %v1322_v63, %v2677_v43  ;;  %v1329_v1 = vpack.c.bf16 %v1322_v63, %v1322_v63  ;;  %v2201_v43 = vld [vmem:[%s2307_s4 + $0xa8] ss:$16 sps:$4 sm:$0xff]   ;;  %v2236_v63 = vmov 0.0|0.0  }
 0x68e   : > { %1363 = vmatmul.mubr.bf16.vlgmr.msra.gmra.mrb[24].mxu0 %v1329_v1  ;;  %1404 = vmatmul.mubr.bf16.vlgmr.msra.gmra.mrb[24].mxu1 %v1329_v1 }
 0x68f   : > { %1474 = vmatpush1.bf16.msra.mxu0 %v2680_v44  ;;  %1515 = vmatpush1.bf16.msra.mxu1 %v2684_v46  ;;  %v2203_v44 = vld [vmem:[%s2307_s4 + $0xcc] ss:$16 sps:$4 sm:$0xff]   ;;  %v2204_v46 = vld [vmem:[%s2307_s4 + $0xc0] ss:$16 sps:$4 sm:$0xff]  }
 0x690   : > { %1475 = vmatprep.subr.bf16.mxu0 %v2688_v47  ;;  %1516 = vmatprep.subr.bf16.mxu1 %v2692_v50  ;;  %v2205_v47 = vld [vmem:[%s2307_s4 + $0xc8] ss:$16 sps:$4 sm:$0xff]   ;;  %v2206_v50 = vld [vmem:[%s2307_s4 + $0xe4] ss:$16 sps:$4 sm:$0xff]  }
 0x691   : > { %1505 = vmatprep.mubr.bf16.mxu0 %v2234_v8  ;;  %1546 = vmatprep.mubr.bf16.mxu1 %v2234_v8  ;;  %v2192_v8 = vld [vmem:[%s2307_s4 + $0x60] ss:$16 sps:$4 sm:$0xff]  }
 0x693   : > { %1476 = vmatpush1.bf16.msra.mxu0 %v2698_v51  ;;  %1517 = vmatpush1.bf16.msra.mxu1 %v2702_v11  ;;  %v2207_v51 = vld [vmem:[%s2307_s4 + $0xec] ss:$16 sps:$4 sm:$0xff]   ;;  %v2208_v11 = vld [vmem:[%s2307_s4 + $0xe0] ss:$16 sps:$4 sm:$0xff]  }
 0x694   : > { %1477 = vmatprep.subr.bf16.mxu0 %v2706_v12  ;;  %1518 = vmatprep.subr.bf16.mxu1 %v2710_v13  ;;  %v2209_v12 = vld [vmem:[%s2307_s4 + $0xe8] ss:$16 sps:$4 sm:$0xff]   ;;  %s1888_s4 = sshll.u32 %s2301_s27, 7 }
 0x695   : > { %s2806_s11 = scalar_lea.vmem %s2847_s2, %s1888_s4 }
 0x696   : > { %v1612_v62 = vld [vmem:[%s2806_s11 + $0x8] sm:$0xff]  ;;  %v1614_v1 = vld [vmem:[%s2806_s11 + $0x18] sm:$0xff] }
 0x697   : > { %1478 = vmatpush1.bf16.msra.mxu0 %v2714_v14  ;;  %1519 = vmatpush1.bf16.msra.mxu1 %v2718_v15 }
 0x698   : > { %1479 = vmatprep.subr.bf16.mxu0 %v2722_v16  ;;  %1520 = vmatprep.subr.bf16.mxu1 %v2191_v2 }
 0x69b   : > { %1480 = vmatpush1.bf16.msra.mxu0 %v2192_v8  ;;  %1521 = vmatpush1.bf16.msra.mxu1 %v2193_v4  ;;  %v2238_v8 = vmov 0.0   ;;  %v1615_v4 = vld [vmem:[%s2806_s11 + $0x20] sm:$0xff] }
 0x69c   : > { %1481 = vmatprep.subr.bf16.mxu0 %v2194_v5  ;;  %1522 = vmatprep.subr.bf16.mxu1 %v2195_v6  ;;  %v1616_v5 = vld [vmem:[%s2806_s11 + $0x28] sm:$0xff] }
 0x69d   : > { %v1956_v6 = vpack.c.bf16 %v1616_v5, %v1615_v4 }
 0x69f   : > { %1482 = vmatpush1.bf16.msra.mxu0 %v2196_v7  ;;  %1523 = vmatpush1.bf16.msra.mxu1 %v2197_v42  ;;  %v1617_v7 = vld [vmem:[%s2806_s11 + $0x30] sm:$0xff]  ;;  %v1618_v42 = vld [vmem:[%s2806_s11 + $0x38] sm:$0xff] }
 0x6a0   : > { %1483 = vmatprep.subr.bf16.mxu0 %v2198_v52  ;;  %1524 = vmatprep.subr.bf16.mxu1 %v2199_v58  ;;  %v1959_v52 = vpack.c.bf16 %v1618_v42, %v1617_v7  ;;  %v1619_v58 = vld [vmem:[%s2806_s11 + $0x40] sm:$0xff] }
 0x6a3   : > { %1484 = vmatpush1.bf16.msra.mxu0 %v2200_v61  ;;  %1525 = vmatpush1.bf16.msra.mxu1 %v2201_v43  ;;  %v1620_v61 = vld [vmem:[%s2806_s11 + $0x48] sm:$0xff] }
 0x6a4   : > { %1485 = vmatprep.subr.bf16.mxu0 %v2202_v45  ;;  %1526 = vmatprep.subr.bf16.mxu1 %v2203_v44  ;;  %v1962_v43 = vpack.c.bf16 %v1620_v61, %v1619_v58  ;;  %v1621_v45 = vld [vmem:[%s2806_s11 + $0x50] sm:$0xff]  ;;  %v1622_v44 = vld [vmem:[%s2806_s11 + $0x58] sm:$0xff] }
 0x6a7   : > { %1486 = vmatpush1.bf16.msra.mxu0 %v2204_v46  ;;  %1527 = vmatpush1.bf16.msra.mxu1 %v2205_v47  ;;  %v1965_v46 = vpack.c.bf16 %v1622_v44, %v1621_v45  ;;  %v1623_v47 = vld [vmem:[%s2806_s11 + $0x60] sm:$0xff] }
 0x6a8   : > { %1487 = vmatprep.subr.bf16.mxu0 %v2206_v50  ;;  %1528 = vmatprep.subr.bf16.mxu1 %v2207_v51  ;;  %v1624_v50 = vld [vmem:[%s2806_s11 + $0x68] sm:$0xff] }
 0x6a9   : > { %v1968_v51 = vpack.c.bf16 %v1624_v50, %v1623_v47 }
 0x6ab   : > { %1488 = vmatpush1.bf16.msra.mxu0 %v2208_v11  ;;  %1529 = vmatpush1.bf16.msra.mxu1 %v2209_v12  ;;  %v1625_v11 = vld [vmem:[%s2806_s11 + $0x70] sm:$0xff]  ;;  %v1626_v12 = vld [vmem:[%s2806_s11 + $0x78] sm:$0xff] }
 0x6ac   : > { %1949 = vmatprep.subr.bf16.mxu0 %v2236_v63 }
 0x761   : > { %v1364_v13 = vpop.f32.mrb[24].mxu0  ;;  %v1405_v14 = vpop.f32.mrb[24].mxu1 }
 0x762   : > { %v1366_v15 = vpop.f32.mrb[25].mxu0  ;;  %v1407_v16 = vpop.f32.mrb[25].mxu1 }
 0x763   : > { %v1416_v22 = vcombine.low %v1364_v13, %v1366_v15  ;;  %v1417_v23 = vcombine.low %v1405_v14, %v1407_v16  ;;  %v1368_v24 = vpop.f32.mrb[26].mxu0  ;;  %v1409_v25 = vpop.f32.mrb[26].mxu1  ;;  %v1971_v13 = vpack.c.bf16 %v1626_v12, %v1625_v11 }
 0x764   : > { %v1369_v26 = vpop.f32.mrb[27].mxu0  ;;  %v1410_v27 = vpop.f32.mrb[27].mxu1 }
 0x765   : > { %v1424_v28 = vrot.slane %v1416_v22, %v2479_v48  ;;  %v1431_v29 = vrot.slane %v1417_v23, %v2479_v48 }
 0x767   : > { %v1432_v31 = vcombine.low %v1424_v28, %v1431_v29 }
 0x769   : > { %v1434_v32 = vadd.f32 %v1432_v31, %v1328_v30  ;;  %v1471_v31 = vld [vmem:[%s1470_s17] sm:$0xff] }
 0x76b   : > { %v1876_v33 = vmul.f32 -1.442695, %v1434_v32  ;;  %v1442_v34 = vrot.slane %v1434_v32, 2  ;;  %v1453_v36 = vrot.slane %v1434_v32, 6  ;;  %v1450_v39 = vrot.slane %v1434_v32, 4 }
 0x76d   : > { %2146 = vpow2.f32 %v1876_v33  ;;  %v1877_v35 = vmul.f32 -1.442695, %v1442_v34  ;;  %v1878_v37 = vmul.f32 -1.442695, %v1453_v36 }
 0x76f   : > { %2148 = vpow2.f32 %v1877_v35 }
 0x770   : > { %2150 = vpow2.f32 %v1878_v37 }
 0x777   : > { %v2147_v38 = vpop.eup %2146 }
 0x778   : > { %v1438_v40 = vadd.f32 1.0, %v2147_v38 }
 0x779   : > { %v2149_v17 = vpop.eup %2148 }
 0x77a   : > { %2152 = vrcp.f32 %v1438_v40  ;;  %v1447_v18 = vadd.f32 1.0, %v2149_v17  ;;  %v2151_v19 = vpop.eup %2150 }
 0x77b   : > { %2154 = vtanh.f32 %v1450_v39  ;;  %v1458_v3 = vadd.f32 1.0, %v2151_v19 }
 0x77c   : > { %2156 = vrcp.f32 %v1447_v18 }
 0x77d   : > { %2158 = vrcp.f32 %v1458_v3 }
 0x784   : > { %v2153_v20 = vpop.eup %2152 }
 0x785   : > { %v2155_v21 = vpop.eup %2154 }
 0x786   : > { %v2157_v9 = vpop.eup %2156  ;;  %v1462_v41 = vmul.f32 %v2155_v21, %v2153_v20 }
 0x787   : > { %v1461_v10 = vmul.f32 %v2157_v9, %v2752_v60  ;;  %v2159_v54 = vpop.eup %2158  ;;  %v1611_v60 = vld [vmem:[%s2806_s11] sm:$0xff] }
 0x788   : > { %v1950_v49 = vpack.c.bf16 %v1612_v62, %v1611_v60 }
 0x789   : > { %v2796_v53 = vadd.f32 %v1462_v41, %v1461_v10 }
 0x78b   : > { %2160 = vtanh.f32 %v2796_v53 }
 0x795   : > { %v2161_v55 = vpop.eup %2160 }
 0x796   : > { %v1465_v56 = vmul.f32 %v2161_v55, %v2159_v54 }
 0x798   : > { %v1472_v57 = vpack.c.bf16 %v1465_v56, %v1465_v56  ;;  %v2800_v59 = vadd.f32 %v1465_v56, %v2756_v0  ;;  %v1613_v0 = vld [vmem:[%s2806_s11 + $0x10] sm:$0xff] }
 0x799   : > { %v1953_v2 = vpack.c.bf16 %v1614_v1, %v1613_v0 }
 0x79a   : > { %1506 = vmatmul.mubr.bf16.vlgmr.msra.gmra.mrb[28].mxu0 %v1472_v57  ;;  %1547 = vmatmul.mubr.bf16.vlgmr.msra.gmra.mrb[28].mxu1 %v1472_v57 }
 0x79b   : > { %1951 = vmatpush3.bf16.msra.mxu0 %v1950_v49  ;;  %1946 = vmatprep.mubr.msk.f32.mxu0 %vm2237_vm0, %v2238_v8 }
 0x79c   : > { %1952 = vmatprep.subr.bf16.mxu0 %v2236_v63 }
 0x79f   : > { %1954 = vmatpush3.bf16.msra.mxu0 %v1953_v2 }
 0x7a0   : > { %1955 = vmatprep.subr.bf16.mxu0 %v2236_v63 }
 0x7a3   : > { %1957 = vmatpush3.bf16.msra.mxu0 %v1956_v6 }
 0x7a4   : > { %1958 = vmatprep.subr.bf16.mxu0 %v2236_v63 }
 0x7a7   : > { %1960 = vmatpush3.bf16.msra.mxu0 %v1959_v52 }
 0x7a8   : > { %1961 = vmatprep.subr.bf16.mxu0 %v2236_v63 }
 0x7ab   : > { %1963 = vmatpush3.bf16.msra.mxu0 %v1962_v43 }
 0x7ac   : > { %1964 = vmatprep.subr.bf16.mxu0 %v2236_v63 }
 0x7af   : > { %1966 = vmatpush3.bf16.msra.mxu0 %v1965_v46 }
 0x7b0   : > { %1967 = vmatprep.subr.bf16.mxu0 %v2236_v63 }
 0x7b3   : > { %1969 = vmatpush3.bf16.msra.mxu0 %v1968_v51 }
 0x7b4   : > { %1970 = vmatprep.subr.bf16.mxu0 %v2236_v63 }
 0x7b7   : > { %1972 = vmatpush3.bf16.msra.mxu0 %v1971_v13 }
 0x86d   : > { %v1507_v14 = vpop.f32.mrb[28].mxu0  ;;  %v1548_v15 = vpop.f32.mrb[28].mxu1 }
 0x86e   : > { %v1509_v16 = vpop.f32.mrb[29].mxu0  ;;  %v1550_v22 = vpop.f32.mrb[29].mxu1 }
 0x86f   : > { %v1559_v23 = vcombine.low %v1507_v14, %v1509_v16  ;;  %v1560_v24 = vcombine.low %v1548_v15, %v1550_v22  ;;  %v1511_v25 = vpop.f32.mrb[30].mxu0  ;;  %v1552_v26 = vpop.f32.mrb[30].mxu1 }
 0x870   : > { %v1512_v27 = vpop.f32.mrb[31].mxu0  ;;  %v1553_v28 = vpop.f32.mrb[31].mxu1 }
 0x871   : > { %v1567_v29 = vrot.slane %v1559_v23, %v2479_v48  ;;  %v1574_v30 = vrot.slane %v1560_v24, %v2479_v48 }
 0x873   : > { %v1575_v32 = vcombine.low %v1567_v29, %v1574_v30 }
 0x875   : > { %v1577_v33 = vadd.f32 %v1575_v32, %v1471_v31 }
 0x877   : > { %v1881_v34 = vmul.f32 -1.442695, %v1577_v33  ;;  %v1585_v35 = vrot.slane %v1577_v33, 2  ;;  %v1596_v37 = vrot.slane %v1577_v33, 6  ;;  %v1593_v40 = vrot.slane %v1577_v33, 4 }
 0x879   : > { %2162 = vpow2.f32 %v1881_v34  ;;  %v1882_v36 = vmul.f32 -1.442695, %v1585_v35  ;;  %v1883_v38 = vmul.f32 -1.442695, %v1596_v37 }
 0x87b   : > { %2164 = vpow2.f32 %v1882_v36 }
 0x87c   : > { %2166 = vpow2.f32 %v1883_v38 }
 0x883   : > { %v2163_v39 = vpop.eup %2162 }
 0x884   : > { %v1581_v17 = vadd.f32 1.0, %v2163_v39 }
 0x885   : > { %v2165_v18 = vpop.eup %2164 }
 0x886   : > { %2168 = vrcp.f32 %v1581_v17  ;;  %v1590_v19 = vadd.f32 1.0, %v2165_v18  ;;  %v2167_v48 = vpop.eup %2166 }
 0x887   : > { %2170 = vtanh.f32 %v1593_v40  ;;  %v1601_v3 = vadd.f32 1.0, %v2167_v48 }
 0x888   : > { %2172 = vrcp.f32 %v1590_v19 }
 0x889   : > { %2174 = vrcp.f32 %v1601_v3 }
 0x890   : > { %v2169_v20 = vpop.eup %2168 }
 0x891   : > { %v2171_v21 = vpop.eup %2170 }
 0x892   : > { %v2173_v9 = vpop.eup %2172  ;;  %v1605_v41 = vmul.f32 %v2171_v21, %v2169_v20 }
 0x893   : > { %v1604_v10 = vmul.f32 %v2173_v9, %v2796_v53  ;;  %v2175_v55 = vpop.eup %2174 }
 0x895   : > { %v1606_v54 = vadd.f32 %v1605_v41, %v1604_v10 }
 0x897   : > { %2176 = vtanh.f32 %v1606_v54 }
 0x8a1   : > { %v2177_v56 = vpop.eup %2176 }
 0x8a2   : > { %v1608_v57 = vmul.f32 %v2177_v56, %v2175_v55 }
 0x8a4   : > { %v1609_v60 = vadd.f32 %v1608_v57, %v2800_v59 }
 0x8a6   : > { %v1610_v62 = vmul.f32 0.125, %v1609_v60 }
 0x8a8   : > { %1947 = vmatmul.mubr.f32.vlgmr.msra.gmra.mrb[32].mxu0 %v1610_v62 }
 0x97b   : > { %v1693_v49 = vpop.f32.mrb[32].mxu0 }
 0x97c   : > { %1698 = vst.msk [vmem:[%s272_s20] sm:$0x3] %vm1697_vm1, %v1693_v49  ;;  %v1948_v53 = vpop.f32.mrb[33].mxu0 }
 0x97d PF: > { %p10_p10 = scmp.ge.s32.totalorder %s2278_s16, 4   ;;  %s2849_s12 = smov %s2228_s13 }
 0x97e   : > { %s2850_s13 = smov %s2287_s19  ;;  %s2851_s14 = smov %s2278_s16 }
 0x97f   :  { %12 = sbr.rel (!%p10_p10) target bundleno = 2 (0x2), region = 119 }

</bundles_post_ra>
